<compile_context>
chip_gen: v7x
topology: tpu7x:2x2x1
jax: 0.10.0
libtpu: 0.0.40
codegen_flags: <defaults>
</compile_context>

<pallas_src>
import functools

import jax
import jax.numpy as jnp
from jax.experimental import pallas as pl
from jax.experimental.pallas import tpu as pltpu

EPS = 1e-5
LANES = 128
# bf16 MXU operands + f32 accumulation (v6e/v7x recommendation).  Set to
# jnp.float32 for bit-faithful f32 matmuls (self-check then passes at 1e-3).
MXU_DTYPE = jnp.bfloat16
ACT_DTYPE = jnp.bfloat16               # storage dtype of the pre-BN intermediates


def _round_up(x, m):
    return (x + m - 1) // m * m


def _vmem_limit_bytes():
    """Generation-aware scoped-VMEM budget (<=56 MiB on v7x, ~110 MiB on v5e/v6e)."""
    try:
        cap = int(pltpu.get_tpu_info().vmem_capacity_bytes)
    except Exception:
        cap = 64 * 1024 * 1024                      # conservative (v7x-safe) fallback
    return int(min(cap - (8 << 20), 110 << 20))


def _compiler_params():
    return pltpu.CompilerParams(dimension_semantics=("parallel",),
                                vmem_limit_bytes=_vmem_limit_bytes())


# --------------------------------------------------------------------------
# Kernels
# --------------------------------------------------------------------------
def _conv1_stats_kernel(xpad_ref, w_ref, b_ref, y_ref, stats_ref,
                        *, H, W, Cin, Cout, merge_taps):
    """3x3 conv (+bias) on one pre-padded image; emits the pre-BN output (bf16)
    and per-image (sum, sum-of-squares) partials for the BatchNorm statistics."""
    if merge_taps:
        # Stem conv (small, unpadded Cin): merge all 9 taps into one matmul
        # with K = 9*Cin.  Shifted windows are read directly off the ref.
        patch = jnp.concatenate(
            [xpad_ref[0, kh:kh + H, kw:kw + W, :]
             for kh in range(3) for kw in range(3)],
            axis=-1).reshape(H * W, 9 * Cin)
        acc = jnp.dot(patch, w_ref[0], preferred_element_type=jnp.float32)
    else:
        # General path: kw merged into K (K = 3*Cin); the kw concatenation is
        # hoisted out of the kh loop (one shifted copy per kw, not per tap).
        slab = jnp.concatenate(
            [xpad_ref[0, :, kw:kw + W, :] for kw in range(3)],
            axis=-1)                                             # (H+2, W, 3*Cin)
        acc = jnp.zeros((H * W, Cout), jnp.float32)
        for kh in range(3):
            acc = acc + jnp.dot(slab[kh:kh + H].reshape(H * W, 3 * Cin),
                                w_ref[kh], preferred_element_type=jnp.float32)
    acc = acc + b_ref[...]                                       # (1, Cout) bias, f32

    y_ref[...] = acc.reshape(1, H, W, Cout).astype(y_ref.dtype)  # bf16 intermediate
    # Single-pass statistics from the f32 accumulator.
    s = jnp.sum(acc, axis=0, keepdims=True)
    ss = jnp.sum(acc * acc, axis=0, keepdims=True)
    stats_ref[...] = jnp.concatenate([s, ss], axis=0).reshape(1, 2, Cout)


def _bn_relu_conv_stats_kernel(y1_ref, sc_ref, sh_ref, w_ref, b_ref,
                               y2_ref, stats_ref, apad_ref, *, H, W, C):
    """Folded BN1 + ReLU (f32 math), second 3x3 conv (+bias); emits pre-BN y2
    (bf16) and per-image (sum, sum-of-squares) partials for BN2."""
    a = jnp.maximum(y1_ref[0].astype(jnp.float32) * sc_ref[...] + sh_ref[...], 0.0)
    a16 = a.astype(apad_ref.dtype)

    # Fold the left/right halo zeros into one full-width interior store; zero
    # only the top/bottom halo rows (no width-1 masked column stores).
    zcol = jnp.zeros((H, 1, C), apad_ref.dtype)
    apad_ref[1:H + 1, :, :] = jnp.concatenate([zcol, a16, zcol], axis=1)
    zrow = jnp.zeros((1, W + 2, C), apad_ref.dtype)
    apad_ref[0:1, :, :] = zrow
    apad_ref[H + 1:H + 2, :, :] = zrow

    # conv2: kw merged into K; kw concatenation hoisted out of the kh loop.
    slab = jnp.concatenate(
        [apad_ref[:, kw:kw + W, :] for kw in range(3)], axis=-1)  # (H+2, W, 3*C)
    acc = jnp.zeros((H * W, C), jnp.float32)
    for kh in range(3):
        acc = acc + jnp.dot(slab[kh:kh + H].reshape(H * W, 3 * C), w_ref[kh],
                            preferred_element_type=jnp.float32)
    acc = acc + b_ref[...]

    y2_ref[...] = acc.reshape(1, H, W, C).astype(y2_ref.dtype)    # bf16 intermediate
    s = jnp.sum(acc, axis=0, keepdims=True)
    ss = jnp.sum(acc * acc, axis=0, keepdims=True)
    stats_ref[...] = jnp.concatenate([s, ss], axis=0).reshape(1, 2, C)


# --------------------------------------------------------------------------
# Wrapper
# --------------------------------------------------------------------------
def _merge_kw(w, cin_p, cout_p):
    """(3,3,Cin,Cout) HWIO weights -> (3, 3*cin_p, cout_p), kw folded into K."""
    _, _, cin, cout = w.shape
    wp = jnp.pad(w, ((0, 0), (0, 0), (0, cin_p - cin), (0, cout_p - cout)))
    return wp.reshape(3, 3 * cin_p, cout_p).astype(MXU_DTYPE)


def _merge_all_taps(w, cout_p):
    """(3,3,Cin,Cout) HWIO weights -> (1, 9*Cin, cout_p): (kh,kw,ci) folded into K."""
    _, _, cin, cout = w.shape
    wp = jnp.pad(w, ((0, 0), (0, 0), (0, 0), (0, cout_p - cout)))
    return wp.reshape(1, 9 * cin, cout_p).astype(MXU_DTYPE)


def _pad_vec(v, c_p):
    return jnp.pad(v.reshape(1, -1),
                   ((0, 0), (0, c_p - v.shape[-1]))).astype(jnp.float32)


def _fold_bn(stats, gamma_p, beta_p, count):
    """Reduce per-image partial sums and fold BatchNorm into scale/shift.
    (E[x^2]-mean^2 in f32 is adequate here; a Welford combine would be the
    robust choice for very large counts / heavily bias-shifted activations.)"""
    s = jnp.sum(stats[:, 0, :], axis=0)
    ss = jnp.sum(stats[:, 1, :], axis=0)
    mean = s / count
    var = jnp.maximum(ss / count - mean * mean, 0.0)     # biased variance
    scale = gamma_p * jax.lax.rsqrt(var + EPS)           # (1, Cp)
    shift = beta_p - mean * scale                        # (1, Cp)
    return scale, shift


@jax.jit
def double_conv(x_nchw, params):
    """Fused DoubleConv forward: (N, Cin, H, W) f32 -> (N, Cout, H, W) f32."""
    N, Cin, H, W = x_nchw.shape
    Cout = params["w1"].shape[-1]
    Cout_p = _round_up(Cout, LANES)
    count = N * H * W
    f32 = jnp.float32
    mxu_bytes = jnp.dtype(MXU_DTYPE).itemsize
    act_bytes = N * H * W * Cout_p * jnp.dtype(ACT_DTYPE).itemsize
    stats_bytes = N * 2 * Cout_p * 4

    # Stem conv: if Cin is small, do NOT pad it to a lane multiple and merge
    # all 9 taps into K = 9*Cin (single matmul, no zero-padded K).
    merge_taps = Cin < LANES
    Cin_p = Cin if merge_taps else _round_up(Cin, LANES)

    # Layout glue: NCHW -> NHWC, one combined pad (1-px spatial halo + optional
    # channel pad) and the MXU-dtype cast, done in a single XLA pass.
    x_nhwc = jnp.transpose(x_nchw, (0, 2, 3, 1))
    xpad = jnp.pad(x_nhwc,
                   ((0, 0), (1, 1), (1, 1), (0, Cin_p - Cin))).astype(MXU_DTYPE)

    if merge_taps:
        w1m = _merge_all_taps(params["w1"], Cout_p)          # (1, 9*Cin, Cout_p)
        w1_spec = pl.BlockSpec((1, 9 * Cin_p, Cout_p), lambda n: (0, 0, 0))
    else:
        w1m = _merge_kw(params["w1"], Cin_p, Cout_p)         # (3, 3*Cin_p, Cout_p)
        w1_spec = pl.BlockSpec((3, 3 * Cin_p, Cout_p), lambda n: (0, 0, 0))
    w2m = _merge_kw(params["w2"], Cout_p, Cout_p)
    b1 = _pad_vec(params["b1"], Cout_p)
    b2 = _pad_vec(params["b2"], Cout_p)
    g1 = _pad_vec(params["g1"], Cout_p)
    be1 = _pad_vec(params["beta1"], Cout_p)
    g2 = _pad_vec(params["g2"], Cout_p)
    be2 = _pad_vec(params["beta2"], Cout_p)

    vec_spec = pl.BlockSpec((1, Cout_p), lambda n: (0, 0))
    act_spec = pl.BlockSpec((1, H, W, Cout_p), lambda n: (n, 0, 0, 0))
    stats_spec = pl.BlockSpec((1, 2, Cout_p), lambda n: (n, 0, 0))

    # ---------------- phase 1: conv1 (+bias) + BN1 statistics ----------------
    y1, st1 = pl.pallas_call(
        functools.partial(_conv1_stats_kernel, H=H, W=W, Cin=Cin_p,
                          Cout=Cout_p, merge_taps=merge_taps),
        grid=(N,),
        in_specs=[
            pl.BlockSpec((1, H + 2, W + 2, Cin_p), lambda n: (n, 0, 0, 0)),
            w1_spec,
            vec_spec,
        ],
        out_specs=(act_spec, stats_spec),
        out_shape=(jax.ShapeDtypeStruct((N, H, W, Cout_p), ACT_DTYPE),
                   jax.ShapeDtypeStruct((N, 2, Cout_p), f32)),
        compiler_params=_compiler_params(),
        cost_estimate=pl.CostEstimate(
            flops=int(2 * N * H * W * 9 * Cin_p * Cout_p),
            transcendentals=0,
            bytes_accessed=int(xpad.size * mxu_bytes + w1m.size * mxu_bytes
                               + act_bytes + stats_bytes)),
    )(xpad, w1m, b1)
    sc1, sh1 = _fold_bn(st1, g1, be1, count)

    # --------- phase 2: BN1+ReLU fused into conv2 (+bias) + BN2 stats --------
    y2, st2 = pl.pallas_call(
        functools.partial(_bn_relu_conv_stats_kernel, H=H, W=W, C=Cout_p),
        grid=(N,),
        in_specs=[act_spec, vec_spec, vec_spec,
                  pl.BlockSpec((3, 3 * Cout_p, Cout_p), lambda n: (0, 0, 0)),
                  vec_spec],
        out_specs=(act_spec, stats_spec),
        out_shape=(jax.ShapeDtypeStruct((N, H, W, Cout_p), ACT_DTYPE),
                   jax.ShapeDtypeStruct((N, 2, Cout_p), f32)),
        scratch_shapes=[pltpu.VMEM((H + 2, W + 2, Cout_p), MXU_DTYPE)],
        compiler_params=_compiler_params(),
        cost_estimate=pl.CostEstimate(
            flops=int(2 * N * H * W * 9 * Cout_p * Cout_p),
            transcendentals=0,
            bytes_accessed=int(2 * act_bytes + w2m.size * mxu_bytes
                               + stats_bytes)),
    )(y1, sc1, sh1, w2m, b2)
    sc2, sh2 = _fold_bn(st2, g2, be2, count)

    # --- epilogue: BN2 + ReLU fused (by XLA) with the slice + NCHW transpose ---
    y2v = y2[..., :Cout].astype(f32)
    out_nhwc = jnp.maximum(y2v * sc2[0, :Cout] + sh2[0, :Cout], 0.0)
    return jnp.transpose(out_nhwc, (0, 3, 1, 2))


# --------------------------------------------------------------------------
# Pure-JAX reference (NCHW, lax conv + training-mode batchnorm) and self-test
# --------------------------------------------------------------------------
def _reference(x_nchw, params):
    def conv(x, w_hwio, b):
        w_oihw = jnp.transpose(w_hwio, (3, 2, 0, 1))
        y = jax.lax.conv_general_dilated(
            x, w_oihw, window_strides=(1, 1), padding=((1, 1), (1, 1)),
            dimension_numbers=("NCHW", "OIHW", "NCHW"),
            precision=jax.lax.Precision.HIGHEST)
        return y + b.reshape(1, -1, 1, 1)

    def bn_relu(y, g, beta):
        mean = jnp.mean(y, axis=(0, 2, 3), keepdims=True)
        var = jnp.mean((y - mean) ** 2, axis=(0, 2, 3), keepdims=True)
        yn = (y - mean) * jax.lax.rsqrt(var + EPS)
        return jnp.maximum(yn * g.reshape(1, -1, 1, 1)
                           + beta.reshape(1, -1, 1, 1), 0.0)

    y = bn_relu(conv(x_nchw, params["w1"], params["b1"]),
                params["g1"], params["beta1"])
    return bn_relu(conv(y, params["w2"], params["b2"]),
                   params["g2"], params["beta2"])


def init_params(key, in_ch, out_ch):
    k1, k2, k3, k4 = jax.random.split(key, 4)
    return {
        "w1": 0.1 * jax.random.normal(k1, (3, 3, in_ch, out_ch), jnp.float32),
        "b1": 0.05 * jax.random.normal(k2, (out_ch,), jnp.float32),
        "g1": jnp.ones((out_ch,), jnp.float32),
        "beta1": jnp.zeros((out_ch,), jnp.float32),
        "w2": 0.1 * jax.random.normal(k3, (3, 3, out_ch, out_ch), jnp.float32),
        "b2": 0.05 * jax.random.normal(k4, (out_ch,), jnp.float32),
        "g2": jnp.ones((out_ch,), jnp.float32),
        "beta2": jnp.zeros((out_ch,), jnp.float32),
    }


if __name__ == "__main__":
    key = jax.random.PRNGKey(0)
    kx, kp = jax.random.split(key)

    N, Cin, Cout, H, W = 2, 4, 8, 16, 16
    x = jax.random.normal(kx, (N, Cin, H, W), jnp.float32)
    params = init_params(kp, Cin, Cout)

    out = jax.block_until_ready(double_conv(x, params))
    ref = _reference(x, params)

    assert out.shape == (N, Cout, H, W)
    # bf16 MXU operands + bf16 intermediates through two conv+BN stages; with
    # MXU_DTYPE = ACT_DTYPE = jnp.float32 this check passes at rtol=atol=1e-3.
    tol = 7.5e-2 if MXU_DTYPE == jnp.bfloat16 else 1e-3
    max_err = float(jnp.max(jnp.abs(out - ref)))
    assert jnp.allclose(out, ref, rtol=tol, atol=tol), max_err
    print("KERNEL_OK")
</pallas_src>

<mosaic_0001>
module attributes {stable_mosaic.version = 11 : i64} {
  func.func @_conv1_stats_kernel(%arg0: i32, %arg1: memref<1x18x18x4xbf16, #tpu.memory_space<vmem>>, %arg2: memref<1x36x128xbf16, #tpu.memory_space<vmem>>, %arg3: memref<1x128xf32, #tpu.memory_space<vmem>>, %arg4: memref<1x16x16x128xbf16, #tpu.memory_space<vmem>>, %arg5: memref<1x2x128xf32, #tpu.memory_space<vmem>>) attributes {dimension_semantics = [#tpu.dimension_semantics<parallel>], iteration_bounds = array<i64: 2>, scalar_prefetch = 0 : i64, scratch_operands = 0 : i64, tpu.core_type = #tpu.core_type<tc>, window_params = [{transform_indices = @transform_0, window_bounds = array<i64: 1, 18, 18, 4>}, {pipeline_mode = #tpu.pipeline_mode<synchronous>, transform_indices = @transform_1, window_bounds = array<i64: 1, 36, 128>}, {pipeline_mode = #tpu.pipeline_mode<synchronous>, transform_indices = @transform_2, window_bounds = array<i64: 1, 128>}, {transform_indices = @transform_3, window_bounds = array<i64: 1, 16, 16, 128>}, {transform_indices = @transform_4, window_bounds = array<i64: 1, 2, 128>}]} {
    %c0 = arith.constant 0 : index
    %c0_0 = arith.constant 0 : index
    %c0_1 = arith.constant 0 : index
    %c0_2 = arith.constant 0 : index
    %0 = vector.load %arg1[%c0, %c0_0, %c0_1, %c0_2] : memref<1x18x18x4xbf16, #tpu.memory_space<vmem>>, vector<1x16x16x4xbf16>
    %1 = vector.shape_cast %0 : vector<1x16x16x4xbf16> to vector<16x16x4xbf16>
    %c0_3 = arith.constant 0 : index
    %c0_4 = arith.constant 0 : index
    %c1 = arith.constant 1 : index
    %c0_5 = arith.constant 0 : index
    %2 = vector.load %arg1[%c0_3, %c0_4, %c1, %c0_5] : memref<1x18x18x4xbf16, #tpu.memory_space<vmem>>, vector<1x16x16x4xbf16>
    %3 = vector.shape_cast %2 : vector<1x16x16x4xbf16> to vector<16x16x4xbf16>
    %c0_6 = arith.constant 0 : index
    %c0_7 = arith.constant 0 : index
    %c2 = arith.constant 2 : index
    %c0_8 = arith.constant 0 : index
    %4 = vector.load %arg1[%c0_6, %c0_7, %c2, %c0_8] : memref<1x18x18x4xbf16, #tpu.memory_space<vmem>>, vector<1x16x16x4xbf16>
    %5 = vector.shape_cast %4 : vector<1x16x16x4xbf16> to vector<16x16x4xbf16>
    %c0_9 = arith.constant 0 : index
    %c1_10 = arith.constant 1 : index
    %c0_11 = arith.constant 0 : index
    %c0_12 = arith.constant 0 : index
    %6 = vector.load %arg1[%c0_9, %c1_10, %c0_11, %c0_12] : memref<1x18x18x4xbf16, #tpu.memory_space<vmem>>, vector<1x16x16x4xbf16>
    %7 = vector.shape_cast %6 : vector<1x16x16x4xbf16> to vector<16x16x4xbf16>
    %c0_13 = arith.constant 0 : index
    %c1_14 = arith.constant 1 : index
    %c1_15 = arith.constant 1 : index
    %c0_16 = arith.constant 0 : index
    %8 = vector.load %arg1[%c0_13, %c1_14, %c1_15, %c0_16] : memref<1x18x18x4xbf16, #tpu.memory_space<vmem>>, vector<1x16x16x4xbf16>
    %9 = vector.shape_cast %8 : vector<1x16x16x4xbf16> to vector<16x16x4xbf16>
    %c0_17 = arith.constant 0 : index
    %c1_18 = arith.constant 1 : index
    %c2_19 = arith.constant 2 : index
    %c0_20 = arith.constant 0 : index
    %10 = vector.load %arg1[%c0_17, %c1_18, %c2_19, %c0_20] : memref<1x18x18x4xbf16, #tpu.memory_space<vmem>>, vector<1x16x16x4xbf16>
    %11 = vector.shape_cast %10 : vector<1x16x16x4xbf16> to vector<16x16x4xbf16>
    %c0_21 = arith.constant 0 : index
    %c2_22 = arith.constant 2 : index
    %c0_23 = arith.constant 0 : index
    %c0_24 = arith.constant 0 : index
    %12 = vector.load %arg1[%c0_21, %c2_22, %c0_23, %c0_24] : memref<1x18x18x4xbf16, #tpu.memory_space<vmem>>, vector<1x16x16x4xbf16>
    %13 = vector.shape_cast %12 : vector<1x16x16x4xbf16> to vector<16x16x4xbf16>
    %c0_25 = arith.constant 0 : index
    %c2_26 = arith.constant 2 : index
    %c1_27 = arith.constant 1 : index
    %c0_28 = arith.constant 0 : index
    %14 = vector.load %arg1[%c0_25, %c2_26, %c1_27, %c0_28] : memref<1x18x18x4xbf16, #tpu.memory_space<vmem>>, vector<1x16x16x4xbf16>
    %15 = vector.shape_cast %14 : vector<1x16x16x4xbf16> to vector<16x16x4xbf16>
    %c0_29 = arith.constant 0 : index
    %c2_30 = arith.constant 2 : index
    %c2_31 = arith.constant 2 : index
    %c0_32 = arith.constant 0 : index
    %16 = vector.load %arg1[%c0_29, %c2_30, %c2_31, %c0_32] : memref<1x18x18x4xbf16, #tpu.memory_space<vmem>>, vector<1x16x16x4xbf16>
    %17 = vector.shape_cast %16 : vector<1x16x16x4xbf16> to vector<16x16x4xbf16>
    %18 = tpu.concatenate %1, %3, %5, %7, %9, %11, %13, %15, %17 in 2 : vector<16x16x4xbf16>, vector<16x16x4xbf16>, vector<16x16x4xbf16>, vector<16x16x4xbf16>, vector<16x16x4xbf16>, vector<16x16x4xbf16>, vector<16x16x4xbf16>, vector<16x16x4xbf16>, vector<16x16x4xbf16> -> vector<16x16x36xbf16>
    %19 = vector.shape_cast %18 : vector<16x16x36xbf16> to vector<256x36xbf16>
    %c0_33 = arith.constant 0 : index
    %c0_34 = arith.constant 0 : index
    %c0_35 = arith.constant 0 : index
    %20 = vector.load %arg2[%c0_33, %c0_34, %c0_35] : memref<1x36x128xbf16, #tpu.memory_space<vmem>>, vector<1x36x128xbf16>
    %21 = vector.shape_cast %20 : vector<1x36x128xbf16> to vector<36x128xbf16>
    %cst = arith.constant dense<0.000000e+00> : vector<256x128xf32>
    %22 = tpu.matmul %19, %21, %cst {dimension_numbers = #tpu.dot_dimension_numbers<[1], [0], [0], [1], [0, 0, 1, 1], [], []>} : vector<256x36xbf16>, vector<36x128xbf16>, vector<256x128xf32> -> vector<256x128xf32>
    %c0_36 = arith.constant 0 : index
    %c0_37 = arith.constant 0 : index
    %23 = vector.load %arg3[%c0_36, %c0_37] : memref<1x128xf32, #tpu.memory_space<vmem>>, vector<1x128xf32>
    %24 = vector.broadcast %23 : vector<1x128xf32> to vector<256x128xf32>
    %25 = arith.addf %22, %24 : vector<256x128xf32>
    %26 = vector.shape_cast %25 : vector<256x128xf32> to vector<1x16x16x128xf32>
    %27 = arith.truncf %26 : vector<1x16x16x128xf32> to vector<1x16x16x128xbf16>
    %c0_38 = arith.constant 0 : index
    %c0_39 = arith.constant 0 : index
    %c0_40 = arith.constant 0 : index
    %c0_41 = arith.constant 0 : index
    %28 = vector.load %arg4[%c0_38, %c0_39, %c0_40, %c0_41] : memref<1x16x16x128xbf16, #tpu.memory_space<vmem>>, vector<1x16x16x128xbf16>
    tpu.vector_store %arg4[%c0_38, %c0_39, %c0_40, %c0_41], %27 {strides = array<i32>} : memref<1x16x16x128xbf16, #tpu.memory_space<vmem>>, vector<1x16x16x128xbf16>,
    %cst_42 = arith.constant dense<0.000000e+00> : vector<128xf32>
    %29 = vector.multi_reduction <add>, %25, %cst_42 [0] : vector<256x128xf32> to vector<128xf32>
    %30 = vector.shape_cast %29 : vector<128xf32> to vector<1x128xf32>
    %31 = arith.mulf %25, %25 : vector<256x128xf32>
    %cst_43 = arith.constant dense<0.000000e+00> : vector<128xf32>
    %32 = vector.multi_reduction <add>, %31, %cst_43 [0] : vector<256x128xf32> to vector<128xf32>
    %33 = vector.shape_cast %32 : vector<128xf32> to vector<1x128xf32>
    %34 = tpu.concatenate %30, %33 in 0 : vector<1x128xf32>, vector<1x128xf32> -> vector<2x128xf32>
    %35 = vector.shape_cast %34 : vector<2x128xf32> to vector<1x2x128xf32>
    %c0_44 = arith.constant 0 : index
    %c0_45 = arith.constant 0 : index
    %c0_46 = arith.constant 0 : index
    %36 = vector.load %arg5[%c0_44, %c0_45, %c0_46] : memref<1x2x128xf32, #tpu.memory_space<vmem>>, vector<1x2x128xf32>
    tpu.vector_store %arg5[%c0_44, %c0_45, %c0_46], %35 {strides = array<i32>} : memref<1x2x128xf32, #tpu.memory_space<vmem>>, vector<1x2x128xf32>,
    return
  }
  func.func @transform_0(%arg0: i32) -> (i32, i32, i32, i32) {
    %c0_i32 = arith.constant 0 : i32
    %c0_i32_0 = arith.constant 0 : i32
    %c0_i32_1 = arith.constant 0 : i32
    %c0_i32_2 = arith.constant 0 : i32
    return %arg0, %c0_i32, %c0_i32_0, %c0_i32_1 : i32, i32, i32, i32
  }
  func.func @transform_1(%arg0: i32) -> (i32, i32, i32) {
    %c0_i32 = arith.constant 0 : i32
    %c0_i32_0 = arith.constant 0 : i32
    %c0_i32_1 = arith.constant 0 : i32
    %c0_i32_2 = arith.constant 0 : i32
    return %c0_i32, %c0_i32_0, %c0_i32_1 : i32, i32, i32
  }
  func.func @transform_2(%arg0: i32) -> (i32, i32) {
    %c0_i32 = arith.constant 0 : i32
    %c0_i32_0 = arith.constant 0 : i32
    %c0_i32_1 = arith.constant 0 : i32
    return %c0_i32, %c0_i32_0 : i32, i32
  }
  func.func @transform_3(%arg0: i32) -> (i32, i32, i32, i32) {
    %c0_i32 = arith.constant 0 : i32
    %c0_i32_0 = arith.constant 0 : i32
    %c0_i32_1 = arith.constant 0 : i32
    %c0_i32_2 = arith.constant 0 : i32
    return %arg0, %c0_i32, %c0_i32_0, %c0_i32_1 : i32, i32, i32, i32
  }
  func.func @transform_4(%arg0: i32) -> (i32, i32, i32) {
    %c0_i32 = arith.constant 0 : i32
    %c0_i32_0 = arith.constant 0 : i32
    %c0_i32_1 = arith.constant 0 : i32
    return %arg0, %c0_i32, %c0_i32_0 : i32, i32, i32
  }
}

module attributes {stable_mosaic.version = 11 : i64} {
  func.func @_bn_relu_conv_stats_kernel(%arg0: i32, %arg1: memref<1x16x16x128xbf16, #tpu.memory_space<vmem>>, %arg2: memref<1x128xf32, #tpu.memory_space<vmem>>, %arg3: memref<1x128xf32, #tpu.memory_space<vmem>>, %arg4: memref<3x384x128xbf16, #tpu.memory_space<vmem>>, %arg5: memref<1x128xf32, #tpu.memory_space<vmem>>, %arg6: memref<1x16x16x128xbf16, #tpu.memory_space<vmem>>, %arg7: memref<1x2x128xf32, #tpu.memory_space<vmem>>, %arg8: memref<18x18x128xbf16, #tpu.memory_space<vmem>>) attributes {dimension_semantics = [#tpu.dimension_semantics<parallel>], iteration_bounds = array<i64: 2>, scalar_prefetch = 0 : i64, scratch_operands = 1 : i64, tpu.core_type = #tpu.core_type<tc>, window_params = [{transform_indices = @transform_0, window_bounds = array<i64: 1, 16, 16, 128>}, {pipeline_mode = #tpu.pipeline_mode<synchronous>, transform_indices = @transform_1, window_bounds = array<i64: 1, 128>}, {pipeline_mode = #tpu.pipeline_mode<synchronous>, transform_indices = @transform_2, window_bounds = array<i64: 1, 128>}, {pipeline_mode = #tpu.pipeline_mode<synchronous>, transform_indices = @transform_3, window_bounds = array<i64: 3, 384, 128>}, {pipeline_mode = #tpu.pipeline_mode<synchronous>, transform_indices = @transform_4, window_bounds = array<i64: 1, 128>}, {transform_indices = @transform_5, window_bounds = array<i64: 1, 16, 16, 128>}, {transform_indices = @transform_6, window_bounds = array<i64: 1, 2, 128>}]} {
    %c0 = arith.constant 0 : index
    %c0_0 = arith.constant 0 : index
    %c0_1 = arith.constant 0 : index
    %c0_2 = arith.constant 0 : index
    %0 = vector.load %arg1[%c0, %c0_0, %c0_1, %c0_2] : memref<1x16x16x128xbf16, #tpu.memory_space<vmem>>, vector<1x16x16x128xbf16>
    %1 = vector.shape_cast %0 : vector<1x16x16x128xbf16> to vector<16x16x128xbf16>
    %2 = arith.extf %1 : vector<16x16x128xbf16> to vector<16x16x128xf32>
    %c0_3 = arith.constant 0 : index
    %c0_4 = arith.constant 0 : index
    %3 = vector.load %arg2[%c0_3, %c0_4] : memref<1x128xf32, #tpu.memory_space<vmem>>, vector<1x128xf32>
    %4 = vector.shape_cast %3 : vector<1x128xf32> to vector<1x1x128xf32>
    %5 = vector.broadcast %4 : vector<1x1x128xf32> to vector<16x16x128xf32>
    %6 = arith.mulf %2, %5 : vector<16x16x128xf32>
    %c0_5 = arith.constant 0 : index
    %c0_6 = arith.constant 0 : index
    %7 = vector.load %arg3[%c0_5, %c0_6] : memref<1x128xf32, #tpu.memory_space<vmem>>, vector<1x128xf32>
    %8 = vector.shape_cast %7 : vector<1x128xf32> to vector<1x1x128xf32>
    %9 = vector.broadcast %8 : vector<1x1x128xf32> to vector<16x16x128xf32>
    %10 = arith.addf %6, %9 : vector<16x16x128xf32>
    %cst = arith.constant 0.000000e+00 : f32
    %11 = vector.broadcast %cst : f32 to vector<16x16x128xf32>
    %12 = arith.maximumf %10, %11 : vector<16x16x128xf32>
    %13 = arith.truncf %12 : vector<16x16x128xf32> to vector<16x16x128xbf16>
    %cst_7 = arith.constant 0.000000e+00 : bf16
    %14 = vector.broadcast %cst_7 : bf16 to vector<16x1x128xbf16>
    %15 = tpu.concatenate %14, %13, %14 in 1 : vector<16x1x128xbf16>, vector<16x16x128xbf16>, vector<16x1x128xbf16> -> vector<16x18x128xbf16>
    %c1 = arith.constant 1 : index
    %c0_8 = arith.constant 0 : index
    %c0_9 = arith.constant 0 : index
    %16 = vector.load %arg8[%c1, %c0_8, %c0_9] : memref<18x18x128xbf16, #tpu.memory_space<vmem>>, vector<16x18x128xbf16>
    tpu.vector_store %arg8[%c1, %c0_8, %c0_9], %15 {strides = array<i32>} : memref<18x18x128xbf16, #tpu.memory_space<vmem>>, vector<16x18x128xbf16>,
    %cst_10 = arith.constant 0.000000e+00 : bf16
    %17 = vector.broadcast %cst_10 : bf16 to vector<1x18x128xbf16>
    %c0_11 = arith.constant 0 : index
    %c0_12 = arith.constant 0 : index
    %c0_13 = arith.constant 0 : index
    %18 = vector.load %arg8[%c0_11, %c0_12, %c0_13] : memref<18x18x128xbf16, #tpu.memory_space<vmem>>, vector<1x18x128xbf16>
    tpu.vector_store %arg8[%c0_11, %c0_12, %c0_13], %17 {strides = array<i32>} : memref<18x18x128xbf16, #tpu.memory_space<vmem>>, vector<1x18x128xbf16>,
    %c17 = arith.constant 17 : index
    %c0_14 = arith.constant 0 : index
    %c0_15 = arith.constant 0 : index
    %19 = vector.load %arg8[%c17, %c0_14, %c0_15] : memref<18x18x128xbf16, #tpu.memory_space<vmem>>, vector<1x18x128xbf16>
    tpu.vector_store %arg8[%c17, %c0_14, %c0_15], %17 {strides = array<i32>} : memref<18x18x128xbf16, #tpu.memory_space<vmem>>, vector<1x18x128xbf16>,
    %c0_16 = arith.constant 0 : index
    %c0_17 = arith.constant 0 : index
    %c0_18 = arith.constant 0 : index
    %20 = vector.load %arg8[%c0_16, %c0_17, %c0_18] : memref<18x18x128xbf16, #tpu.memory_space<vmem>>, vector<18x16x128xbf16>
    %c0_19 = arith.constant 0 : index
    %c1_20 = arith.constant 1 : index
    %c0_21 = arith.constant 0 : index
    %21 = vector.load %arg8[%c0_19, %c1_20, %c0_21] : memref<18x18x128xbf16, #tpu.memory_space<vmem>>, vector<18x16x128xbf16>
    %c0_22 = arith.constant 0 : index
    %c2 = arith.constant 2 : index
    %c0_23 = arith.constant 0 : index
    %22 = vector.load %arg8[%c0_22, %c2, %c0_23] : memref<18x18x128xbf16, #tpu.memory_space<vmem>>, vector<18x16x128xbf16>
    %23 = tpu.concatenate %20, %21, %22 in 2 : vector<18x16x128xbf16>, vector<18x16x128xbf16>, vector<18x16x128xbf16> -> vector<18x16x384xbf16>
    %cst_24 = arith.constant 0.000000e+00 : f32
    %24 = vector.broadcast %cst_24 : f32 to vector<256x128xf32>
    %25 = vector.extract_strided_slice %23 {offsets = [0, 0, 0], sizes = [16, 16, 384], strides = [1, 1, 1]} : vector<18x16x384xbf16> to vector<16x16x384xbf16>
    %26 = vector.shape_cast %25 : vector<16x16x384xbf16> to vector<256x384xbf16>
    %c0_25 = arith.constant 0 : index
    %c0_26 = arith.constant 0 : index
    %c0_27 = arith.constant 0 : index
    %27 = vector.load %arg4[%c0_25, %c0_26, %c0_27] : memref<3x384x128xbf16, #tpu.memory_space<vmem>>, vector<1x384x128xbf16>
    %28 = vector.shape_cast %27 : vector<1x384x128xbf16> to vector<384x128xbf16>
    %cst_28 = arith.constant dense<0.000000e+00> : vector<256x128xf32>
    %29 = tpu.matmul %26, %28, %cst_28 {dimension_numbers = #tpu.dot_dimension_numbers<[1], [0], [0], [1], [0, 0, 1, 1], [], []>} : vector<256x384xbf16>, vector<384x128xbf16>, vector<256x128xf32> -> vector<256x128xf32>
    %30 = arith.addf %24, %29 : vector<256x128xf32>
    %31 = vector.extract_strided_slice %23 {offsets = [1, 0, 0], sizes = [16, 16, 384], strides = [1, 1, 1]} : vector<18x16x384xbf16> to vector<16x16x384xbf16>
    %32 = vector.shape_cast %31 : vector<16x16x384xbf16> to vector<256x384xbf16>
    %c1_29 = arith.constant 1 : index
    %c0_30 = arith.constant 0 : index
    %c0_31 = arith.constant 0 : index
    %33 = vector.load %arg4[%c1_29, %c0_30, %c0_31] : memref<3x384x128xbf16, #tpu.memory_space<vmem>>, vector<1x384x128xbf16>
    %34 = vector.shape_cast %33 : vector<1x384x128xbf16> to vector<384x128xbf16>
    %cst_32 = arith.constant dense<0.000000e+00> : vector<256x128xf32>
    %35 = tpu.matmul %32, %34, %cst_32 {dimension_numbers = #tpu.dot_dimension_numbers<[1], [0], [0], [1], [0, 0, 1, 1], [], []>} : vector<256x384xbf16>, vector<384x128xbf16>, vector<256x128xf32> -> vector<256x128xf32>
    %36 = arith.addf %30, %35 : vector<256x128xf32>
    %37 = vector.extract_strided_slice %23 {offsets = [2, 0, 0], sizes = [16, 16, 384], strides = [1, 1, 1]} : vector<18x16x384xbf16> to vector<16x16x384xbf16>
    %38 = vector.shape_cast %37 : vector<16x16x384xbf16> to vector<256x384xbf16>
    %c2_33 = arith.constant 2 : index
    %c0_34 = arith.constant 0 : index
    %c0_35 = arith.constant 0 : index
    %39 = vector.load %arg4[%c2_33, %c0_34, %c0_35] : memref<3x384x128xbf16, #tpu.memory_space<vmem>>, vector<1x384x128xbf16>
    %40 = vector.shape_cast %39 : vector<1x384x128xbf16> to vector<384x128xbf16>
    %cst_36 = arith.constant dense<0.000000e+00> : vector<256x128xf32>
    %41 = tpu.matmul %38, %40, %cst_36 {dimension_numbers = #tpu.dot_dimension_numbers<[1], [0], [0], [1], [0, 0, 1, 1], [], []>} : vector<256x384xbf16>, vector<384x128xbf16>, vector<256x128xf32> -> vector<256x128xf32>
    %42 = arith.addf %36, %41 : vector<256x128xf32>
    %c0_37 = arith.constant 0 : index
    %c0_38 = arith.constant 0 : index
    %43 = vector.load %arg5[%c0_37, %c0_38] : memref<1x128xf32, #tpu.memory_space<vmem>>, vector<1x128xf32>
    %44 = vector.broadcast %43 : vector<1x128xf32> to vector<256x128xf32>
    %45 = arith.addf %42, %44 : vector<256x128xf32>
    %46 = vector.shape_cast %45 : vector<256x128xf32> to vector<1x16x16x128xf32>
    %47 = arith.truncf %46 : vector<1x16x16x128xf32> to vector<1x16x16x128xbf16>
    %c0_39 = arith.constant 0 : index
    %c0_40 = arith.constant 0 : index
    %c0_41 = arith.constant 0 : index
    %c0_42 = arith.constant 0 : index
    %48 = vector.load %arg6[%c0_39, %c0_40, %c0_41, %c0_42] : memref<1x16x16x128xbf16, #tpu.memory_space<vmem>>, vector<1x16x16x128xbf16>
    tpu.vector_store %arg6[%c0_39, %c0_40, %c0_41, %c0_42], %47 {strides = array<i32>} : memref<1x16x16x128xbf16, #tpu.memory_space<vmem>>, vector<1x16x16x128xbf16>,
    %cst_43 = arith.constant dense<0.000000e+00> : vector<128xf32>
    %49 = vector.multi_reduction <add>, %45, %cst_43 [0] : vector<256x128xf32> to vector<128xf32>
    %50 = vector.shape_cast %49 : vector<128xf32> to vector<1x128xf32>
    %51 = arith.mulf %45, %45 : vector<256x128xf32>
    %cst_44 = arith.constant dense<0.000000e+00> : vector<128xf32>
    %52 = vector.multi_reduction <add>, %51, %cst_44 [0] : vector<256x128xf32> to vector<128xf32>
    %53 = vector.shape_cast %52 : vector<128xf32> to vector<1x128xf32>
    %54 = tpu.concatenate %50, %53 in 0 : vector<1x128xf32>, vector<1x128xf32> -> vector<2x128xf32>
    %55 = vector.shape_cast %54 : vector<2x128xf32> to vector<1x2x128xf32>
    %c0_45 = arith.constant 0 : index
    %c0_46 = arith.constant 0 : index
    %c0_47 = arith.constant 0 : index
    %56 = vector.load %arg7[%c0_45, %c0_46, %c0_47] : memref<1x2x128xf32, #tpu.memory_space<vmem>>, vector<1x2x128xf32>
    tpu.vector_store %arg7[%c0_45, %c0_46, %c0_47], %55 {strides = array<i32>} : memref<1x2x128xf32, #tpu.memory_space<vmem>>, vector<1x2x128xf32>,
    return
  }
  func.func @transform_0(%arg0: i32) -> (i32, i32, i32, i32) {
    %c0_i32 = arith.constant 0 : i32
    %c0_i32_0 = arith.constant 0 : i32
    %c0_i32_1 = arith.constant 0 : i32
    %c0_i32_2 = arith.constant 0 : i32
    return %arg0, %c0_i32, %c0_i32_0, %c0_i32_1 : i32, i32, i32, i32
  }
  func.func @transform_1(%arg0: i32) -> (i32, i32) {
    %c0_i32 = arith.constant 0 : i32
    %c0_i32_0 = arith.constant 0 : i32
    %c0_i32_1 = arith.constant 0 : i32
    return %c0_i32, %c0_i32_0 : i32, i32
  }
  func.func @transform_2(%arg0: i32) -> (i32, i32) {
    %c0_i32 = arith.constant 0 : i32
    %c0_i32_0 = arith.constant 0 : i32
    %c0_i32_1 = arith.constant 0 : i32
    return %c0_i32, %c0_i32_0 : i32, i32
  }
  func.func @transform_3(%arg0: i32) -> (i32, i32, i32) {
    %c0_i32 = arith.constant 0 : i32
    %c0_i32_0 = arith.constant 0 : i32
    %c0_i32_1 = arith.constant 0 : i32
    %c0_i32_2 = arith.constant 0 : i32
    return %c0_i32, %c0_i32_0, %c0_i32_1 : i32, i32, i32
  }
  func.func @transform_4(%arg0: i32) -> (i32, i32) {
    %c0_i32 = arith.constant 0 : i32
    %c0_i32_0 = arith.constant 0 : i32
    %c0_i32_1 = arith.constant 0 : i32
    return %c0_i32, %c0_i32_0 : i32, i32
  }
  func.func @transform_5(%arg0: i32) -> (i32, i32, i32, i32) {
    %c0_i32 = arith.constant 0 : i32
    %c0_i32_0 = arith.constant 0 : i32
    %c0_i32_1 = arith.constant 0 : i32
    %c0_i32_2 = arith.constant 0 : i32
    return %arg0, %c0_i32, %c0_i32_0, %c0_i32_1 : i32, i32, i32, i32
  }
  func.func @transform_6(%arg0: i32) -> (i32, i32, i32) {
    %c0_i32 = arith.constant 0 : i32
    %c0_i32_0 = arith.constant 0 : i32
    %c0_i32_1 = arith.constant 0 : i32
    return %arg0, %c0_i32, %c0_i32_0 : i32, i32, i32
  }
}

</mosaic_0001>

<bundles_post_ra>
// kernel: double_conv.2
= control target key start
LH: loop header
LB: loop body
LE: loop exit
PB: predicated region body
PF: predicated region fallthrough
CT: control target
= control target key end

     0   :  { %s3487_s15 = smov 0   ;;  %s4615_s0 = inlined_call_operand.vmem [shape: bf16[2,18,18,4], index: 0, kind: input, shape index: {}]   ;;  %s4616_s1 = inlined_call_operand.vmem [shape: bf16[1,36,128], index: 1, kind: input, shape index: {}]   ;;  %s4617_s2 = inlined_call_operand.vmem [shape: f32[1,128], index: 2, kind: input, shape index: {}]   ;;  %s4618_s3 = inlined_call_operand.vmem [shape: bf16[2,16,16,128], index: 3, kind: output, shape index: {0}]   ;;  %s4619_s4 = inlined_call_operand.vmem [shape: f32[2,2,128], index: 4, kind: output, shape index: {1}]  }
   0x1 LB: > { %s2754_s16 = sadd.s32 4294967295, %s3452_s15   ;;  %p2758_p0 = scmp.ge.s32.totalorder %s3452_s15, 1  ;;  %s3452_s15 = sphi %s3487_s15, %s15_s15  }
   0x2   : > { %p165_p1 = scmp.lt.s32.totalorder %s3452_s15, 3 }
   0x4   : > { %p166_p2 = pnand %p2758_p0, %p165_p1 }
   0x5   : > { %p195_p3 = scmp.lt.s32.totalorder (!%p166_p2), %s2754_s16, 1  ;;  %vm805_vm0 = vcmask (!%p166_p2), 1046528   ;;  %s3454_s21 = smov (!%p166_p2), 12   ;;  %vm532_vm1 = vsmask.f32 (!%p166_p2), 7424  ;;  %v3377_v57 = vld [vmem:[%s4616_s1] sm:$0xff] (!%p166_p2)  }
   0x6   : > { %169 = sbr.rel (%p166_p2) target bundleno = 632 (0x278), region = 32  ;;  %s3455_s22 = smov (!%p166_p2), 20   ;;  %3236 = vmatprep.subr.bf16.mxu0 (!%p166_p2), %v3377_v57  ;;  %3274 = vmatprep.subr.bf16.mxu1 (!%p166_p2), %v3377_v57  ;;  %vm2234_vm2 = vcmask (!%p166_p2), 1041408   ;;  %vm1910_vm3 = vcmask (!%p166_p2), 31744   ;;  %vm1943_vm4 = vcmask (!%p166_p2), 64512   ;;  %vm1976_vm5 = vcmask (!%p166_p2), 97280  }
   0x7   : > { %s3456_s23 = smov (!%p166_p2), 8   ;;  %s3457_s26 = smov (!%p166_p2), 4   ;;  %3237 = vmatpush3.bf16.msra.mxu0 (!%p166_p2), %v3377_v57  ;;  %3277 = vmatpush3.bf16.msra.mxu1 (!%p166_p2), %v3377_v57  ;;  %vm2009_vm6 = vcmask (!%p166_p2), 130048   ;;  %vm2042_vm7 = vcmask (!%p166_p2), 162816   ;;  %vm2075_vm8 = vcmask (!%p166_p2), 195584   ;;  %vm2108_vm9 = vcmask (!%p166_p2), 228352  }
   0x8   : > { %s3458_s29 = smov (!%p166_p2), 16   ;;  %s3459_s30 = smov (!%p166_p2), 24   ;;  %vm2141_vm10 = vcmask (!%p166_p2), 261120   ;;  %vm2201_vm11 = vcmask (!%p166_p2), 293888   ;;  %vm2665_vm12 = vcmask (!%p166_p2), 1040384  }
   0x9   : > { %s3460_s5 = smov (!%p166_p2), 28   ;;  %s3461_s6 = smov (!%p166_p2), 32  }
   0xd   : > { %s4621_s16 = smov (!%p195_p3, %s2754_s16), 1 }
   0xe   : > { %s3282_s17 = smul.u32 216, %s4621_s16  ;;  %s3089_s11 = sshll.u32 %s4621_s16, 7 }
   0xf   : > { %s4554_s14 = scalar_lea.vmem %s4618_s3, %s3089_s11 }
  0x10   : > { %s3501_s20 = scalar_lea.vmem %s4615_s0, %s3282_s17  ;;  %s2762_s17 = sshll.u32 %s4621_s16, 1 }
  0x11   : > { %v2765_v0 = vld [vmem:[%s3501_s20 + $0x18] sm:$0xf]  ;;  %v2766_v1 = vld [vmem:[%s3501_s20 + $0x1c] sm:$0xf]  ;;  %v2763_v5 = vld [vmem:[%s3501_s20 + $0xc] sm:$0xf] }
  0x12   : > { %v2812_v2 = vld [vmem:[%s3501_s20 + $0x18] sm:$0xe]  ;;  %v3506_v3 = vcombine.low %v2765_v0, %v2766_v1  ;;  %v2764_v6 = vld [vmem:[%s3501_s20 + $0x10] sm:$0xf]  ;;  %v2811_v7 = vld [vmem:[%s3501_s20 + $0xc] sm:$0xe] }
  0x13   : > { %v2972_v4 = vcombine.low %v2812_v2, %v2766_v1  ;;  %v3511_v8 = vcombine.low %v2763_v5, %v2764_v6  ;;  %v2971_v9 = vcombine.low %v2811_v7, %v2764_v6  ;;  %v3514_v10 = vld [vmem:[%s3501_s20 + $0x14] ss:$0 sps:$4 sm:$0x11]   ;;  %v211_v12 = vld [vmem:[%s3501_s20 + $0x4] sm:$0xf] }
  0x14   : > { %968 = vrot.lane.b32.xlu1 %v3506_v3, %s3454_s21  ;;  %v1061_v11 = vshll.u32 %v3506_v3, 16  ;;  %v1319_v15 = vrot.slane %v3514_v10, 1  ;;  %v258_v16 = vld [vmem:[%s3501_s20] sm:$0xe]  ;;  %v1059_v21 = vshrl.u32 %v3506_v3, 16  ;;  %v1054_v60 = vshll.u32 %v3514_v10, 16 }
  0x15   : > { %966 = vrot.lane.b32.xlu0 %v3511_v8, %s3454_s21  ;;  %v1049_v13 = vshll.u32 %v3511_v8, 16  ;;  %v1318_v14 = vrot.slane %v2971_v9, 1  ;;  %v1321_v17 = vrot.slane %v2972_v4, 1  ;;  %v3304_v18 = vld [vmem:[%s3501_s20 + $0x8] ss:$0 sps:$4 sm:$0x11]   ;;  %v2923_v19 = vcombine.low %v258_v16, %v211_v12 }
  0x16   : > { %v210_v20 = vld [vmem:[%s3501_s20] sm:$0xf]  ;;  %v212_v24 = vld [vmem:[%s3501_s20 + $0xc] sm:$0xf]  ;;  %v213_v25 = vld [vmem:[%s3501_s20 + $0x10] sm:$0xf] }
  0x17   : > { %v1320_v22 = vsel %vm805_vm0, %v1318_v14, %v1319_v15  ;;  %v3529_v23 = vcombine.low %v210_v20, %v211_v12  ;;  %v806_v26 = vrot.slane %v2923_v19, 1  ;;  %v807_v27 = vrot.slane %v3304_v18, 1  ;;  %v259_v28 = vld [vmem:[%s3501_s20 + $0xc] sm:$0xe]  ;;  %v2829_v43 = vld [vmem:[%s3501_s20 + $0x24] sm:$0xf] }
  0x18   : > { %v3534_v29 = vcombine.low %v212_v24, %v213_v25  ;;  %v541_v30 = vshll.u32 %v3304_v18, 16  ;;  %v3308_v31 = vld [vmem:[%s3501_s20 + $0x14] ss:$0 sps:$4 sm:$0x11]   ;;  %v2924_v32 = vcombine.low %v259_v28, %v213_v25  ;;  %v1063_v35 = vrot.slane %v1061_v11, 1  ;;  %v3382_v12 = vld [vmem:[%s4616_s1 + $0x8] sm:$0xff]  }
  0x19   : > { %1366 = vrot.lane.b32.xlu0 %v1320_v22, %s3455_s22  ;;  %v534_v33 = vshrl.u32 %v3529_v23, 16  ;;  %v536_v34 = vshll.u32 %v3529_v23, 16  ;;  %v808_v36 = vsel %vm805_vm0, %v806_v26, %v807_v27  ;;  %v3310_v38 = vld [vmem:[%s3501_s20 + $0x20] ss:$0 sps:$4 sm:$0x11]   ;;  %v810_v40 = vrot.slane %v3308_v31, 1  ;;  %3238 = vmatprep.subr.bf16.mxu0 %v3382_v12 }
  0x1a   : > { %v543_v37 = vrot.slane %v541_v30, 1  ;;  %854 = vrot.lane.b32.xlu1 %v808_v36, %s3456_s23  ;;  %v809_v39 = vrot.slane %v2924_v32, 1  ;;  %v546_v42 = vshrl.u32 %v3534_v29, 16  ;;  %v1322_v44 = vrot.slane %v3310_v38, 1  ;;  %v3547_v48 = vld [vmem:[%s3501_s20 + $0x28] sm:$0xf]  ;;  %3275 = vmatprep.subr.bf16.mxu1 %v3382_v12 }
  0x1b   : > { %v538_v41 = vrot.slane %v536_v34, 1  ;;  %v548_v45 = vshll.u32 %v3534_v29, 16  ;;  %v553_v46 = vshll.u32 %v3308_v31, 16  ;;  %v1066_v47 = vshll.u32 %v3310_v38, 16  ;;  %v2827_v53 = vld [vmem:[%s3501_s20 + $0x18] sm:$0xf]  ;;  %3239 = vmatpush3.bf16.msra.mxu0 %v3382_v12  ;;  %3278 = vmatpush3.bf16.msra.mxu1 %v3382_v12 }
  0x1c   : > { %v811_v49 = vsel %vm805_vm0, %v809_v39, %v810_v40  ;;  %v1047_v51 = vshrl.u32 %v3511_v8, 16  ;;  %v1051_v52 = vrot.slane %v1049_v13, 1  ;;  %v3553_v56 = vld [vmem:[%s3501_s20 + $0x1c] sm:$0xf]  ;;  %v1064_v59 = vor.u32 %v1063_v35, %v1059_v21  ;;  %v2875_v6 = vld [vmem:[%s3501_s20 + $0x18] sm:$0xe] }
  0x1d   : > { %v539_v50 = vor.u32 %v538_v41, %v534_v33  ;;  %v550_v54 = vrot.slane %v548_v45, 1  ;;  %v555_v55 = vrot.slane %v553_v46, 1  ;;  %v2988_v61 = vcombine.low %v2829_v43, %v3547_v48  ;;  %v3566_v2 = vld [vmem:[%s3501_s20 + $0x2c] ss:$0 sps:$4 sm:$0x11]  }
  0x1e   : > { %856 = vrot.lane.b32.xlu1 %v811_v49, %s3456_s23  ;;  %v1323_v62 = vsel %vm805_vm0, %v1321_v17, %v1322_v44  ;;  %v1068_v0 = vrot.slane %v1066_v47, 1  ;;  %v2987_v1 = vcombine.low %v2827_v53, %v3553_v56  ;;  %v1052_v3 = vor.u32 %v1051_v52, %v1047_v51  ;;  %v3570_v7 = vld [vmem:[%s3501_s20 + $0x20] ss:$0 sps:$4 sm:$0x11]   ;;  %v214_v11 = vld [vmem:[%s3501_s20 + $0x18] sm:$0xf] }
  0x1f   : > { %v544_v58 = vsel %vm532_vm1, %v539_v50, %v543_v37  ;;  %v551_v63 = vor.u32 %v550_v54, %v546_v42  ;;  %v1056_v4 = vrot.slane %v1054_v60, 1  ;;  %v1573_v5 = vshll.u32 %v2988_v61, 16  ;;  %v3580_v15 = vld [vmem:[%s3501_s20 + $0x1c] sm:$0xf]  ;;  %v216_v24 = vld [vmem:[%s3501_s20 + $0x24] sm:$0xf] }
  0x20   : > { %725 = vrot.lane.b32.xlu0 %v544_v58, %s3457_s26  ;;  %v1561_v9 = vshll.u32 %v2987_v1, 16  ;;  %v1571_v10 = vshrl.u32 %v2988_v61, 16  ;;  %v1578_v14 = vshll.u32 %v3566_v2, 16  ;;  %v1069_v16 = vsel %vm532_vm1, %v1064_v59, %v1068_v0  ;;  %v3588_v19 = vld [vmem:[%s3501_s20 + $0x20] ss:$0 sps:$4 sm:$0x11]  }
  0x21   : > { %v556_v8 = vsel %vm532_vm1, %v551_v63, %v555_v55  ;;  %v1575_v13 = vrot.slane %v1573_v5, 1  ;;  %v1559_v17 = vshrl.u32 %v2987_v1, 16  ;;  %v3585_v18 = vcombine.low %v214_v11, %v3580_v15  ;;  %v217_v25 = vld [vmem:[%s3501_s20 + $0x28] sm:$0xf]  ;;  %v2876_v39 = vld [vmem:[%s3501_s20 + $0x24] sm:$0xe] }
  0x22   : > { %1368 = vrot.lane.b32.xlu1 %v1323_v62, %s3455_s22  ;;  %v1057_v20 = vsel %vm532_vm1, %v1052_v3, %v1056_v4  ;;  %v1563_v21 = vrot.slane %v1561_v9, 1  ;;  %v1566_v22 = vshll.u32 %v3570_v7, 16  ;;  %v3019_v26 = vcombine.low %v2875_v6, %v3553_v56  ;;  %v3320_v35 = vld [vmem:[%s3501_s20 + $0x2c] ss:$0 sps:$4 sm:$0x11]  }
  0x23   : > { %v560_v27 = vshll.u32 %v3585_v18, 16  ;;  %v1576_v28 = vor.u32 %v1575_v13, %v1571_v10  ;;  %v1580_v30 = vrot.slane %v1578_v14, 1  ;;  %v565_v31 = vshll.u32 %v3588_v19, 16  ;;  %v261_v44 = vld [vmem:[%s3501_s20 + $0x24] sm:$0xe] }
  0x24   : > { %727 = vrot.lane.b32.xlu0 %v556_v8, %s3457_s26  ;;  %v3598_v32 = vcombine.low %v216_v24, %v217_v25  ;;  %v558_v33 = vshrl.u32 %v3585_v18, 16  ;;  %v1564_v36 = vor.u32 %v1563_v21, %v1559_v17  ;;  %v1568_v37 = vrot.slane %v1566_v22, 1  ;;  %v260_v50 = vld [vmem:[%s3501_s20 + $0x18] sm:$0xe]  ;;  %v2769_v53 = vld [vmem:[%s3501_s20 + $0x30] sm:$0xf] }
  0x25   : > { %v562_v34 = vrot.slane %v560_v27, 1  ;;  %v1581_v40 = vsel %vm532_vm1, %v1576_v28, %v1580_v30  ;;  %v567_v41 = vrot.slane %v565_v31, 1  ;;  %v1830_v42 = vrot.slane %v3019_v26, 1  ;;  %v2770_v54 = vld [vmem:[%s3501_s20 + $0x34] sm:$0xf] }
  0x26   : > { %1240 = vrot.lane.b32.xlu1 %v1069_v16, %s3458_s29  ;;  %v572_v38 = vshll.u32 %v3598_v32, 16  ;;  %v1831_v43 = vrot.slane %v3570_v7, 1  ;;  %v570_v46 = vshrl.u32 %v3598_v32, 16  ;;  %v577_v49 = vshll.u32 %v3320_v35, 16  ;;  %v2767_v55 = vld [vmem:[%s3501_s20 + $0x24] sm:$0xf] }
  0x27   : > { %v563_v45 = vor.u32 %v562_v34, %v558_v33  ;;  %v3020_v51 = vcombine.low %v2876_v39, %v3547_v48  ;;  %v1569_v52 = vsel %vm532_vm1, %v1564_v36, %v1568_v37  ;;  %v2768_v56 = vld [vmem:[%s3501_s20 + $0x28] sm:$0xf]  ;;  %v2926_v58 = vcombine.low %v261_v44, %v217_v25  ;;  %v3626_v3 = vld [vmem:[%s3501_s20 + $0x38] ss:$0 sps:$4 sm:$0x11]  }
  0x28   : > { %1238 = vrot.lane.b32.xlu0 %v1057_v20, %s3458_s29  ;;  %v574_v47 = vrot.slane %v572_v38, 1  ;;  %v1832_v57 = vsel %vm805_vm0, %v1830_v42, %v1831_v43  ;;  %v2942_v48 = vcombine.low %v2769_v53, %v2770_v54  ;;  %v1834_v63 = vrot.slane %v3566_v2, 1  ;;  %v3328_v11 = vld [vmem:[%s3501_s20 + $0x2c] ss:$0 sps:$4 sm:$0x11]  }
  0x29   : > { %v568_v59 = vsel %vm532_vm1, %v563_v45, %v567_v41  ;;  %v1833_v62 = vrot.slane %v3020_v51, 1  ;;  %v2925_v0 = vcombine.low %v260_v50, %v3580_v15  ;;  %v815_v5 = vrot.slane %v2926_v58, 1  ;;  %v2814_v12 = vld [vmem:[%s3501_s20 + $0x30] sm:$0xe]  ;;  %v2813_v13 = vld [vmem:[%s3501_s20 + $0x24] sm:$0xe] }
  0x2a   : > { %1480 = vrot.lane.b32.xlu1 %v2988_v61, %s3459_s30  ;;  %v575_v60 = vor.u32 %v574_v47, %v570_v46  ;;  %v579_v61 = vrot.slane %v577_v49, 1  ;;  %v816_v6 = vrot.slane %v3320_v35, 1  ;;  %v1085_v7 = vshll.u32 %v2942_v48, 16  ;;  %v2833_v21 = vld [vmem:[%s3501_s20 + $0x3c] sm:$0xf] }
  0x2b   : > { %v1835_v2 = vsel %vm805_vm0, %v1833_v62, %v1834_v63  ;;  %v812_v8 = vrot.slane %v2925_v0, 1  ;;  %v813_v9 = vrot.slane %v3588_v19, 1  ;;  %v1083_v14 = vshrl.u32 %v2942_v48, 16  ;;  %v3641_v22 = vld [vmem:[%s3501_s20 + $0x40] sm:$0xf] }
  0x2c   : > { %1478 = vrot.lane.b32.xlu0 %v2987_v1, %s3459_s30  ;;  %v2941_v1 = vcombine.low %v2767_v55, %v2768_v56  ;;  %v580_v4 = vsel %vm532_vm1, %v575_v60, %v579_v61  ;;  %v1090_v15 = vshll.u32 %v3626_v3, 16  ;;  %v817_v16 = vsel %vm805_vm0, %v815_v5, %v816_v6  ;;  %v2831_v26 = vld [vmem:[%s3501_s20 + $0x30] sm:$0xf]  ;;  %v2832_v27 = vld [vmem:[%s3501_s20 + $0x34] sm:$0xf] }
  0x2d   : > { %v1087_v17 = vrot.slane %v1085_v7, 1  ;;  %v814_v19 = vsel %vm805_vm0, %v812_v8, %v813_v9  ;;  %v1078_v25 = vshll.u32 %v3328_v11, 16  ;;  %v2974_v28 = vcombine.low %v2814_v12, %v2770_v54  ;;  %v218_v38 = vld [vmem:[%s3501_s20 + $0x30] sm:$0xf]  ;;  %v3651_v39 = vld [vmem:[%s3501_s20 + $0x34] sm:$0xf] }
  0x2e   : > { %1752 = vrot.lane.b32.xlu1 %v1581_v40, %s3460_s5  ;;  %v1073_v10 = vshll.u32 %v2941_v1, 16  ;;  %v1071_v20 = vshrl.u32 %v2941_v1, 16  ;;  %v2973_v30 = vcombine.low %v2813_v13, %v2768_v56  ;;  %v2990_v31 = vcombine.low %v2833_v21, %v3641_v22  ;;  %v3656_v45 = vld [vmem:[%s3501_s20 + $0x44] ss:$0 sps:$4 sm:$0x11]  }
  0x2f   : > { %v1088_v33 = vor.u32 %v1087_v17, %v1083_v14  ;;  %v1092_v34 = vrot.slane %v1090_v15, 1  ;;  %v2989_v35 = vcombine.low %v2831_v26, %v2832_v27  ;;  %v1080_v37 = vrot.slane %v1078_v25, 1  ;;  %v3334_v49 = vld [vmem:[%s3501_s20 + $0x38] ss:$0 sps:$4 sm:$0x11]  }
  0x30   : > { %1750 = vrot.lane.b32.xlu0 %v1569_v52, %s3460_s5  ;;  %v1075_v24 = vrot.slane %v1073_v10, 1  ;;  %v1327_v40 = vrot.slane %v2974_v28, 1  ;;  %v1328_v41 = vrot.slane %v3626_v3, 1  ;;  %v1324_v42 = vrot.slane %v2973_v30, 1  ;;  %v220_v52 = vld [vmem:[%s3501_s20 + $0x3c] sm:$0xf] }
  0x31   : > { %v1325_v43 = vrot.slane %v3328_v11, 1  ;;  %v1597_v44 = vshll.u32 %v2990_v31, 16  ;;  %v1093_v46 = vsel %vm532_vm1, %v1088_v33, %v1092_v34  ;;  %v1585_v47 = vshll.u32 %v2989_v35, 16  ;;  %v221_v53 = vld [vmem:[%s3501_s20 + $0x40] sm:$0xf] }
  0x32   : > { %729 = vrot.lane.b32.xlu1 %v568_v59, %s3457_s26  ;;  %v1076_v36 = vor.u32 %v1075_v24, %v1071_v20  ;;  %v3662_v50 = vcombine.low %v218_v38, %v3651_v39  ;;  %v1595_v54 = vshrl.u32 %v2990_v31, 16  ;;  %v1602_v56 = vshll.u32 %v3656_v45, 16  ;;  %v2877_v59 = vld [vmem:[%s3501_s20 + $0x30] sm:$0xe]  ;;  %v263_v24 = vld [vmem:[%s3501_s20 + $0x3c] sm:$0xe] }
  0x33   : > { %v1599_v55 = vrot.slane %v1597_v44, 1  ;;  %v1329_v58 = vsel %vm805_vm0, %v1327_v40, %v1328_v41  ;;  %v3676_v61 = vcombine.low %v220_v52, %v221_v53  ;;  %v1583_v62 = vshrl.u32 %v2989_v35, 16  ;;  %v3338_v8 = vld [vmem:[%s3501_s20 + $0x44] ss:$0 sps:$4 sm:$0x11]  }
  0x34   : > { %1878 = vrot.lane.b32.xlu0 %v1832_v57, %s3461_s6  ;;  %v1081_v51 = vsel %vm532_vm1, %v1076_v36, %v1080_v37  ;;  %v3670_v57 = vld [vmem:[%s3501_s20 + $0x38] ss:$0 sps:$4 sm:$0x11]   ;;  %v584_v60 = vshll.u32 %v3662_v50, 16  ;;  %v1587_v63 = vrot.slane %v1585_v47, 1  ;;  %v1590_v0 = vshll.u32 %v3334_v49, 16 }
  0x35   : > { %v3021_v3 = vcombine.low %v2877_v59, %v2832_v27  ;;  %v1604_v5 = vrot.slane %v1602_v56, 1  ;;  %v589_v6 = vshll.u32 %v3670_v57, 16  ;;  %v582_v7 = vshrl.u32 %v3662_v50, 16  ;;  %v2774_v26 = vld [vmem:[%s3501_s20 + $0x4c] sm:$0xf] }
  0x36   : > { %731 = vrot.lane.b32.xlu1 %v580_v4, %s3457_s26  ;;  %v1600_v4 = vor.u32 %v1599_v55, %v1595_v54  ;;  %v596_v9 = vshll.u32 %v3676_v61, 16  ;;  %v1588_v10 = vor.u32 %v1587_v63, %v1583_v62  ;;  %v1592_v11 = vrot.slane %v1590_v0, 1  ;;  %v262_v27 = vld [vmem:[%s3501_s20 + $0x30] sm:$0xe]  ;;  %v2771_v28 = vld [vmem:[%s3501_s20 + $0x3c] sm:$0xf] }
  0x37   : > { %v591_v14 = vrot.slane %v589_v6, 1  ;;  %v1836_v15 = vrot.slane %v3021_v3, 1  ;;  %v594_v20 = vshrl.u32 %v3676_v61, 16  ;;  %v2772_v30 = vld [vmem:[%s3501_s20 + $0x40] sm:$0xf]  ;;  %v2928_v33 = vcombine.low %v263_v24, %v221_v53 }
  0x38   : > { %1880 = vrot.lane.b32.xlu0 %v1835_v2, %s3461_s6  ;;  %v586_v2 = vrot.slane %v584_v60, 1  ;;  %v1605_v13 = vsel %vm532_vm1, %v1600_v4, %v1604_v5  ;;  %v598_v21 = vrot.slane %v596_v9, 1  ;;  %v1593_v25 = vsel %vm532_vm1, %v1588_v10, %v1592_v11  ;;  %v3346_v53 = vld [vmem:[%s3501_s20 + $0x44] ss:$0 sps:$4 sm:$0x11]  }
  0x39   : > { %v1840_v40 = vrot.slane %v3656_v45, 1  ;;  %v2927_v41 = vcombine.low %v262_v27, %v3651_v39  ;;  %v821_v44 = vrot.slane %v2928_v33, 1  ;;  %v819_v52 = vrot.slane %v3670_v57, 1  ;;  %v2837_v54 = vld [vmem:[%s3501_s20 + $0x54] sm:$0xf] }
  0x3a   : > { %860 = vrot.lane.b32.xlu1 %v817_v16, %s3456_s23  ;;  %v1837_v16 = vrot.slane %v3334_v49, 1  ;;  %v587_v17 = vor.u32 %v586_v2, %v582_v7  ;;  %v3345_v49 = vld [vmem:[%s3501_s20 + $0x50] ss:$0 sps:$4 sm:$0x11]   ;;  %v3714_v55 = vld [vmem:[%s3501_s20 + $0x58] sm:$0xf] }
  0x3b   : > { %v818_v45 = vrot.slane %v2927_v41, 1  ;;  %v2815_v62 = vld [vmem:[%s3501_s20 + $0x3c] sm:$0xe]  ;;  %v2992_v3 = vcombine.low %v2837_v54, %v3714_v55  ;;  %v2835_v4 = vld [vmem:[%s3501_s20 + $0x48] sm:$0xf] }
  0x3c   : > { %858 = vrot.lane.b32.xlu0 %v814_v19, %s3456_s23  ;;  %v601_v19 = vshll.u32 %v3338_v8, 16  ;;  %v592_v34 = vsel %vm532_vm1, %v587_v17, %v591_v14  ;;  %v1838_v38 = vsel %vm805_vm0, %v1836_v15, %v1837_v16  ;;  %v3724_v5 = vld [vmem:[%s3501_s20 + $0x4c] sm:$0xf]  ;;  %v2975_v7 = vcombine.low %v2815_v62, %v2772_v30  ;;  %v222_v9 = vld [vmem:[%s3501_s20 + $0x48] sm:$0xf] }
  0x3d   : > { %v820_v57 = vsel %vm805_vm0, %v818_v45, %v819_v52  ;;  %v3730_v10 = vld [vmem:[%s3501_s20 + $0x4c] sm:$0xf]  ;;  %v1621_v14 = vshll.u32 %v2992_v3, 16  ;;  %v1334_v16 = vrot.slane %v3345_v49, 1  ;;  %v224_v27 = vld [vmem:[%s3501_s20 + $0x54] sm:$0xf] }
  0x3e   : > { %972 = vrot.lane.b32.xlu1 %v2942_v48, %s3454_s21  ;;  %v1326_v48 = vsel %vm805_vm0, %v1324_v42, %v1325_v43  ;;  %v603_v36 = vrot.slane %v601_v19, 1  ;;  %v2943_v42 = vcombine.low %v2771_v28, %v2772_v30  ;;  %v3735_v17 = vld [vmem:[%s3501_s20 + $0x5c] ss:$0 sps:$4 sm:$0x11]   ;;  %v1330_v19 = vrot.slane %v2975_v7, 1 }
  0x3f   : > { %v3743_v24 = vld [vmem:[%s3501_s20 + $0x50] ss:$0 sps:$4 sm:$0x11]   ;;  %v3748_v28 = vld [vmem:[%s3501_s20 + $0x58] sm:$0xf]  ;;  %v1619_v30 = vshrl.u32 %v2992_v3, 16 }
  0x40   : > { %970 = vrot.lane.b32.xlu0 %v2941_v1, %s3454_s21  ;;  %v2878_v1 = vld [vmem:[%s3501_s20 + $0x3c] sm:$0xe]  ;;  %v1097_v39 = vshll.u32 %v2943_v42, 16  ;;  %v1095_v63 = vshrl.u32 %v2943_v42, 16  ;;  %v1626_v33 = vshll.u32 %v3735_v17, 16 }
  0x41   : > { %v3022_v12 = vcombine.low %v2878_v1, %v3641_v22  ;;  %v2773_v22 = vld [vmem:[%s3501_s20 + $0x48] sm:$0xf]  ;;  %v1102_v1 = vshll.u32 %v3346_v53, 16  ;;  %v3356_v52 = vld [vmem:[%s3501_s20 + $0x5c] ss:$0 sps:$4 sm:$0x11]  }
  0x42   : > { %1244 = vrot.lane.b32.xlu1 %v1093_v46, %s3458_s29  ;;  %v2944_v37 = vcombine.low %v2773_v22, %v2774_v26  ;;  %v822_v46 = vrot.slane %v3338_v8, 1  ;;  %v1099_v0 = vrot.slane %v1097_v39, 1  ;;  %v1331_v22 = vrot.slane %v3346_v53, 1  ;;  %v2777_v62 = vld [vmem:[%s3501_s20 + $0x60] sm:$0xf] }
  0x43   : > { %v264_v7 = vld [vmem:[%s3501_s20 + $0x48] sm:$0xe] }
  0x44   : > { %1242 = vrot.lane.b32.xlu0 %v1081_v51, %s3458_s29  ;;  %v1109_v47 = vshll.u32 %v2944_v37, 16  ;;  %v823_v56 = vsel %vm805_vm0, %v821_v44, %v822_v46  ;;  %v1107_v59 = vshrl.u32 %v2944_v37, 16  ;;  %v1100_v11 = vor.u32 %v1099_v0, %v1095_v63  ;;  %v2879_v44 = vld [vmem:[%s3501_s20 + $0x48] sm:$0xe] }
  0x45   : > { %v3023_v53 = vcombine.low %v2879_v44, %v3724_v5 }
  0x46   : > { %1372 = vrot.lane.b32.xlu1 %v1329_v58, %s3455_s22  ;;  %v2816_v58 = vld [vmem:[%s3501_s20 + $0x48] sm:$0xe]  ;;  %v1111_v60 = vrot.slane %v1109_v47, 1  ;;  %v1628_v47 = vrot.slane %v1626_v33, 1 }
  0x47   : > { %v2976_v6 = vcombine.low %v2816_v58, %v2774_v26  ;;  %v3385_v58 = vld [vmem:[%s4616_s1 + $0x10] ss:$0 sps:$4 sm:$0x33]  }
  0x48   : > { %1370 = vrot.lane.b32.xlu0 %v1326_v48, %s3455_s22  ;;  %v1114_v48 = vshll.u32 %v3345_v49, 16  ;;  %v1112_v2 = vor.u32 %v1111_v60, %v1107_v59  ;;  %3280 = vmatprep.subr.msk.bf16.mxu0 %vm2234_vm2, %v3385_v58 }
  0x49   : > { %v1333_v15 = vrot.slane %v2976_v6, 1  ;;  %v1843_v6 = vrot.slane %v3743_v24, 1  ;;  %3281 = vmatprep.subr.msk.bf16.mxu1 %vm2234_vm2, %v3385_v58 }
  0x4a   : > { %1484 = vrot.lane.b32.xlu1 %v2990_v31, %s3459_s30  ;;  %v1839_v31 = vrot.slane %v3022_v12, 1  ;;  %v1116_v8 = vrot.slane %v1114_v48, 1  ;;  %v1104_v12 = vrot.slane %v1102_v1, 1 }
  0x4c   : > { %1482 = vrot.lane.b32.xlu0 %v2989_v35, %s3459_s30  ;;  %v599_v35 = vor.u32 %v598_v21, %v594_v20  ;;  %v1841_v51 = vsel %vm805_vm0, %v1839_v31, %v1840_v40  ;;  %v3738_v20 = vcombine.low %v222_v9, %v3730_v10  ;;  %v1117_v21 = vsel %vm532_vm1, %v1112_v2, %v1116_v8  ;;  %v2775_v2 = vld [vmem:[%s3501_s20 + $0x54] sm:$0xf]  ;;  %v3790_v8 = vld [vmem:[%s3501_s20 + $0x58] sm:$0xf] }
  0x4d   : > { %v1623_v31 = vrot.slane %v1621_v14, 1  ;;  %v2236_v9 = vsel %vm2234_vm2, %v3385_v58, 0 }
  0x4e   : > { %1756 = vrot.lane.b32.xlu1 %v1605_v13, %s3460_s5  ;;  %v604_v43 = vsel %vm532_vm1, %v599_v35, %v603_v36  ;;  %v2991_v13 = vcombine.low %v2835_v4, %v3724_v5  ;;  %v608_v35 = vshll.u32 %v3738_v20, 16  ;;  %v1335_v36 = vsel %vm805_vm0, %v1333_v15, %v1334_v16  ;;  %v3783_v5 = vld [vmem:[%s3501_s20 + $0x64] sm:$0xf]  ;;  %3241 = vmatpush3.bf16.msra.mxu0 %v2236_v9 }
  0x4f   : > { %v1624_v46 = vor.u32 %v1623_v31, %v1619_v30  ;;  %v606_v49 = vshrl.u32 %v3738_v20, 16  ;;  %v625_v4 = vshll.u32 %v3356_v52, 16  ;;  %3279 = vmatpush3.bf16.msra.mxu1 %v2236_v9  ;;  %v3363_v30 = vld [vmem:[%s3501_s20 + $0x68] ss:$0 sps:$4 sm:$0x11]  }
  0x50   : > { %1754 = vrot.lane.b32.xlu0 %v1593_v25, %s3460_s5  ;;  %v1105_v25 = vsel %vm532_vm1, %v1100_v11, %v1104_v12  ;;  %v1609_v26 = vshll.u32 %v2991_v13, 16  ;;  %v1607_v40 = vshrl.u32 %v2991_v13, 16  ;;  %v2946_v12 = vcombine.low %v2777_v62, %v3783_v5  ;;  %v3364_v31 = vld [vmem:[%s3501_s20 + $0x5c] ss:$0 sps:$4 sm:$0x11]  }
  0x51   : > { %v1629_v60 = vsel %vm532_vm1, %v1624_v46, %v1628_v47  ;;  %v627_v15 = vrot.slane %v625_v4, 1  ;;  %v1138_v44 = vshll.u32 %v3363_v30, 16  ;;  %v1126_v46 = vshll.u32 %v3364_v31, 16  ;;  %v3827_v62 = vld [vmem:[%s3501_s20 + $0x64] sm:$0xf] }
  0x52   : > { %733 = vrot.lane.b32.xlu1 %v592_v34, %s3457_s26  ;;  %v3753_v34 = vld [vmem:[%s3501_s20 + $0x50] ss:$0 sps:$4 sm:$0x11]   ;;  %v1611_v41 = vrot.slane %v1609_v26, 1  ;;  %v828_v26 = vrot.slane %v3356_v52, 1 }
  0x53   : > { %v613_v45 = vshll.u32 %v3753_v34, 16  ;;  %v825_v33 = vrot.slane %v3753_v34, 1  ;;  %v2817_v34 = vld [vmem:[%s3501_s20 + $0x54] sm:$0xe]  ;;  %v2839_v52 = vld [vmem:[%s3501_s20 + $0x60] sm:$0xf] }
  0x54   : > { %1882 = vrot.lane.b32.xlu0 %v1838_v38, %s3461_s6  ;;  %v1332_v38 = vsel %vm805_vm0, %v1330_v19, %v1331_v22  ;;  %v1612_v54 = vor.u32 %v1611_v41, %v1607_v40  ;;  %v1846_v19 = vrot.slane %v3735_v17, 1  ;;  %v3812_v40 = vld [vmem:[%s3501_s20 + $0x70] sm:$0xf]  ;;  %v2818_v41 = vld [vmem:[%s3501_s20 + $0x60] sm:$0xe]  ;;  %v1140_v58 = vrot.slane %v1138_v44, 1 }
  0x55   : > { %v615_v48 = vrot.slane %v613_v45, 1  ;;  %v228_v9 = vld [vmem:[%s3501_s20 + $0x6c] sm:$0xf] }
  0x56   : > { %735 = vrot.lane.b32.xlu1 %v604_v43, %s3457_s26  ;;  %v2880_v43 = vld [vmem:[%s3501_s20 + $0x54] sm:$0xe]  ;;  %v2882_v44 = vld [vmem:[%s3501_s20 + $0x6c] sm:$0xe] }
  0x57   : > { %v3024_v59 = vcombine.low %v2880_v43, %v3714_v55 }
  0x58   : > { %1884 = vrot.lane.b32.xlu0 %v1841_v51, %s3461_s6  ;;  %v610_v51 = vrot.slane %v608_v35, 1 }
  0x59   : > { %v1845_v16 = vrot.slane %v3024_v59, 1  ;;  %v1128_v59 = vrot.slane %v1126_v46, 1 }
  0x5a   : > { %864 = vrot.lane.b32.xlu1 %v823_v56, %s3456_s23  ;;  %v611_v63 = vor.u32 %v610_v51, %v606_v49 }
  0x5c   : > { %862 = vrot.lane.b32.xlu0 %v820_v57, %s3456_s23  ;;  %v265_v57 = vld [vmem:[%s3501_s20 + $0x54] sm:$0xe] }
  0x5d   : > { %v2930_v11 = vcombine.low %v265_v57, %v3748_v28  ;;  %v226_v57 = vld [vmem:[%s3501_s20 + $0x60] sm:$0xf] }
  0x5e   : > { %976 = vrot.lane.b32.xlu1 %v2944_v37, %s3454_s21  ;;  %v3759_v37 = vcombine.low %v224_v27, %v3748_v28  ;;  %v1133_v27 = vshll.u32 %v2946_v12, 16 }
  0x5f   : > { %v827_v22 = vrot.slane %v2930_v11, 1  ;;  %v3842_v11 = vld [vmem:[%s3501_s20 + $0x70] sm:$0xf] }
  0x60   : > { %974 = vrot.lane.b32.xlu0 %v2943_v42, %s3454_s21  ;;  %v1614_v42 = vshll.u32 %v3743_v24, 16  ;;  %v620_v39 = vshll.u32 %v3759_v37, 16  ;;  %v618_v0 = vshrl.u32 %v3759_v37, 16  ;;  %v2929_v24 = vcombine.low %v264_v7, %v3730_v10 }
  0x61   : > { %v1847_v10 = vsel %vm805_vm0, %v1845_v16, %v1846_v19  ;;  %v1135_v43 = vrot.slane %v1133_v27, 1 }
  0x62   : > { %1248 = vrot.lane.b32.xlu1 %v1117_v21, %s3458_s29  ;;  %v1616_v56 = vrot.slane %v1614_v42, 1  ;;  %v622_v1 = vrot.slane %v620_v39, 1  ;;  %v824_v17 = vrot.slane %v2929_v24, 1  ;;  %v1131_v42 = vshrl.u32 %v2946_v12, 16  ;;  %v2840_v39 = vld [vmem:[%s3501_s20 + $0x64] sm:$0xf] }
  0x63   : > { %v3854_v24 = vcombine.low %v228_v9, %v3842_v11 }
  0x64   : > { %1246 = vrot.lane.b32.xlu0 %v1105_v25, %s3458_s29  ;;  %v1617_v55 = vsel %vm532_vm1, %v1612_v54, %v1616_v56  ;;  %v623_v14 = vor.u32 %v622_v1, %v618_v0  ;;  %v2945_v25 = vcombine.low %v2775_v2, %v3790_v8  ;;  %v826_v47 = vsel %vm805_vm0, %v824_v17, %v825_v33  ;;  %v3831_v1 = vld [vmem:[%s3501_s20 + $0x74] ss:$0 sps:$4 sm:$0x11]  }
  0x65   : > { %v2977_v54 = vcombine.low %v2817_v34, %v3790_v8  ;;  %v1136_v56 = vor.u32 %v1135_v43, %v1131_v42  ;;  %v1337_v2 = vrot.slane %v3364_v31, 1  ;;  %v1852_v9 = vrot.slane %v3831_v1, 1 }
  0x66   : > { %1376 = vrot.lane.b32.xlu1 %v1335_v36, %s3455_s22  ;;  %v628_v28 = vsel %vm532_vm1, %v623_v14, %v627_v15  ;;  %v1121_v35 = vshll.u32 %v2945_v25, 16  ;;  %v829_v36 = vsel %vm805_vm0, %v827_v22, %v828_v26  ;;  %v1119_v49 = vshrl.u32 %v2945_v25, 16  ;;  %v3847_v15 = vld [vmem:[%s3501_s20 + $0x68] ss:$0 sps:$4 sm:$0x11]  }
  0x67   : > { %v1141_v4 = vsel %vm532_vm1, %v1136_v56, %v1140_v58  ;;  %v1650_v14 = vshll.u32 %v3831_v1, 16  ;;  %v637_v33 = vshll.u32 %v3847_v15, 16  ;;  %v3026_v58 = vcombine.low %v2882_v44, %v3812_v40 }
  0x68   : > { %1374 = vrot.lane.b32.xlu0 %v1332_v38, %s3455_s22  ;;  %v2841_v38 = vld [vmem:[%s3501_s20 + $0x6c] sm:$0xf]  ;;  %v1123_v51 = vrot.slane %v1121_v35, 1 }
  0x69   : > { %v2994_v45 = vcombine.low %v2841_v38, %v3812_v40  ;;  %v1652_v17 = vrot.slane %v1650_v14, 1  ;;  %v3374_v38 = vld [vmem:[%s3501_s20 + $0x74] ss:$0 sps:$4 sm:$0x11]  }
  0x6a   : > { %1488 = vrot.lane.b32.xlu1 %v2992_v3, %s3459_s30  ;;  %v1842_v3 = vrot.slane %v3023_v53, 1  ;;  %v2978_v53 = vcombine.low %v2818_v41, %v3783_v5  ;;  %v1340_v5 = vrot.slane %v3363_v30, 1  ;;  %v644_v41 = vshll.u32 %v3854_v24, 16 }
  0x6b   : > { %v649_v56 = vshll.u32 %v3374_v38, 16  ;;  %v834_v14 = vrot.slane %v3374_v38, 1 }
  0x6c   : > { %1486 = vrot.lane.b32.xlu0 %v2991_v13, %s3459_s30  ;;  %v616_v13 = vsel %vm532_vm1, %v611_v63, %v615_v48  ;;  %v1844_v21 = vsel %vm805_vm0, %v1842_v3, %v1843_v6  ;;  %v2993_v48 = vcombine.low %v2839_v52, %v2840_v39  ;;  %v1645_v63 = vshll.u32 %v2994_v45, 16  ;;  %v3370_v3 = vld [vmem:[%s3501_s20 + $0x68] ss:$0 sps:$4 sm:$0x11]  }
  0x6d   : > { %v1339_v0 = vrot.slane %v2978_v53, 1  ;;  %v3837_v6 = vcombine.low %v226_v57, %v3827_v62  ;;  %v1638_v27 = vshll.u32 %v3370_v3, 16  ;;  %v642_v53 = vshrl.u32 %v3854_v24, 16  ;;  %v2781_v57 = vld [vmem:[%s3501_s20 + $0x78] sm:$0xf] }
  0x6e   : > { %1760 = vrot.lane.b32.xlu1 %v1629_v60, %s3460_s5  ;;  %v1124_v60 = vor.u32 %v1123_v51, %v1119_v49  ;;  %v1633_v8 = vshll.u32 %v2993_v48, 16  ;;  %v1631_v22 = vshrl.u32 %v2993_v48, 16  ;;  %v1849_v49 = vrot.slane %v3370_v3, 1  ;;  %v267_v51 = vld [vmem:[%s3501_s20 + $0x6c] sm:$0xe] }
  0x6f   : > { %v1341_v16 = vsel %vm805_vm0, %v1339_v0, %v1340_v5  ;;  %v632_v19 = vshll.u32 %v3837_v6, 16  ;;  %v630_v35 = vshrl.u32 %v3837_v6, 16  ;;  %v1640_v43 = vrot.slane %v1638_v27, 1  ;;  %v2779_v0 = vld [vmem:[%s3501_s20 + $0x6c] sm:$0xf] }
  0x70   : > { %1758 = vrot.lane.b32.xlu0 %v1617_v55, %s3460_s5  ;;  %v1336_v55 = vrot.slane %v2977_v54, 1  ;;  %v1129_v7 = vsel %vm532_vm1, %v1124_v60, %v1128_v59  ;;  %v1635_v26 = vrot.slane %v1633_v8, 1  ;;  %v646_v54 = vrot.slane %v644_v41, 1 }
  0x71   : > { %v2932_v5 = vcombine.low %v267_v51, %v3842_v11  ;;  %v651_v3 = vrot.slane %v649_v56, 1  ;;  %v1851_v8 = vrot.slane %v3026_v58, 1  ;;  %v3936_v51 = vld [vmem:[%s3501_s20 + $0x7c] sm:$0xf] }
  0x72   : > { %737 = vrot.lane.b32.xlu1 %v616_v13, %s3457_s26  ;;  %v1647_v13 = vrot.slane %v1645_v63, 1  ;;  %v1636_v42 = vor.u32 %v1635_v26, %v1631_v22  ;;  %v3882_v63 = vld [vmem:[%s3501_s20 + $0x7c] sm:$0xf]  ;;  %v831_v26 = vrot.slane %v3847_v15, 1 }
  0x74   : > { %1886 = vrot.lane.b32.xlu0 %v1844_v21, %s3461_s6  ;;  %v2881_v21 = vld [vmem:[%s3501_s20 + $0x60] sm:$0xe]  ;;  %v1641_v60 = vsel %vm532_vm1, %v1636_v42, %v1640_v43  ;;  %v2845_v42 = vld [vmem:[%s3501_s20 + $0x84] sm:$0xf]  ;;  %v3928_v43 = vld [vmem:[%s3501_s20 + $0x88] sm:$0xf] }
  0x75   : > { %v3025_v31 = vcombine.low %v2881_v21, %v2840_v39 }
  0x76   : > { %739 = vrot.lane.b32.xlu1 %v628_v28, %s3457_s26 }
  0x77   : > { %v1848_v34 = vrot.slane %v3025_v31, 1  ;;  %v3916_v31 = vld [vmem:[%s3501_s20 + $0x74] ss:$0 sps:$4 sm:$0x11]  }
  0x78   : > { %1888 = vrot.lane.b32.xlu0 %v1847_v10, %s3461_s6 }
  0x7a   : > { %868 = vrot.lane.b32.xlu1 %v829_v36, %s3456_s23  ;;  %v634_v36 = vrot.slane %v632_v19, 1  ;;  %v833_v19 = vrot.slane %v2932_v5, 1  ;;  %v230_v5 = vld [vmem:[%s3501_s20 + $0x78] sm:$0xf] }
  0x7c   : > { %866 = vrot.lane.b32.xlu0 %v826_v47, %s3456_s23  ;;  %v639_v47 = vrot.slane %v637_v33, 1  ;;  %v635_v39 = vor.u32 %v634_v36, %v630_v35  ;;  %v2819_v33 = vld [vmem:[%s3501_s20 + $0x6c] sm:$0xe]  ;;  %v835_v15 = vsel %vm805_vm0, %v833_v19, %v834_v14 }
  0x7e   : > { %980 = vrot.lane.b32.xlu1 %v2946_v12, %s3454_s21  ;;  %v1643_v12 = vshrl.u32 %v2994_v45, 16  ;;  %v640_v40 = vsel %vm532_vm1, %v635_v39, %v639_v47 }
  0x80   : > { %978 = vrot.lane.b32.xlu0 %v2945_v25, %s3454_s21  ;;  %v1338_v25 = vsel %vm805_vm0, %v1336_v55, %v1337_v2  ;;  %v1648_v10 = vor.u32 %v1647_v13, %v1643_v12  ;;  %v647_v55 = vor.u32 %v646_v54, %v642_v53 }
  0x82   : > { %1252 = vrot.lane.b32.xlu1 %v1141_v4, %s3458_s29  ;;  %v1653_v46 = vsel %vm532_vm1, %v1648_v10, %v1652_v17  ;;  %v3886_v4 = vld [vmem:[%s3501_s20 + $0x70] sm:$0xf]  ;;  %v652_v21 = vsel %vm532_vm1, %v647_v55, %v651_v3  ;;  %v2820_v17 = vld [vmem:[%s3501_s20 + $0x78] sm:$0xe] }
  0x83   : > { %v3901_v13 = vcombine.low %v2779_v0, %v3886_v4  ;;  %v2980_v54 = vcombine.low %v2820_v17, %v3882_v63  ;;  %v2979_v56 = vcombine.low %v2819_v33, %v3886_v4 }
  0x84   : > { %1250 = vrot.lane.b32.xlu0 %v1129_v7, %s3458_s29  ;;  %v3894_v7 = vcombine.low %v2781_v57, %v3882_v63 }
  0x85   : > { %v1145_v27 = vshll.u32 %v3901_v13, 16  ;;  %v1143_v41 = vshrl.u32 %v3901_v13, 16  ;;  %v1345_v55 = vrot.slane %v2980_v54, 1  ;;  %v2884_v54 = vld [vmem:[%s3501_s20 + $0x84] sm:$0xe] }
  0x86   : > { %1380 = vrot.lane.b32.xlu1 %v1341_v16, %s3455_s22  ;;  %v3858_v28 = vpop.permute.xlu1 %968  ;;  %v3905_v16 = vld [vmem:[%s3501_s20 + $0x80] ss:$0 sps:$4 sm:$0x11]   ;;  %v1157_v1 = vshll.u32 %v3894_v7, 16  ;;  %v1155_v35 = vshrl.u32 %v3894_v7, 16 }
  0x87   : > { %v3860_v30 = vpop.permute.xlu0 %966  ;;  %v1162_v36 = vshll.u32 %v3905_v16, 16  ;;  %v1147_v47 = vrot.slane %v1145_v27, 1  ;;  %v1346_v3 = vrot.slane %v3905_v16, 1 }
  0x88   : > { %1378 = vrot.lane.b32.xlu0 %v1338_v25, %s3455_s22  ;;  %v1159_v38 = vrot.slane %v1157_v1, 1 }
  0x89   : > { %v1148_v4 = vor.u32 %v1147_v47, %v1143_v41  ;;  %v1347_v27 = vsel %vm805_vm0, %v1345_v55, %v1346_v3 }
  0x8a   : > { %1492 = vrot.lane.b32.xlu1 %v2994_v45, %s3459_s30  ;;  %v266_v45 = vld [vmem:[%s3501_s20 + $0x60] sm:$0xe] }
  0x8b   : > { %v3872_v52 = vpop.permute.xlu0 %1366  ;;  %v2931_v12 = vcombine.low %v266_v45, %v3827_v62  ;;  %v1853_v62 = vsel %vm805_vm0, %v1851_v8, %v1852_v9  ;;  %v3944_v45 = vcombine.low %v2845_v42, %v3928_v43  ;;  %v1342_v8 = vrot.slane %v2979_v56, 1 }
  0x8c   : > { %1490 = vrot.lane.b32.xlu0 %v2993_v48, %s3459_s30  ;;  %v3877_v59 = vpop.permute.xlu1 %854  ;;  %v1850_v48 = vsel %vm805_vm0, %v1848_v34, %v1849_v49  ;;  %v1150_v34 = vshll.u32 %v3916_v31, 16  ;;  %v2843_v49 = vld [vmem:[%s3501_s20 + $0x78] sm:$0xf]  ;;  %v1343_v9 = vrot.slane %v3916_v31, 1 }
  0x8d   : > { %v830_v22 = vrot.slane %v2931_v12, 1  ;;  %v3950_v57 = vcombine.low %v2843_v49, %v3936_v51  ;;  %v1669_v12 = vshll.u32 %v3944_v45, 16 }
  0x8e   : > { %1764 = vrot.lane.b32.xlu1 %v1653_v46, %s3460_s5  ;;  %v1344_v31 = vsel %vm805_vm0, %v1342_v8, %v1343_v9 }
  0x8f   : > { %v832_v46 = vsel %vm805_vm0, %v830_v22, %v831_v26  ;;  %v232_v22 = vld [vmem:[%s3501_s20 + $0x84] sm:$0xf]  ;;  %v1671_v17 = vrot.slane %v1669_v12, 1  ;;  %v3028_v12 = vcombine.low %v2884_v54, %v3928_v43  ;;  %v3402_v54 = vld [vmem:[%s3501_s20 + $0x98] ss:$0 sps:$4 sm:$0x11]  }
  0x90   : > { %1762 = vrot.lane.b32.xlu0 %v1641_v60, %s3460_s5  ;;  %v3896_v2 = vpop.permute.xlu1 %856  ;;  %v1164_v60 = vrot.slane %v1162_v36, 1  ;;  %v1655_v36 = vshrl.u32 %v3950_v57, 16 }
  0x92   : > { %v726_v11 = vpop.permute.xlu0 %725  ;;  %741 = vrot.lane.b32.xlu1 %v640_v40, %s3457_s26  ;;  %v3958_v40 = vld [vmem:[%s3501_s20 + $0x7c] sm:$0xf] }
  0x93   : > { %v1912_v39 = vsel %vm1910_vm3, %v3529_v23, %v726_v11  ;;  %v1160_v23 = vor.u32 %v1159_v38, %v1155_v35  ;;  %v3968_v11 = vld [vmem:[%s3501_s20 + $0x8c] ss:$0 sps:$4 sm:$0x11]   ;;  %v3996_v35 = vld [vmem:[%s3501_s20 + $0x80] ss:$0 sps:$4 sm:$0x11]  }
  0x94   : > { %1890 = vrot.lane.b32.xlu0 %v1850_v48, %s3461_s6  ;;  %v3910_v25 = vpop.permute.xlu1 %1368  ;;  %v1945_v63 = vsel %vm1943_vm4, %v1912_v39, %v3877_v59  ;;  %v1152_v48 = vrot.slane %v1150_v34, 1  ;;  %v1674_v33 = vshll.u32 %v3968_v11, 16  ;;  %v2883_v39 = vld [vmem:[%s3501_s20 + $0x78] sm:$0xe] }
  0x95   : > { %v1978_v14 = vsel %vm1976_vm5, %v1945_v63, %v3860_v30  ;;  %v1165_v16 = vsel %vm532_vm1, %v1160_v23, %v1164_v60  ;;  %v3986_v30 = vld [vmem:[%s3501_s20 + $0x88] sm:$0xf]  ;;  %v3027_v55 = vcombine.low %v2883_v39, %v3936_v51 }
  0x96   : > { %v728_v10 = vpop.permute.xlu0 %727  ;;  %743 = vrot.lane.b32.xlu1 %v652_v21, %s3457_s26  ;;  %v3977_v21 = vld [vmem:[%s3501_s20 + $0x80] ss:$0 sps:$4 sm:$0x11]   ;;  %v4004_v38 = vcombine.low %v232_v22, %v3986_v30 }
  0x97   : > { %v1914_v58 = vsel %vm1910_vm3, %v3534_v29, %v728_v10  ;;  %v1667_v10 = vshrl.u32 %v3944_v45, 16  ;;  %v1855_v22 = vrot.slane %v3977_v21, 1 }
  0x98   : > { %1892 = vrot.lane.b32.xlu0 %v1853_v62, %s3461_s6  ;;  %v3930_v44 = vpop.permute.xlu1 %1240  ;;  %v1947_v59 = vsel %vm1943_vm4, %v1914_v58, %v3896_v2  ;;  %v1657_v2 = vshll.u32 %v3950_v57, 16  ;;  %v1153_v62 = vsel %vm532_vm1, %v1148_v4, %v1152_v48  ;;  %v1676_v58 = vrot.slane %v1674_v33, 1  ;;  %v4024_v4 = vld [vmem:[%s3501_s20 + $0x8c] ss:$0 sps:$4 sm:$0x11]  }
  0x99   : > { %v1672_v56 = vor.u32 %v1671_v17, %v1667_v10  ;;  %v668_v48 = vshll.u32 %v4004_v38, 16  ;;  %v673_v43 = vshll.u32 %v4024_v4, 16  ;;  %v4057_v10 = vld [vmem:[%s3501_s20 + $0x88] sm:$0xf]  ;;  %v1857_v17 = vrot.slane %v3028_v12, 1 }
  0x9a   : > { %v1239_v53 = vpop.permute.xlu0 %1238  ;;  %872 = vrot.lane.b32.xlu1 %v835_v15, %s3456_s23  ;;  %v1659_v47 = vrot.slane %v1657_v2, 1 }
  0x9b   : > { %v2011_v19 = vsel %vm2009_vm6, %v1978_v14, %v1239_v53  ;;  %v670_v2 = vrot.slane %v668_v48, 1  ;;  %v2822_v48 = vld [vmem:[%s3501_s20 + $0x90] sm:$0xe] }
  0x9c   : > { %870 = vrot.lane.b32.xlu0 %v832_v46, %s3456_s23  ;;  %v3954_v0 = vpop.permute.xlu1 %1480 }
  0x9e   : > { %v1479_v29 = vpop.permute.xlu0 %1478  ;;  %984 = vrot.lane.b32.xlu1 %v3894_v7, %s3454_s21  ;;  %v3980_v7 = vcombine.low %v230_v5, %v3958_v40 }
  0xa0   : > { %982 = vrot.lane.b32.xlu0 %v3901_v13, %s3454_s21  ;;  %v1753_v1 = vpop.permute.xlu1 %1752  ;;  %v1980_v13 = vsel %vm1976_vm5, %v1947_v59, %v3858_v28  ;;  %v2044_v28 = vsel %vm2042_vm7, %v2011_v19, %v3872_v52  ;;  %v656_v15 = vshll.u32 %v3980_v7, 16  ;;  %v1662_v52 = vshll.u32 %v3977_v21, 16  ;;  %v269_v19 = vld [vmem:[%s3501_s20 + $0x84] sm:$0xe] }
  0xa1   : > { %v2013_v41 = vsel %vm2009_vm6, %v1980_v13, %v3930_v44  ;;  %v2077_v42 = vsel %vm2075_vm8, %v2044_v28, %v1479_v29  ;;  %v661_v44 = vshll.u32 %v3996_v35, 16  ;;  %v654_v60 = vshrl.u32 %v3980_v7, 16  ;;  %v2785_v13 = vld [vmem:[%s3501_s20 + $0x90] sm:$0xf] }
  0xa2   : > { %v1751_v26 = vpop.permute.xlu0 %1750  ;;  %1256 = vrot.lane.b32.xlu1 %v1165_v16, %s3458_s29  ;;  %v2046_v23 = vsel %vm2042_vm7, %v2013_v41, %v3910_v25  ;;  %v658_v63 = vrot.slane %v656_v15, 1  ;;  %v1660_v25 = vor.u32 %v1659_v47, %v1655_v36  ;;  %v1664_v3 = vrot.slane %v1662_v52, 1 }
  0xa3   : > { %v2110_v34 = vsel %vm2108_vm9, %v2077_v42, %v1751_v26  ;;  %v2079_v5 = vsel %vm2075_vm8, %v2046_v23, %v3954_v0  ;;  %v1677_v0 = vsel %vm532_vm1, %v1672_v56, %v1676_v58  ;;  %v663_v14 = vrot.slane %v661_v44, 1  ;;  %v4050_v26 = vld [vmem:[%s3501_s20 + $0x94] sm:$0xf] }
  0xa4   : > { %1254 = vrot.lane.b32.xlu0 %v1153_v62, %s3458_s29  ;;  %v4009_v46 = vpop.permute.xlu1 %729  ;;  %v2112_v59 = vsel %vm2108_vm9, %v2079_v5, %v1753_v1  ;;  %v659_v51 = vor.u32 %v658_v63, %v654_v60  ;;  %v666_v16 = vshrl.u32 %v4004_v38, 16  ;;  %v1854_v62 = vrot.slane %v3027_v55, 1  ;;  %v3403_v60 = vld [vmem:[%s3501_s20 + $0x8c] ss:$0 sps:$4 sm:$0x11]  }
  0xa5   : > { %v2934_v33 = vcombine.low %v269_v19, %v3986_v30  ;;  %v675_v36 = vrot.slane %v673_v43, 1  ;;  %v2950_v15 = vcombine.low %v2785_v13, %v4050_v26  ;;  %v1858_v47 = vrot.slane %v3968_v11, 1  ;;  %v2849_v5 = vld [vmem:[%s3501_s20 + $0x9c] sm:$0xf]  ;;  %v4086_v55 = vld [vmem:[%s3501_s20 + $0xa0] sm:$0xf] }
  0xa6   : > { %v1879_v49 = vpop.permute.xlu0 %1878  ;;  %1384 = vrot.lane.b32.xlu1 %v1347_v27, %s3455_s22  ;;  %v268_v27 = vld [vmem:[%s3501_s20 + $0x78] sm:$0xe]  ;;  %v664_v28 = vsel %vm532_vm1, %v659_v51, %v663_v14  ;;  %v671_v21 = vor.u32 %v670_v2, %v666_v16  ;;  %v1856_v42 = vsel %vm805_vm0, %v1854_v62, %v1855_v22  ;;  %v837_v44 = vrot.slane %v3996_v35, 1  ;;  %v2847_v43 = vld [vmem:[%s3501_s20 + $0x90] sm:$0xf] }
  0xa7   : > { %v2143_v53 = vsel %vm2141_vm10, %v2110_v34, %v1879_v49  ;;  %v2933_v52 = vcombine.low %v268_v27, %v3958_v40  ;;  %v839_v39 = vrot.slane %v2934_v33, 1  ;;  %v1181_v11 = vshll.u32 %v2950_v15, 16  ;;  %v4100_v19 = vld [vmem:[%s3501_s20 + $0x94] sm:$0xf] }
  0xa8   : > { %1382 = vrot.lane.b32.xlu0 %v1344_v31, %s3455_s22  ;;  %3242 = vmatprep.mubr.msk.bf16.mxu0 %vm2201_vm11, %v2143_v53  ;;  %v4029_v29 = vpop.permute.xlu1 %731  ;;  %v2783_v31 = vld [vmem:[%s3501_s20 + $0x84] sm:$0xf]  ;;  %v676_v49 = vsel %vm532_vm1, %v671_v21, %v675_v36  ;;  %v840_v53 = vrot.slane %v4024_v4, 1  ;;  %v1859_v56 = vsel %vm805_vm0, %v1857_v17, %v1858_v47  ;;  %v1174_v14 = vshll.u32 %v3403_v60, 16  ;;  %v234_v17 = vld [vmem:[%s3501_s20 + $0x90] sm:$0xf] }
  0xa9   : > { %v2949_v30 = vcombine.low %v2783_v31, %v4057_v10  ;;  %v836_v58 = vrot.slane %v2933_v52, 1  ;;  %v2982_v16 = vcombine.low %v2822_v48, %v4050_v26  ;;  %v4096_v2 = vcombine.low %v2849_v5, %v4086_v55  ;;  %v4112_v33 = vld [vmem:[%s3501_s20 + $0x94] sm:$0xf]  ;;  %v4117_v52 = vld [vmem:[%s3501_s20 + $0xa4] ss:$0 sps:$4 sm:$0x11]  }
  0xaa   : > { %v1881_v8 = vpop.permute.xlu0 %1880  ;;  %1496 = vrot.lane.b32.xlu1 %v3944_v45, %s3459_s30  ;;  %v1665_v45 = vsel %vm532_vm1, %v1660_v25, %v1664_v3  ;;  %v841_v4 = vsel %vm805_vm0, %v839_v39, %v840_v53  ;;  %v2821_v25 = vld [vmem:[%s3501_s20 + $0x84] sm:$0xe]  ;;  %v1179_v3 = vshrl.u32 %v2950_v15, 16  ;;  %v1176_v26 = vrot.slane %v1174_v14, 1 }
  0xab   : > { %v2145_v9 = vsel %vm2141_vm10, %v2112_v59, %v1881_v8  ;;  %v1169_v23 = vshll.u32 %v2949_v30, 16  ;;  %v1183_v59 = vrot.slane %v1181_v11, 1  ;;  %v1186_v8 = vshll.u32 %v3402_v54, 16  ;;  %v4125_v53 = vld [vmem:[%s3501_s20 + $0x98] ss:$0 sps:$4 sm:$0x11]  }
  0xac   : > { %1494 = vrot.lane.b32.xlu0 %v3950_v57, %s3459_s30  ;;  %3243 = vmatmul.mubr.msk.bf16.vlgmr.msra.gmra.mrb[0].mxu0 %vm2201_vm11, %v2145_v9  ;;  %v4044_v1 = vpop.permute.xlu1 %860  ;;  %v838_v9 = vsel %vm805_vm0, %v836_v58, %v837_v44  ;;  %v1167_v12 = vshrl.u32 %v2949_v30, 16  ;;  %v4108_v31 = vcombine.low %v2847_v43, %v4100_v19  ;;  %v1351_v21 = vrot.slane %v2982_v16, 1  ;;  %v236_v44 = vld [vmem:[%s3501_s20 + $0x9c] sm:$0xf]  ;;  %v2885_v43 = vld [vmem:[%s3501_s20 + $0x90] sm:$0xe] }
  0xad   : > { %v1184_v62 = vor.u32 %v1183_v59, %v1179_v3  ;;  %v1188_v22 = vrot.slane %v1186_v8, 1  ;;  %v1693_v36 = vshll.u32 %v4096_v2, 16  ;;  %v1349_v47 = vrot.slane %v3403_v60, 1  ;;  %v4148_v3 = vld [vmem:[%s3501_s20 + $0x98] ss:$0 sps:$4 sm:$0x11]  }
  0xae   : > { %v4052_v57 = vpop.permute.xlu0 %858  ;;  %1768 = vrot.lane.b32.xlu1 %v1677_v0, %s3460_s5  ;;  %v1171_v0 = vrot.slane %v1169_v23, 1  ;;  %v4128_v11 = vcombine.low %v234_v17, %v4112_v33  ;;  %v1681_v58 = vshll.u32 %v4108_v31, 16  ;;  %v1691_v60 = vshrl.u32 %v4096_v2, 16 }
  0xaf   : > { %v1189_v39 = vsel %vm532_vm1, %v1184_v62, %v1188_v22  ;;  %v1695_v48 = vrot.slane %v1693_v36, 1  ;;  %v1686_v16 = vshll.u32 %v4125_v53, 16  ;;  %v3029_v36 = vcombine.low %v2885_v43, %v4100_v19 }
  0xb0   : > { %1766 = vrot.lane.b32.xlu0 %v1665_v45, %s3460_s5  ;;  %v4064_v41 = vpop.permute.xlu1 %972  ;;  %v2981_v45 = vcombine.low %v2821_v25, %v4057_v10  ;;  %v1172_v27 = vor.u32 %v1171_v0, %v1167_v12  ;;  %v1352_v10 = vrot.slane %v3402_v54, 1  ;;  %v1679_v25 = vshrl.u32 %v4108_v31, 16 }
  0xb1   : > { %v1683_v14 = vrot.slane %v1681_v58, 1  ;;  %v271_v58 = vld [vmem:[%s3501_s20 + $0x9c] sm:$0xe]  ;;  %v843_v43 = vrot.slane %v4148_v3, 1 }
  0xb2   : > { %v4070_v34 = vpop.permute.xlu0 %970  ;;  %745 = vrot.lane.b32.xlu1 %v664_v28, %s3457_s26  ;;  %v1353_v23 = vsel %vm805_vm0, %v1351_v21, %v1352_v10 }
  0xb4   : > { %1894 = vrot.lane.b32.xlu0 %v1856_v42, %s3461_s6  ;;  %v4077_v40 = vpop.permute.xlu1 %1244  ;;  %v1348_v42 = vrot.slane %v2981_v45, 1  ;;  %v1696_v45 = vor.u32 %v1695_v48, %v1691_v60  ;;  %v1860_v48 = vrot.slane %v3029_v36, 1 }
  0xb6   : > { %v1243_v63 = vpop.permute.xlu0 %1242  ;;  %747 = vrot.lane.b32.xlu1 %v676_v49, %s3457_s26  ;;  %v1916_v49 = vsel %vm1910_vm3, %v3585_v18, %v4009_v46  ;;  %v4136_v18 = vld [vmem:[%s3501_s20 + $0xa0] sm:$0xf]  ;;  %v1350_v5 = vsel %vm805_vm0, %v1348_v42, %v1349_v47  ;;  %v1688_v42 = vrot.slane %v1686_v16, 1 }
  0xb7   : > { %v4157_v8 = vcombine.low %v236_v44, %v4136_v18 }
  0xb8   : > { %1896 = vrot.lane.b32.xlu0 %v1859_v56, %s3461_s6  ;;  %v4091_v35 = vpop.permute.xlu1 %1372  ;;  %v1177_v56 = vsel %vm532_vm1, %v1172_v27, %v1176_v26  ;;  %v685_v27 = vshll.u32 %v4148_v3, 16 }
  0xba   : > { %v1371_v51 = vpop.permute.xlu0 %1370  ;;  %876 = vrot.lane.b32.xlu1 %v841_v4, %s3456_s23  ;;  %v1698_v4 = vshll.u32 %v4117_v52, 16 }
  0xbc   : > { %874 = vrot.lane.b32.xlu0 %v838_v9, %s3456_s23  ;;  %v4105_v13 = vpop.permute.xlu1 %1484  ;;  %v1700_v22 = vrot.slane %v1698_v4, 1 }
  0xbe   : > { %v1483_v28 = vpop.permute.xlu0 %1482  ;;  %988 = vrot.lane.b32.xlu1 %v2950_v15, %s3454_s21  ;;  %v1949_v15 = vsel %vm1943_vm4, %v1916_v49, %v4052_v57 }
  0xbf   : > { %v1982_v46 = vsel %vm1976_vm5, %v1949_v15, %v4070_v34  ;;  %v1918_v34 = vsel %vm1910_vm3, %v3598_v32, %v4029_v29 }
  0xc0   : > { %986 = vrot.lane.b32.xlu0 %v2949_v30, %s3454_s21  ;;  %v1757_v54 = vpop.permute.xlu1 %1756  ;;  %v2015_v57 = vsel %vm2009_vm6, %v1982_v46, %v1243_v63  ;;  %v680_v63 = vshll.u32 %v4128_v11, 16  ;;  %v1951_v9 = vsel %vm1943_vm4, %v1918_v34, %v4044_v1  ;;  %v4212_v34 = vld [vmem:[%s3501_s20 + $0xa0] sm:$0xf] }
  0xc1   : > { %v2048_v59 = vsel %vm2042_vm7, %v2015_v57, %v1371_v51  ;;  %v1984_v32 = vsel %vm1976_vm5, %v1951_v9, %v4064_v41  ;;  %v678_v41 = vshrl.u32 %v4128_v11, 16  ;;  %v1861_v57 = vrot.slane %v4125_v53, 1 }
  0xc2   : > { %v1755_v30 = vpop.permute.xlu0 %1754  ;;  %1260 = vrot.lane.b32.xlu1 %v1189_v39, %s3458_s29  ;;  %v2081_v12 = vsel %vm2075_vm8, %v2048_v59, %v1483_v28  ;;  %v2017_v62 = vsel %vm2009_vm6, %v1984_v32, %v4077_v40  ;;  %v682_v17 = vrot.slane %v680_v63, 1  ;;  %v4180_v40 = vld [vmem:[%s3501_s20 + $0xa4] ss:$0 sps:$4 sm:$0x11]   ;;  %v692_v28 = vshll.u32 %v4157_v8, 16 }
  0xc3   : > { %v2114_v29 = vsel %vm2108_vm9, %v2081_v12, %v1755_v30  ;;  %v2050_v26 = vsel %vm2042_vm7, %v2017_v62, %v4091_v35  ;;  %v1684_v35 = vor.u32 %v1683_v14, %v1679_v25  ;;  %v2886_v39 = vld [vmem:[%s3501_s20 + $0x9c] sm:$0xe]  ;;  %v697_v46 = vshll.u32 %v4180_v40, 16 }
  0xc4   : > { %1258 = vrot.lane.b32.xlu0 %v1177_v56, %s3458_s29  ;;  %v4162_v0 = vpop.permute.xlu1 %733  ;;  %v2083_v21 = vsel %vm2075_vm8, %v2050_v26, %v4105_v13  ;;  %v1701_v56 = vsel %vm532_vm1, %v1696_v45, %v1700_v22  ;;  %v687_v13 = vrot.slane %v685_v27, 1  ;;  %v683_v19 = vor.u32 %v682_v17, %v678_v41  ;;  %v2787_v25 = vld [vmem:[%s3501_s20 + $0x9c] sm:$0xf]  ;;  %v3418_v22 = vld [vmem:[%s3501_s20 + $0xb0] ss:$0 sps:$4 sm:$0x11]  }
  0xc5   : > { %v2116_v47 = vsel %vm2108_vm9, %v2083_v21, %v1757_v54  ;;  %v690_v54 = vshrl.u32 %v4157_v8, 16  ;;  %v694_v44 = vrot.slane %v692_v28, 1  ;;  %v3030_v30 = vcombine.low %v2886_v39, %v4086_v55  ;;  %v3419_v41 = vld [vmem:[%s3501_s20 + $0xa4] ss:$0 sps:$4 sm:$0x11]  }
  0xc6   : > { %v1883_v51 = vpop.permute.xlu0 %1882  ;;  %1388 = vrot.lane.b32.xlu1 %v1353_v23, %s3455_s22  ;;  %v1689_v60 = vsel %vm532_vm1, %v1684_v35, %v1688_v42  ;;  %v2936_v59 = vcombine.low %v271_v58, %v4136_v18  ;;  %v688_v63 = vsel %vm532_vm1, %v683_v19, %v687_v13  ;;  %v699_v53 = vrot.slane %v697_v46, 1  ;;  %v2823_v21 = vld [vmem:[%s3501_s20 + $0x9c] sm:$0xe]  ;;  %v4243_v39 = vld [vmem:[%s3501_s20 + $0xb8] sm:$0xf] }
  0xc7   : > { %v2147_v1 = vsel %vm2141_vm10, %v2114_v29, %v1883_v51  ;;  %v695_v9 = vor.u32 %v694_v44, %v690_v54  ;;  %v1862_v16 = vsel %vm805_vm0, %v1860_v48, %v1861_v57  ;;  %v1863_v32 = vrot.slane %v3030_v30, 1  ;;  %v2851_v46 = vld [vmem:[%s3501_s20 + $0xa8] sm:$0xf] }
  0xc8   : > { %1386 = vrot.lane.b32.xlu0 %v1350_v5, %s3455_s22  ;;  %3246 = vmatprep.mubr.msk.bf16.mxu0 %vm2201_vm11, %v2147_v1  ;;  %v4185_v10 = vpop.permute.xlu1 %735  ;;  %v2790_v5 = vld [vmem:[%s3501_s20 + $0xac] sm:$0xf]  ;;  %v1864_v29 = vrot.slane %v4117_v52, 1  ;;  %v2951_v18 = vcombine.low %v2787_v25, %v4212_v34  ;;  %v846_v51 = vrot.slane %v4180_v40, 1  ;;  %v845_v62 = vrot.slane %v2936_v59, 1 }
  0xc9   : > { %v700_v45 = vsel %vm532_vm1, %v695_v9, %v699_v53  ;;  %v2824_v40 = vld [vmem:[%s3501_s20 + $0xa8] sm:$0xe]  ;;  %v1210_v42 = vshll.u32 %v3418_v22, 16  ;;  %v1198_v19 = vshll.u32 %v3419_v41, 16  ;;  %v2983_v44 = vcombine.low %v2823_v21, %v4212_v34 }
  0xca   : > { %v1885_v49 = vpop.permute.xlu0 %1884  ;;  %1500 = vrot.lane.b32.xlu1 %v4096_v2, %s3459_s30  ;;  %v270_v2 = vld [vmem:[%s3501_s20 + $0x90] sm:$0xe]  ;;  %v1865_v26 = vsel %vm805_vm0, %v1863_v32, %v1864_v29  ;;  %v1193_v17 = vshll.u32 %v2951_v18, 16  ;;  %v847_v36 = vsel %vm805_vm0, %v845_v62, %v846_v51  ;;  %v1191_v13 = vshrl.u32 %v2951_v18, 16  ;;  %v238_v59 = vld [vmem:[%s3501_s20 + $0xa8] sm:$0xf] }
  0xcb   : > { %v2149_v15 = vsel %vm2141_vm10, %v2116_v47, %v1885_v49  ;;  %v2935_v55 = vcombine.low %v270_v2, %v4112_v33  ;;  %v2984_v47 = vcombine.low %v2824_v40, %v2790_v5  ;;  %v2853_v49 = vld [vmem:[%s3501_s20 + $0xb4] sm:$0xf]  ;;  %v4251_v2 = vld [vmem:[%s3501_s20 + $0xac] sm:$0xf]  ;;  %v1212_v48 = vrot.slane %v1210_v42, 1 }
  0xcc   : > { %1498 = vrot.lane.b32.xlu0 %v4108_v31, %s3459_s30  ;;  %3247 = vmatmul.mubr.msk.bf16.gmra.mrb[4].mxu0 %vm2201_vm11, %v2149_v15  ;;  %v4202_v23 = vpop.permute.xlu1 %864  ;;  %v2789_v31 = vld [vmem:[%s3501_s20 + $0xa8] sm:$0xf]  ;;  %v1195_v58 = vrot.slane %v1193_v17, 1  ;;  %v4255_v30 = vcombine.low %v2853_v49, %v4243_v39  ;;  %v4261_v34 = vcombine.low %v2851_v46, %v4251_v2  ;;  %v1358_v9 = vrot.slane %v3418_v22, 1 }
  0xcd   : > { %v2952_v12 = vcombine.low %v2789_v31, %v2790_v5  ;;  %v842_v1 = vrot.slane %v2935_v55, 1  ;;  %v1200_v5 = vrot.slane %v1198_v19, 1  ;;  %v1357_v25 = vrot.slane %v2984_v47, 1  ;;  %v4265_v55 = vld [vmem:[%s3501_s20 + $0xac] sm:$0xf] }
  0xce   : > { %v4208_v4 = vpop.permute.xlu0 %862  ;;  %1772 = vrot.lane.b32.xlu1 %v1701_v56, %s3460_s5  ;;  %v1196_v31 = vor.u32 %v1195_v58, %v1191_v13  ;;  %v1354_v53 = vrot.slane %v2983_v44, 1  ;;  %v4268_v32 = vld [vmem:[%s3501_s20 + $0xbc] ss:$0 sps:$4 sm:$0x11]   ;;  %v1717_v29 = vshll.u32 %v4255_v30, 16  ;;  %v1920_v51 = vsel %vm1910_vm3, %v3662_v50, %v4162_v0 }
  0xcf   : > { %v1205_v52 = vshll.u32 %v2952_v12, 16  ;;  %v1203_v3 = vshrl.u32 %v2952_v12, 16  ;;  %v844_v56 = vsel %vm805_vm0, %v842_v1, %v843_v43  ;;  %v4281_v62 = vcombine.low %v238_v59, %v4265_v55  ;;  %v4289_v50 = vld [vmem:[%s3501_s20 + $0xb8] sm:$0xf]  ;;  %v2887_v46 = vld [vmem:[%s3501_s20 + $0xa8] sm:$0xe] }
  0xd0   : > { %1770 = vrot.lane.b32.xlu0 %v1689_v60, %s3460_s5  ;;  %v4219_v14 = vpop.permute.xlu1 %976  ;;  %v1953_v1 = vsel %vm1943_vm4, %v1920_v51, %v4208_v4  ;;  %v1201_v22 = vsel %vm532_vm1, %v1196_v31, %v1200_v5  ;;  %v1722_v40 = vshll.u32 %v4268_v32, 16  ;;  %v1719_v21 = vrot.slane %v1717_v29, 1  ;;  %v4333_v59 = vld [vmem:[%s3501_s20 + $0xbc] ss:$0 sps:$4 sm:$0x11]  }
  0xd1   : > { %v1207_v35 = vrot.slane %v1205_v52, 1  ;;  %v1705_v52 = vshll.u32 %v4261_v34, 16 }
  0xd2   : > { %v4224_v33 = vpop.permute.xlu0 %974  ;;  %749 = vrot.lane.b32.xlu1 %v688_v63, %s3457_s26  ;;  %v1724_v44 = vrot.slane %v1722_v40, 1  ;;  %v2793_v40 = vld [vmem:[%s3501_s20 + $0xc0] sm:$0xf] }
  0xd3   : > { %v1208_v60 = vor.u32 %v1207_v35, %v1203_v3  ;;  %v1986_v0 = vsel %vm1976_vm5, %v1953_v1, %v4224_v33  ;;  %v1715_v3 = vshrl.u32 %v4255_v30, 16  ;;  %v4301_v35 = vld [vmem:[%s3501_s20 + $0xb0] ss:$0 sps:$4 sm:$0x11]   ;;  %v1922_v33 = vsel %vm1910_vm3, %v3676_v61, %v4185_v10 }
  0xd4   : > { %1898 = vrot.lane.b32.xlu0 %v1862_v16, %s3461_s6  ;;  %v4232_v27 = vpop.permute.xlu1 %1248  ;;  %v1355_v16 = vrot.slane %v3419_v41, 1  ;;  %v1359_v41 = vsel %vm805_vm0, %v1357_v25, %v1358_v9  ;;  %v1955_v49 = vsel %vm1943_vm4, %v1922_v33, %v4202_v23  ;;  %v1707_v58 = vrot.slane %v1705_v52, 1  ;;  %v4367_v33 = vld [vmem:[%s3501_s20 + $0xb8] sm:$0xf] }
  0xd5   : > { %v1213_v43 = vsel %vm532_vm1, %v1208_v60, %v1212_v48  ;;  %v1988_v61 = vsel %vm1976_vm5, %v1955_v49, %v4219_v14  ;;  %v1720_v48 = vor.u32 %v1719_v21, %v1715_v3  ;;  %v709_v31 = vshll.u32 %v4301_v35, 16  ;;  %v272_v21 = vld [vmem:[%s3501_s20 + $0xa8] sm:$0xe] }
  0xd6   : > { %v1247_v28 = vpop.permute.xlu0 %1246  ;;  %751 = vrot.lane.b32.xlu1 %v700_v45, %s3457_s26  ;;  %v4278_v45 = vld [vmem:[%s3501_s20 + $0xb0] ss:$0 sps:$4 sm:$0x11]   ;;  %v1356_v17 = vsel %vm805_vm0, %v1354_v53, %v1355_v16  ;;  %v2021_v60 = vsel %vm2009_vm6, %v1988_v61, %v4232_v27  ;;  %v702_v14 = vshrl.u32 %v4281_v62, 16 }
  0xd7   : > { %v2019_v4 = vsel %vm2009_vm6, %v1986_v0, %v1247_v28  ;;  %v704_v28 = vshll.u32 %v4281_v62, 16  ;;  %v1710_v19 = vshll.u32 %v4278_v45, 16  ;;  %v273_v0 = vld [vmem:[%s3501_s20 + $0xb4] sm:$0xe] }
  0xd8   : > { %1900 = vrot.lane.b32.xlu0 %v1865_v26, %s3461_s6  ;;  %v4245_v15 = vpop.permute.xlu1 %1376  ;;  %v240_v26 = vld [vmem:[%s3501_s20 + $0xb4] sm:$0xf] }
  0xd9   : > { %v4310_v47 = vcombine.low %v240_v26, %v4289_v50  ;;  %v2054_v5 = vsel %vm2042_vm7, %v2021_v60, %v4245_v15  ;;  %v706_v25 = vrot.slane %v704_v28, 1  ;;  %v1712_v16 = vrot.slane %v1710_v19, 1  ;;  %v3436_v60 = vld [vmem:[%s3501_s20 + $0xc8] ss:$0 sps:$4 sm:$0x11]  }
  0xda   : > { %v1375_v54 = vpop.permute.xlu0 %1374  ;;  %880 = vrot.lane.b32.xlu1 %v847_v36, %s3456_s23  ;;  %v1703_v36 = vshrl.u32 %v4261_v34, 16  ;;  %v3031_v15 = vcombine.low %v2887_v46, %v4251_v2  ;;  %v721_v26 = vshll.u32 %v4333_v59, 16  ;;  %v2938_v28 = vcombine.low %v273_v0, %v4289_v50 }
  0xdb   : > { %v2052_v42 = vsel %vm2042_vm7, %v2019_v4, %v1375_v54  ;;  %v716_v27 = vshll.u32 %v4310_v47, 16  ;;  %v707_v2 = vor.u32 %v706_v25, %v702_v14  ;;  %v4360_v4 = vld [vmem:[%s3501_s20 + $0xc4] sm:$0xf]  ;;  %v852_v46 = vrot.slane %v4333_v59, 1  ;;  %v2825_v59 = vld [vmem:[%s3501_s20 + $0xb4] sm:$0xe] }
  0xdc   : > { %878 = vrot.lane.b32.xlu0 %v844_v56, %s3456_s23  ;;  %v4258_v57 = vpop.permute.xlu1 %1488  ;;  %v1708_v53 = vor.u32 %v1707_v58, %v1703_v36  ;;  %v2791_v36 = vld [vmem:[%s3501_s20 + $0xb4] sm:$0xf]  ;;  %v723_v49 = vrot.slane %v721_v26, 1  ;;  %v3437_v14 = vld [vmem:[%s3501_s20 + $0xbc] ss:$0 sps:$4 sm:$0x11]  }
  0xdd   : > { %v718_v52 = vrot.slane %v716_v27, 1  ;;  %v4404_v26 = vld [vmem:[%s3501_s20 + $0xc4] sm:$0xf] }
  0xde   : > { %v1487_v63 = vpop.permute.xlu0 %1486  ;;  %992 = vrot.lane.b32.xlu1 %v2952_v12, %s3454_s21 }
  0xdf   : > { %v2085_v56 = vsel %vm2075_vm8, %v2052_v42, %v1487_v63  ;;  %v2087_v63 = vsel %vm2075_vm8, %v2054_v5, %v4258_v57  ;;  %v1725_v57 = vsel %vm532_vm1, %v1720_v48, %v1724_v44  ;;  %v1870_v42 = vrot.slane %v4268_v32, 1 }
  0xe0   : > { %990 = vrot.lane.b32.xlu0 %v2951_v18, %s3454_s21  ;;  %v1761_v12 = vpop.permute.xlu1 %1760  ;;  %v2953_v32 = vcombine.low %v2791_v36, %v4367_v33  ;;  %v851_v44 = vrot.slane %v2938_v28, 1  ;;  %v849_v5 = vrot.slane %v4301_v35, 1 }
  0xe1   : > { %v2120_v29 = vsel %vm2108_vm9, %v2087_v63, %v1761_v12  ;;  %v714_v12 = vshrl.u32 %v4310_v47, 16  ;;  %v2826_v63 = vld [vmem:[%s3501_s20 + $0xc0] sm:$0xe] }
  0xe2   : > { %v1759_v18 = vpop.permute.xlu0 %1758  ;;  %1264 = vrot.lane.b32.xlu1 %v1213_v43, %s3458_s29  ;;  %v2888_v43 = vld [vmem:[%s3501_s20 + $0xb4] sm:$0xe]  ;;  %v1217_v25 = vshll.u32 %v2953_v32, 16  ;;  %v2986_v0 = vcombine.low %v2826_v63, %v4360_v4 }
  0xe3   : > { %v2118_v10 = vsel %vm2108_vm9, %v2085_v56, %v1759_v18  ;;  %v1713_v18 = vsel %vm532_vm1, %v1708_v53, %v1712_v16  ;;  %v2954_v56 = vcombine.low %v2793_v40, %v4360_v4  ;;  %v853_v53 = vsel %vm805_vm0, %v851_v44, %v852_v46 }
  0xe4   : > { %1262 = vrot.lane.b32.xlu0 %v1201_v22, %s3458_s29  ;;  %v4315_v13 = vpop.permute.xlu1 %737  ;;  %v711_v22 = vrot.slane %v709_v31, 1  ;;  %v1363_v4 = vrot.slane %v2986_v0, 1 }
  0xe5   : > { %v1227_v16 = vshrl.u32 %v2954_v56, 16 }
  0xe6   : > { %v1887_v54 = vpop.permute.xlu0 %1886  ;;  %1392 = vrot.lane.b32.xlu1 %v1359_v41, %s3455_s22  ;;  %v1866_v41 = vrot.slane %v3031_v15, 1 }
  0xe7   : > { %v2151_v23 = vsel %vm2141_vm10, %v2118_v10, %v1887_v54  ;;  %v2937_v10 = vcombine.low %v272_v21, %v4265_v55 }
  0xe8   : > { %1390 = vrot.lane.b32.xlu0 %v1356_v17, %s3455_s22  ;;  %3250 = vmatprep.mubr.msk.bf16.mxu0 %vm2201_vm11, %v2151_v23  ;;  %v4338_v9 = vpop.permute.xlu1 %739  ;;  %v1867_v17 = vrot.slane %v4278_v45, 1  ;;  %v719_v45 = vor.u32 %v718_v52, %v714_v12  ;;  %v1229_v23 = vshll.u32 %v2954_v56, 16  ;;  %v2855_v52 = vld [vmem:[%s3501_s20 + $0xc0] sm:$0xf] }
  0xe9   : > { %v848_v31 = vrot.slane %v2937_v10, 1 }
  0xea   : > { %v1889_v51 = vpop.permute.xlu0 %1888  ;;  %1504 = vrot.lane.b32.xlu1 %v4255_v30, %s3459_s30  ;;  %v1868_v19 = vsel %vm805_vm0, %v1866_v41, %v1867_v17  ;;  %v724_v54 = vsel %vm532_vm1, %v719_v45, %v723_v49  ;;  %v1231_v15 = vrot.slane %v1229_v23, 1  ;;  %v1364_v45 = vrot.slane %v3436_v60, 1 }
  0xeb   : > { %v2153_v1 = vsel %vm2141_vm10, %v2120_v29, %v1889_v51  ;;  %v1234_v29 = vshll.u32 %v3436_v60, 16  ;;  %v2857_v51 = vld [vmem:[%s3501_s20 + $0xcc] sm:$0xf]  ;;  %v850_v35 = vsel %vm805_vm0, %v848_v31, %v849_v5  ;;  %v1361_v49 = vrot.slane %v3437_v14, 1 }
  0xec   : > { %1502 = vrot.lane.b32.xlu0 %v4261_v34, %s3459_s30  ;;  %3251 = vmatmul.mubr.msk.bf16.gmra.mrb[8].mxu0 %vm2201_vm11, %v2153_v1  ;;  %v4353_v30 = vpop.permute.xlu1 %868  ;;  %v3032_v34 = vcombine.low %v2888_v43, %v4243_v39  ;;  %v712_v39 = vsel %vm532_vm1, %v707_v2, %v711_v22  ;;  %v1215_v1 = vshrl.u32 %v2953_v32, 16  ;;  %v1222_v22 = vshll.u32 %v3437_v14, 16  ;;  %v4400_v2 = vld [vmem:[%s3501_s20 + $0xd0] sm:$0xf] }
  0xed   : > { %v1232_v41 = vor.u32 %v1231_v15, %v1227_v16  ;;  %v1236_v17 = vrot.slane %v1234_v29, 1  ;;  %v1926_v5 = vsel %vm1910_vm3, %v3759_v37, %v4338_v9  ;;  %v2890_v15 = vld [vmem:[%s3501_s20 + $0xcc] sm:$0xe] }
  0xee   : > { %v4362_v3 = vpop.permute.xlu0 %866  ;;  %1776 = vrot.lane.b32.xlu1 %v1725_v57, %s3460_s5  ;;  %v1869_v61 = vrot.slane %v3032_v34, 1  ;;  %v1219_v57 = vrot.slane %v1217_v25, 1  ;;  %v3002_v34 = vcombine.low %v2857_v51, %v4400_v2  ;;  %v1224_v36 = vrot.slane %v1222_v22, 1  ;;  %v2889_v51 = vld [vmem:[%s3501_s20 + $0xc0] sm:$0xe] }
  0xef   : > { %v3034_v22 = vcombine.low %v2890_v15, %v4400_v2 }
  0xf0   : > { %1774 = vrot.lane.b32.xlu0 %v1713_v18, %s3460_s5  ;;  %v4375_v58 = vpop.permute.xlu1 %980  ;;  %v1871_v55 = vsel %vm805_vm0, %v1869_v61, %v1870_v42  ;;  %v2985_v18 = vcombine.low %v2825_v59, %v4367_v33  ;;  %v1220_v21 = vor.u32 %v1219_v57, %v1215_v1  ;;  %v3001_v42 = vcombine.low %v2855_v52, %v4404_v26 }
  0xf1   : > { %v1237_v61 = vsel %vm532_vm1, %v1232_v41, %v1236_v17  ;;  %v1741_v10 = vshll.u32 %v3002_v34, 16  ;;  %v1739_v31 = vshrl.u32 %v3002_v34, 16 }
  0xf2   : > { %v979_v50 = vpop.permute.xlu0 %978  ;;  %753 = vrot.lane.b32.xlu1 %v712_v39, %s3457_s26  ;;  %v4413_v39 = vld [vmem:[%s3501_s20 + $0xd4] ss:$0 sps:$4 sm:$0x11]   ;;  %v1360_v33 = vrot.slane %v2985_v18, 1  ;;  %v1225_v46 = vsel %vm532_vm1, %v1220_v21, %v1224_v36  ;;  %v1729_v23 = vshll.u32 %v3001_v42, 16  ;;  %v1727_v25 = vshrl.u32 %v3001_v42, 16 }
  0xf3   : > { %v1743_v14 = vrot.slane %v1741_v10, 1  ;;  %v3033_v18 = vcombine.low %v2889_v51, %v4404_v26  ;;  %v1875_v21 = vrot.slane %v3034_v22, 1 }
  0xf4   : > { %1902 = vrot.lane.b32.xlu0 %v1868_v19, %s3461_s6  ;;  %v4385_v48 = vpop.permute.xlu1 %1252  ;;  %v1924_v19 = vsel %vm1910_vm3, %v3738_v20, %v4315_v13  ;;  %v1365_v13 = vsel %vm805_vm0, %v1363_v4, %v1364_v45 }
  0xf5   : > { %v1744_v57 = vor.u32 %v1743_v14, %v1739_v31  ;;  %v1872_v26 = vrot.slane %v3033_v18, 1 }
  0xf6   : > { %v1251_v27 = vpop.permute.xlu0 %1250  ;;  %755 = vrot.lane.b32.xlu1 %v724_v54, %s3457_s26  ;;  %v1957_v54 = vsel %vm1943_vm4, %v1924_v19, %v4362_v3  ;;  %v1746_v3 = vshll.u32 %v4413_v39, 16 }
  0xf7   : > { %v1990_v60 = vsel %vm1976_vm5, %v1957_v54, %v979_v50 }
  0xf8   : > { %1904 = vrot.lane.b32.xlu0 %v1871_v55, %s3461_s6  ;;  %v4396_v43 = vpop.permute.xlu1 %1380  ;;  %v2023_v20 = vsel %vm2009_vm6, %v1990_v60, %v1251_v27  ;;  %v1959_v27 = vsel %vm1943_vm4, %v1926_v5, %v4353_v30 }
  0xf9   : > { %v1992_v29 = vsel %vm1976_vm5, %v1959_v27, %v4375_v58  ;;  %v1748_v58 = vrot.slane %v1746_v3, 1 }
  0xfa   : > { %v1379_v12 = vpop.permute.xlu0 %1378  ;;  %884 = vrot.lane.b32.xlu1 %v853_v53, %s3456_s23  ;;  %v1731_v53 = vrot.slane %v1729_v23, 1 }
  0xfb   : > { %v2056_v50 = vsel %vm2042_vm7, %v2023_v20, %v1379_v12  ;;  %v1749_v2 = vsel %vm532_vm1, %v1744_v57, %v1748_v58 }
  0xfc   : > { %882 = vrot.lane.b32.xlu0 %v850_v35, %s3456_s23  ;;  %v1493_v40 = vpop.permute.xlu1 %1492  ;;  %v2025_v35 = vsel %vm2009_vm6, %v1992_v29, %v4385_v48  ;;  %v1732_v0 = vor.u32 %v1731_v53, %v1727_v25 }
  0xfd   : > { %v2058_v30 = vsel %vm2042_vm7, %v2025_v35, %v4396_v43 }
  0xfe   : > { %v1491_v28 = vpop.permute.xlu0 %1490  ;;  %996 = vrot.lane.b32.xlu1 %v2954_v56, %s3454_s21  ;;  %v3443_v56 = vld [vmem:[%s3501_s20 + $0xc8] ss:$0 sps:$4 sm:$0x11]   ;;  %v2091_v12 = vsel %vm2075_vm8, %v2058_v30, %v1493_v40  ;;  %v1876_v40 = vrot.slane %v4413_v39, 1  ;;  %s208_s20 = scalar_lea.vmem %s4619_s4, %s2762_s17 }
  0xff   : > { %v2089_v63 = vsel %vm2075_vm8, %v2056_v50, %v1491_v28  ;;  %v1734_v16 = vshll.u32 %v3443_v56, 16  ;;  %v1873_v4 = vrot.slane %v3443_v56, 1 }
 0x100   : > { %994 = vrot.lane.b32.xlu0 %v2953_v32, %s3454_s21  ;;  %v1765_v44 = vpop.permute.xlu1 %1764  ;;  %v1362_v32 = vsel %vm805_vm0, %v1360_v33, %v1361_v49 }
 0x101   : > { %v1736_v48 = vrot.slane %v1734_v16, 1  ;;  %v2124_v41 = vsel %vm2108_vm9, %v2091_v12, %v1765_v44  ;;  %v1874_v33 = vsel %vm805_vm0, %v1872_v26, %v1873_v4 }
 0x102   : > { %v1763_v55 = vpop.permute.xlu0 %1762  ;;  %1268 = vrot.lane.b32.xlu1 %v1237_v61, %s3458_s29 }
 0x103   : > { %v2122_v37 = vsel %vm2108_vm9, %v2089_v63, %v1763_v55  ;;  %v1737_v28 = vsel %vm532_vm1, %v1732_v0, %v1736_v48 }
 0x104   : > { %1266 = vrot.lane.b32.xlu0 %v1225_v46, %s3458_s29  ;;  %v742_v59 = vpop.permute.xlu1 %741 }
 0x105   : > { %v1928_v46 = vsel %vm1910_vm3, %v3837_v6, %v742_v59 }
 0x106   : > { %v1891_v9 = vpop.permute.xlu0 %1890  ;;  %1396 = vrot.lane.b32.xlu1 %v1365_v13, %s3455_s22 }
 0x107   : > { %v2155_v1 = vsel %vm2141_vm10, %v2122_v37, %v1891_v9 }
 0x108   : > { %1394 = vrot.lane.b32.xlu0 %v1362_v32, %s3455_s22  ;;  %3254 = vmatprep.mubr.msk.bf16.mxu0 %vm2201_vm11, %v2155_v1  ;;  %v744_v52 = vpop.permute.xlu1 %743 }
 0x109   : > { %v1930_v20 = vsel %vm1910_vm3, %v3854_v24, %v744_v52 }
 0x10a   : > { %v1893_v17 = vpop.permute.xlu0 %1892  ;;  %1508 = vrot.lane.b32.xlu1 %v3002_v34, %s3459_s30  ;;  %v1877_v34 = vsel %vm805_vm0, %v1875_v21, %v1876_v40 }
 0x10b   : > { %v2157_v43 = vsel %vm2141_vm10, %v2124_v41, %v1893_v17 }
 0x10c   : > { %1506 = vrot.lane.b32.xlu0 %v3001_v42, %s3459_s30  ;;  %3255 = vmatmul.mubr.msk.bf16.gmra.mrb[12].mxu0 %vm2201_vm11, %v2157_v43  ;;  %v873_v36 = vpop.permute.xlu1 %872 }
 0x10d   : > { %v1963_v32 = vsel %vm1943_vm4, %v1930_v20, %v873_v36 }
 0x10e   : > { %v871_v45 = vpop.permute.xlu0 %870  ;;  %1780 = vrot.lane.b32.xlu1 %v1749_v2, %s3460_s5 }
 0x10f   : > { %v1961_v56 = vsel %vm1943_vm4, %v1928_v46, %v871_v45 }
 0x110   : > { %1778 = vrot.lane.b32.xlu0 %v1737_v28, %s3460_s5  ;;  %v985_v42 = vpop.permute.xlu1 %984 }
 0x111   : > { %v1996_v6 = vsel %vm1976_vm5, %v1963_v32, %v985_v42 }
 0x112   : > { %v983_v49 = vpop.permute.xlu0 %982  ;;  %1908 = vrot.lane.b32.xlu1 %v1877_v34, %s3461_s6 }
 0x113   : > { %v1994_v60 = vsel %vm1976_vm5, %v1961_v56, %v983_v49 }
 0x114   : > { %1906 = vrot.lane.b32.xlu0 %v1874_v33, %s3461_s6  ;;  %v1257_v39 = vpop.permute.xlu1 %1256 }
 0x115   : > { %v2029_v25 = vsel %vm2009_vm6, %v1996_v6, %v1257_v39 }
 0x116   : > { %v1255_v19 = vpop.permute.xlu0 %1254 }
 0x117   : > { %v2027_v31 = vsel %vm2009_vm6, %v1994_v60, %v1255_v19 }
 0x118   : > { %v1385_v61 = vpop.permute.xlu1 %1384 }
 0x119   : > { %v2062_v63 = vsel %vm2042_vm7, %v2029_v25, %v1385_v61 }
 0x11a   : > { %v1383_v10 = vpop.permute.xlu0 %1382 }
 0x11b   : > { %v2060_v13 = vsel %vm2042_vm7, %v2027_v31, %v1383_v10 }
 0x11c   : > { %v1497_v54 = vpop.permute.xlu1 %1496 }
 0x11d   : > { %v2095_v24 = vsel %vm2075_vm8, %v2062_v63, %v1497_v54 }
 0x11e   : > { %v1495_v44 = vpop.permute.xlu0 %1494 }
 0x11f   : > { %v2093_v3 = vsel %vm2075_vm8, %v2060_v13, %v1495_v44 }
 0x120   : > { %v1769_v23 = vpop.permute.xlu1 %1768 }
 0x121   : > { %v2128_v53 = vsel %vm2108_vm9, %v2095_v24, %v1769_v23 }
 0x122   : > { %v1767_v55 = vpop.permute.xlu0 %1766 }
 0x123   : > { %v2126_v50 = vsel %vm2108_vm9, %v2093_v3, %v1767_v55 }
 0x124   : > { %v746_v5 = vpop.permute.xlu1 %745 }
 0x125   : > { %v1932_v12 = vsel %vm1910_vm3, %v3980_v7, %v746_v5 }
 0x126   : > { %v1895_v14 = vpop.permute.xlu0 %1894 }
 0x127   : > { %v2159_v27 = vsel %vm2141_vm10, %v2126_v50, %v1895_v14 }
 0x128   : > { %3258 = vmatprep.mubr.msk.bf16.mxu1 %vm2201_vm11, %v2159_v27  ;;  %v748_v59 = vpop.permute.xlu1 %747 }
 0x129   : > { %v1934_v17 = vsel %vm1910_vm3, %v4004_v38, %v748_v59 }
 0x12a   : > { %v1897_v16 = vpop.permute.xlu0 %1896 }
 0x12b   : > { %v2161_v15 = vsel %vm2141_vm10, %v2128_v53, %v1897_v16 }
 0x12c   : > { %3259 = vmatmul.mubr.msk.bf16.vlgmr.msra.gmra.mrb[0].mxu1 %vm2201_vm11, %v2161_v15  ;;  %v877_v29 = vpop.permute.xlu1 %876 }
 0x12d   : > { %v1967_v2 = vsel %vm1943_vm4, %v1934_v17, %v877_v29 }
 0x12e   : > { %v875_v37 = vpop.permute.xlu0 %874 }
 0x12f   : > { %v1965_v52 = vsel %vm1943_vm4, %v1932_v12, %v875_v37 }
 0x130   : > { %v989_v9 = vpop.permute.xlu1 %988 }
 0x131   : > { %v2000_v7 = vsel %vm1976_vm5, %v1967_v2, %v989_v9 }
 0x132   : > { %v987_v51 = vpop.permute.xlu0 %986 }
 0x133   : > { %v1998_v48 = vsel %vm1976_vm5, %v1965_v52, %v987_v51 }
 0x134   : > { %v1261_v35 = vpop.permute.xlu1 %1260 }
 0x135   : > { %v2033_v26 = vsel %vm2009_vm6, %v2000_v7, %v1261_v35 }
 0x136   : > { %v1259_v1 = vpop.permute.xlu0 %1258 }
 0x137   : > { %v2031_v41 = vsel %vm2009_vm6, %v1998_v48, %v1259_v1  ;;  %v4534_v48 = vld [vmem:[%s4617_s2] ss:$0 sm:$0xff] }
 0x138   : > { %v1389_v30 = vpop.permute.xlu1 %1388 }
 0x139   : > { %v2066_v45 = vsel %vm2042_vm7, %v2033_v26, %v1389_v30 }
 0x13a   : > { %v1387_v57 = vpop.permute.xlu0 %1386 }
 0x13b   : > { %v2064_v43 = vsel %vm2042_vm7, %v2031_v41, %v1387_v57 }
 0x13c   : > { %v1501_v58 = vpop.permute.xlu1 %1500 }
 0x13d   : > { %v2099_v38 = vsel %vm2075_vm8, %v2066_v45, %v1501_v58 }
 0x13e   : > { %v1499_v22 = vpop.permute.xlu0 %1498 }
 0x13f   : > { %v2097_v21 = vsel %vm2075_vm8, %v2064_v43, %v1499_v22 }
 0x140   : > { %v1773_v0 = vpop.permute.xlu1 %1772 }
 0x141   : > { %v2132_v42 = vsel %vm2108_vm9, %v2099_v38, %v1773_v0 }
 0x142   : > { %v1771_v18 = vpop.permute.xlu0 %1770 }
 0x143   : > { %v2130_v36 = vsel %vm2108_vm9, %v2097_v21, %v1771_v18 }
 0x144   : > { %v750_v40 = vpop.permute.xlu1 %749 }
 0x145   : > { %v1936_v55 = vsel %vm1910_vm3, %v4128_v11, %v750_v40 }
 0x146   : > { %v1899_v28 = vpop.permute.xlu0 %1898 }
 0x147   : > { %v2163_v4 = vsel %vm2141_vm10, %v2130_v36, %v1899_v28 }
 0x148   : > { %3262 = vmatprep.mubr.msk.bf16.mxu1 %vm2201_vm11, %v2163_v4  ;;  %v752_v34 = vpop.permute.xlu1 %751 }
 0x149   : > { %v1938_v5 = vsel %vm1910_vm3, %v4157_v8, %v752_v34 }
 0x14a   : > { %v1901_v33 = vpop.permute.xlu0 %1900 }
 0x14b   : > { %v2165_v49 = vsel %vm2141_vm10, %v2132_v42, %v1901_v33 }
 0x14c   : > { %3263 = vmatmul.mubr.msk.bf16.gmra.mrb[4].mxu1 %vm2201_vm11, %v2165_v49  ;;  %v881_v39 = vpop.permute.xlu1 %880 }
 0x14d   : > { %v1971_v50 = vsel %vm1943_vm4, %v1938_v5, %v881_v39 }
 0x14e   : > { %v879_v19 = vpop.permute.xlu0 %878 }
 0x14f   : > { %v1969_v31 = vsel %vm1943_vm4, %v1936_v55, %v879_v19 }
 0x150   : > { %v993_v61 = vpop.permute.xlu1 %992 }
 0x151   : > { %v2004_v11 = vsel %vm1976_vm5, %v1971_v50, %v993_v61 }
 0x152   : > { %v991_v10 = vpop.permute.xlu0 %990 }
 0x153   : > { %v2002_v13 = vsel %vm1976_vm5, %v1969_v31, %v991_v10 }
 0x154   : > { %v1265_v54 = vpop.permute.xlu1 %1264 }
 0x155   : > { %v2037_v24 = vsel %vm2009_vm6, %v2004_v11, %v1265_v54 }
 0x156   : > { %v1263_v44 = vpop.permute.xlu0 %1262 }
 0x157   : > { %v2035_v3 = vsel %vm2009_vm6, %v2002_v13, %v1263_v44 }
 0x158   : > { %v1393_v46 = vpop.permute.xlu1 %1392 }
 0x159   : > { %v2070_v53 = vsel %vm2042_vm7, %v2037_v24, %v1393_v46 }
 0x15a   : > { %v1391_v56 = vpop.permute.xlu0 %1390 }
 0x15b   : > { %v2068_v6 = vsel %vm2042_vm7, %v2035_v3, %v1391_v56 }
 0x15c   : > { %v1505_v23 = vpop.permute.xlu1 %1504 }
 0x15d   : > { %v2103_v8 = vsel %vm2075_vm8, %v2070_v53, %v1505_v23 }
 0x15e   : > { %v1503_v60 = vpop.permute.xlu0 %1502 }
 0x15f   : > { %v2101_v14 = vsel %vm2075_vm8, %v2068_v6, %v1503_v60 }
 0x160   : > { %v1777_v20 = vpop.permute.xlu1 %1776 }
 0x161   : > { %v2136_v15 = vsel %vm2108_vm9, %v2103_v8, %v1777_v20 }
 0x162   : > { %v1775_v32 = vpop.permute.xlu0 %1774 }
 0x163   : > { %v2134_v27 = vsel %vm2108_vm9, %v2101_v14, %v1775_v32 }
 0x164   : > { %v754_v25 = vpop.permute.xlu1 %753 }
 0x165   : > { %v1940_v18 = vsel %vm1910_vm3, %v4281_v62, %v754_v25 }
 0x166   : > { %v1903_v63 = vpop.permute.xlu0 %1902 }
 0x167   : > { %v2167_v59 = vsel %vm2141_vm10, %v2134_v27, %v1903_v63 }
 0x168   : > { %3266 = vmatprep.mubr.msk.bf16.mxu1 %vm2201_vm11, %v2167_v59  ;;  %v756_v16 = vpop.permute.xlu1 %755 }
 0x169   : > { %v1942_v52 = vsel %vm1910_vm3, %v4310_v47, %v756_v16 }
 0x16a   : > { %v1905_v29 = vpop.permute.xlu0 %1904 }
 0x16b   : > { %v2169_v37 = vsel %vm2141_vm10, %v2136_v15, %v1905_v29 }
 0x16c   : > { %3267 = vmatmul.mubr.msk.bf16.gmra.mrb[8].mxu1 %vm2201_vm11, %v2169_v37  ;;  %v885_v9 = vpop.permute.xlu1 %884 }
 0x16d   : > { %v1975_v41 = vsel %vm1943_vm4, %v1942_v52, %v885_v9 }
 0x16e   : > { %v883_v51 = vpop.permute.xlu0 %882 }
 0x16f   : > { %v1973_v43 = vsel %vm1943_vm4, %v1940_v18, %v883_v51 }
 0x170   : > { %v997_v35 = vpop.permute.xlu1 %996 }
 0x171   : > { %v2008_v2 = vsel %vm1976_vm5, %v1975_v41, %v997_v35 }
 0x172   : > { %v995_v1 = vpop.permute.xlu0 %994 }
 0x173   : > { %v2006_v47 = vsel %vm1976_vm5, %v1973_v43, %v995_v1 }
 0x174   : > { %v1269_v30 = vpop.permute.xlu1 %1268 }
 0x175   : > { %v2041_v40 = vsel %vm2009_vm6, %v2008_v2, %v1269_v30 }
 0x176   : > { %v1267_v57 = vpop.permute.xlu0 %1266 }
 0x177   : > { %v2039_v26 = vsel %vm2009_vm6, %v2006_v47, %v1267_v57 }
 0x178   : > { %v1397_v58 = vpop.permute.xlu1 %1396 }
 0x179   : > { %v2074_v62 = vsel %vm2042_vm7, %v2041_v40, %v1397_v58 }
 0x17a   : > { %v1395_v22 = vpop.permute.xlu0 %1394 }
 0x17b   : > { %v2072_v42 = vsel %vm2042_vm7, %v2039_v26, %v1395_v22 }
 0x17c   : > { %v1509_v12 = vpop.permute.xlu1 %1508 }
 0x17d   : > { %v2107_v33 = vsel %vm2075_vm8, %v2074_v62, %v1509_v12 }
 0x17e   : > { %v1507_v0 = vpop.permute.xlu0 %1506 }
 0x17f   : > { %v3244_v17 = vpop.f32.mrb[0].mxu0  ;;  %v2105_v39 = vsel %vm2075_vm8, %v2072_v42, %v1507_v0 }
 0x180   : > { %v2272_v21 = vpop.f32.mrb[1].mxu0  ;;  %v1781_v28 = vpop.permute.xlu1 %1780  ;;  %v2281_v4 = vadd.f32 %v3244_v17, %v4534_v48 }
 0x181   : > { %v2273_v7 = vadd.f32 %v4534_v48, %v2272_v21  ;;  %v3245_v36 = vpop.f32.mrb[2].mxu0  ;;  %v2140_v61 = vsel %vm2108_vm9, %v2107_v33, %v1781_v28 }
 0x182   : > { %v2284_v45 = vadd.f32 %v3245_v36, %v4534_v48  ;;  %v2275_v38 = vpop.f32.mrb[3].mxu0  ;;  %v1779_v34 = vpop.permute.xlu0 %1778  ;;  %v2598_v31 = vmul.f32 %v2281_v4, %v2281_v4 }
 0x183   : > { %v2276_v49 = vadd.f32 %v4534_v48, %v2275_v38  ;;  %v2596_v10 = vmul.f32 %v2273_v7, %v2273_v7  ;;  %v2138_v23 = vsel %vm2108_vm9, %v2105_v39, %v1779_v34 }
 0x184   : > { %v3130_v19 = vpack.c.bf16 %v2284_v45, %v2281_v4  ;;  %v1909_v56 = vpop.permute.xlu1 %1908  ;;  %v2599_v3 = vmul.f32 %v2284_v45, %v2284_v45 }
 0x185   : > { %v3125_v54 = vpack.c.bf16 %v2276_v49, %v2273_v7  ;;  %v2559_v44 = vadd.f32 %v2276_v49, %v2273_v7  ;;  %v2597_v46 = vmul.f32 %v2276_v49, %v2276_v49  ;;  %v2173_v60 = vsel %vm2141_vm10, %v2140_v61, %v1909_v56 }
 0x186   : > { %3202 = vst [vmem:[%s4554_s14 + $0x8] sm:$0xff] %v3130_v19   ;;  %v1907_v55 = vpop.permute.xlu0 %1906 }
 0x187   : > { %3126 = vst [vmem:[%s4554_s14] sm:$0xff] %v3125_v54   ;;  %v2560_v20 = vadd.f32 %v2559_v44, %v2281_v4  ;;  %v2628_v13 = vadd.f32 %v2597_v46, %v2596_v10  ;;  %v2171_v32 = vsel %vm2141_vm10, %v2138_v23, %v1907_v55 }
 0x188   : > { %3270 = vmatprep.mubr.msk.bf16.mxu1 %vm2201_vm11, %v2171_v32 }
 0x189   : > { %v2629_v5 = vadd.f32 %v2628_v13, %v2598_v31  ;;  %3271 = vmatmul.mubr.msk.bf16.gmra.mrb[12].mxu1 %vm2201_vm11, %v2173_v60  ;;  %v2561_v6 = vadd.f32 %v2560_v20, %v2284_v45 }
 0x18b   : > { %v2630_v50 = vadd.f32 %v2629_v5, %v2599_v3 }
 0x19f   : > { %v3248_v14 = vpop.f32.mrb[4].mxu0 }
 0x1a0   : > { %v2288_v25 = vpop.f32.mrb[5].mxu0  ;;  %v2297_v63 = vadd.f32 %v3248_v14, %v4534_v48 }
 0x1a1   : > { %v2289_v11 = vadd.f32 %v4534_v48, %v2288_v25  ;;  %v3249_v27 = vpop.f32.mrb[6].mxu0 }
 0x1a2   : > { %v2300_v24 = vadd.f32 %v3249_v27, %v4534_v48  ;;  %v2291_v59 = vpop.f32.mrb[7].mxu0  ;;  %v2602_v35 = vmul.f32 %v2297_v63, %v2297_v63 }
 0x1a3   : > { %v2562_v53 = vadd.f32 %v2561_v6, %v2289_v11  ;;  %v2600_v8 = vmul.f32 %v2289_v11, %v2289_v11  ;;  %v2292_v16 = vadd.f32 %v4534_v48, %v2291_v59 }
 0x1a4   : > { %v3140_v15 = vpack.c.bf16 %v2300_v24, %v2297_v63  ;;  %v2603_v57 = vmul.f32 %v2300_v24, %v2300_v24 }
 0x1a5   : > { %v2631_v29 = vadd.f32 %v2630_v50, %v2600_v8  ;;  %v3135_v37 = vpack.c.bf16 %v2292_v16, %v2289_v11  ;;  %v2563_v9 = vadd.f32 %v2562_v53, %v2292_v16  ;;  %v2601_v51 = vmul.f32 %v2292_v16, %v2292_v16 }
 0x1a6   : > { %3204 = vst [vmem:[%s4554_s14 + $0x18] sm:$0xff] %v3140_v15  }
 0x1a7   : > { %3203 = vst [vmem:[%s4554_s14 + $0x10] sm:$0xff] %v3135_v37   ;;  %v2564_v1 = vadd.f32 %v2563_v9, %v2297_v63  ;;  %v2632_v30 = vadd.f32 %v2631_v29, %v2601_v51 }
 0x1a9   : > { %v2633_v58 = vadd.f32 %v2632_v30, %v2602_v35  ;;  %v2565_v22 = vadd.f32 %v2564_v1, %v2300_v24 }
 0x1ab   : > { %v2634_v12 = vadd.f32 %v2633_v58, %v2603_v57 }
 0x1bf   : > { %v3252_v52 = vpop.f32.mrb[8].mxu0 }
 0x1c0   : > { %v2304_v0 = vpop.f32.mrb[9].mxu0  ;;  %v2313_v17 = vadd.f32 %v3252_v52, %v4534_v48 }
 0x1c1   : > { %v2305_v18 = vadd.f32 %v4534_v48, %v2304_v0  ;;  %v3253_v41 = vpop.f32.mrb[10].mxu0 }
 0x1c2   : > { %v2316_v43 = vadd.f32 %v3253_v41, %v4534_v48  ;;  %v2307_v2 = vpop.f32.mrb[11].mxu0  ;;  %v2606_v4 = vmul.f32 %v2313_v17, %v2313_v17 }
 0x1c3   : > { %v2566_v21 = vadd.f32 %v2565_v22, %v2305_v18  ;;  %v2604_v47 = vmul.f32 %v2305_v18, %v2305_v18  ;;  %v2308_v40 = vadd.f32 %v4534_v48, %v2307_v2 }
 0x1c4   : > { %v3150_v7 = vpack.c.bf16 %v2316_v43, %v2313_v17  ;;  %v2607_v34 = vmul.f32 %v2316_v43, %v2316_v43 }
 0x1c5   : > { %v2635_v36 = vadd.f32 %v2634_v12, %v2604_v47  ;;  %v3145_v28 = vpack.c.bf16 %v2308_v40, %v2305_v18  ;;  %v2567_v26 = vadd.f32 %v2566_v21, %v2308_v40  ;;  %v2605_v62 = vmul.f32 %v2308_v40, %v2308_v40 }
 0x1c6   : > { %3206 = vst [vmem:[%s4554_s14 + $0x28] sm:$0xff] %v3150_v7  }
 0x1c7   : > { %3205 = vst [vmem:[%s4554_s14 + $0x20] sm:$0xff] %v3145_v28   ;;  %v2568_v45 = vadd.f32 %v2567_v26, %v2313_v17  ;;  %v2636_v38 = vadd.f32 %v2635_v36, %v2605_v62 }
 0x1c9   : > { %v2637_v42 = vadd.f32 %v2636_v38, %v2606_v4  ;;  %v2569_v33 = vadd.f32 %v2568_v45, %v2316_v43 }
 0x1cb   : > { %v2638_v49 = vadd.f32 %v2637_v42, %v2607_v34 }
 0x1df   : > { %v3256_v39 = vpop.f32.mrb[12].mxu0 }
 0x1e0   : > { %v2320_v19 = vpop.f32.mrb[13].mxu0  ;;  %v2329_v54 = vadd.f32 %v3256_v39, %v4534_v48 }
 0x1e1   : > { %v2321_v61 = vadd.f32 %v4534_v48, %v2320_v19  ;;  %v3257_v10 = vpop.f32.mrb[14].mxu0 }
 0x1e2   : > { %v2332_v44 = vadd.f32 %v3257_v10, %v4534_v48  ;;  %v2323_v46 = vpop.f32.mrb[15].mxu0  ;;  %v2610_v3 = vmul.f32 %v2329_v54, %v2329_v54 }
 0x1e3   : > { %v2570_v56 = vadd.f32 %v2569_v33, %v2321_v61  ;;  %v2608_v23 = vmul.f32 %v2321_v61, %v2321_v61  ;;  %v2324_v60 = vadd.f32 %v4534_v48, %v2323_v46 }
 0x1e4   : > { %v3160_v55 = vpack.c.bf16 %v2332_v44, %v2329_v54  ;;  %v2611_v50 = vmul.f32 %v2332_v44, %v2332_v44 }
 0x1e5   : > { %v2639_v31 = vadd.f32 %v2638_v49, %v2608_v23  ;;  %v3155_v20 = vpack.c.bf16 %v2324_v60, %v2321_v61  ;;  %v2571_v13 = vadd.f32 %v2570_v56, %v2324_v60  ;;  %v2609_v32 = vmul.f32 %v2324_v60, %v2324_v60 }
 0x1e6   : > { %3208 = vst [vmem:[%s4554_s14 + $0x38] sm:$0xff] %v3160_v55  }
 0x1e7   : > { %3207 = vst [vmem:[%s4554_s14 + $0x30] sm:$0xff] %v3155_v20   ;;  %v2572_v5 = vadd.f32 %v2571_v13, %v2329_v54  ;;  %v2640_v6 = vadd.f32 %v2639_v31, %v2609_v32 }
 0x1e9   : > { %v2641_v14 = vadd.f32 %v2640_v6, %v2610_v3  ;;  %v2573_v25 = vadd.f32 %v2572_v5, %v2332_v44 }
 0x1eb   : > { %v2642_v11 = vadd.f32 %v2641_v14, %v2611_v50 }
 0x1ff   : > { %v3260_v27 = vpop.f32.mrb[0].mxu1 }
 0x200   : > { %v2336_v63 = vpop.f32.mrb[1].mxu1  ;;  %v2345_v53 = vadd.f32 %v3260_v27, %v4534_v48 }
 0x201   : > { %v2337_v24 = vadd.f32 %v4534_v48, %v2336_v63  ;;  %v3261_v59 = vpop.f32.mrb[2].mxu1 }
 0x202   : > { %v2348_v8 = vadd.f32 %v3261_v59, %v4534_v48  ;;  %v2339_v16 = vpop.f32.mrb[3].mxu1  ;;  %v2614_v57 = vmul.f32 %v2345_v53, %v2345_v53 }
 0x203   : > { %v2574_v15 = vadd.f32 %v2573_v25, %v2337_v24  ;;  %v2612_v29 = vmul.f32 %v2337_v24, %v2337_v24  ;;  %v2340_v37 = vadd.f32 %v4534_v48, %v2339_v16 }
 0x204   : > { %v3170_v9 = vpack.c.bf16 %v2348_v8, %v2345_v53  ;;  %v2615_v12 = vmul.f32 %v2348_v8, %v2348_v8 }
 0x205   : > { %v2643_v51 = vadd.f32 %v2642_v11, %v2612_v29  ;;  %v3165_v35 = vpack.c.bf16 %v2340_v37, %v2337_v24  ;;  %v2575_v1 = vadd.f32 %v2574_v15, %v2340_v37  ;;  %v2613_v30 = vmul.f32 %v2340_v37, %v2340_v37 }
 0x206   : > { %3210 = vst [vmem:[%s4554_s14 + $0x48] sm:$0xff] %v3170_v9  }
 0x207   : > { %3209 = vst [vmem:[%s4554_s14 + $0x40] sm:$0xff] %v3165_v35   ;;  %v2576_v58 = vadd.f32 %v2575_v1, %v2345_v53  ;;  %v2644_v22 = vadd.f32 %v2643_v51, %v2613_v30 }
 0x209   : > { %v2645_v52 = vadd.f32 %v2644_v22, %v2614_v57  ;;  %v2577_v0 = vadd.f32 %v2576_v58, %v2348_v8 }
 0x20b   : > { %v2646_v18 = vadd.f32 %v2645_v52, %v2615_v12 }
 0x21f   : > { %v3264_v41 = vpop.f32.mrb[4].mxu1 }
 0x220   : > { %v2352_v17 = vpop.f32.mrb[5].mxu1  ;;  %v2361_v21 = vadd.f32 %v3264_v41, %v4534_v48 }
 0x221   : > { %v2353_v43 = vadd.f32 %v4534_v48, %v2352_v17  ;;  %v3265_v2 = vpop.f32.mrb[6].mxu1 }
 0x222   : > { %v2364_v47 = vadd.f32 %v3265_v2, %v4534_v48  ;;  %v2355_v40 = vpop.f32.mrb[7].mxu1  ;;  %v2618_v34 = vmul.f32 %v2361_v21, %v2361_v21 }
 0x223   : > { %v2578_v7 = vadd.f32 %v2577_v0, %v2353_v43  ;;  %v2616_v36 = vmul.f32 %v2353_v43, %v2353_v43  ;;  %v2356_v28 = vadd.f32 %v4534_v48, %v2355_v40 }
 0x224   : > { %v3180_v26 = vpack.c.bf16 %v2364_v47, %v2361_v21  ;;  %v2619_v49 = vmul.f32 %v2364_v47, %v2364_v47 }
 0x225   : > { %v2647_v62 = vadd.f32 %v2646_v18, %v2616_v36  ;;  %v3175_v4 = vpack.c.bf16 %v2356_v28, %v2353_v43  ;;  %v2579_v45 = vadd.f32 %v2578_v7, %v2356_v28  ;;  %v2617_v38 = vmul.f32 %v2356_v28, %v2356_v28 }
 0x226   : > { %3212 = vst [vmem:[%s4554_s14 + $0x58] sm:$0xff] %v3180_v26  }
 0x227   : > { %3211 = vst [vmem:[%s4554_s14 + $0x50] sm:$0xff] %v3175_v4   ;;  %v2580_v42 = vadd.f32 %v2579_v45, %v2361_v21  ;;  %v2648_v33 = vadd.f32 %v2647_v62, %v2617_v38 }
 0x229   : > { %v2649_v39 = vadd.f32 %v2648_v33, %v2618_v34  ;;  %v2581_v19 = vadd.f32 %v2580_v42, %v2364_v47 }
 0x22b   : > { %v2650_v61 = vadd.f32 %v2649_v39, %v2619_v49 }
 0x23f   : > { %v3268_v10 = vpop.f32.mrb[8].mxu1 }
 0x240   : > { %v2368_v54 = vpop.f32.mrb[9].mxu1  ;;  %v2377_v56 = vadd.f32 %v3268_v10, %v4534_v48 }
 0x241   : > { %v2369_v44 = vadd.f32 %v4534_v48, %v2368_v54  ;;  %v3269_v46 = vpop.f32.mrb[10].mxu1 }
 0x242   : > { %v2380_v23 = vadd.f32 %v3269_v46, %v4534_v48  ;;  %v2371_v60 = vpop.f32.mrb[11].mxu1  ;;  %v2622_v50 = vmul.f32 %v2377_v56, %v2377_v56 }
 0x243   : > { %v2582_v55 = vadd.f32 %v2581_v19, %v2369_v44  ;;  %v2620_v31 = vmul.f32 %v2369_v44, %v2369_v44  ;;  %v2372_v20 = vadd.f32 %v4534_v48, %v2371_v60 }
 0x244   : > { %v3190_v13 = vpack.c.bf16 %v2380_v23, %v2377_v56  ;;  %v2623_v11 = vmul.f32 %v2380_v23, %v2380_v23 }
 0x245   : > { %v2651_v32 = vadd.f32 %v2650_v61, %v2620_v31  ;;  %v3185_v3 = vpack.c.bf16 %v2372_v20, %v2369_v44  ;;  %v2583_v5 = vadd.f32 %v2582_v55, %v2372_v20  ;;  %v2621_v6 = vmul.f32 %v2372_v20, %v2372_v20 }
 0x246   : > { %3214 = vst [vmem:[%s4554_s14 + $0x68] sm:$0xff] %v3190_v13  }
 0x247   : > { %3213 = vst [vmem:[%s4554_s14 + $0x60] sm:$0xff] %v3185_v3   ;;  %v2584_v14 = vadd.f32 %v2583_v5, %v2377_v56  ;;  %v2652_v25 = vadd.f32 %v2651_v32, %v2621_v6 }
 0x249   : > { %v2653_v27 = vadd.f32 %v2652_v25, %v2622_v50  ;;  %v2585_v63 = vadd.f32 %v2584_v14, %v2380_v23 }
 0x24b   : > { %v2654_v24 = vadd.f32 %v2653_v27, %v2623_v11 }
 0x25c   : > { %v3272_v59 = vpop.f32.mrb[12].mxu1 }
 0x25d   : > { %v2384_v53 = vpop.f32.mrb[13].mxu1  ;;  %v2393_v15 = vadd.f32 %v3272_v59, %v4534_v48 }
 0x25e   : > { %v2385_v8 = vadd.f32 %v4534_v48, %v2384_v53  ;;  %v3273_v16 = vpop.f32.mrb[14].mxu1 }
 0x25f   : > { %v2396_v29 = vadd.f32 %v3273_v16, %v4534_v48  ;;  %v2387_v37 = vpop.f32.mrb[15].mxu1  ;;  %v2626_v12 = vmul.f32 %v2393_v15, %v2393_v15 }
 0x260   : > { %v2586_v9 = vadd.f32 %v2585_v63, %v2385_v8  ;;  %v2624_v51 = vmul.f32 %v2385_v8, %v2385_v8  ;;  %v2388_v35 = vadd.f32 %v4534_v48, %v2387_v37 }
 0x261   : > { %v3200_v1 = vpack.c.bf16 %v2396_v29, %v2393_v15  ;;  %v2627_v18 = vmul.f32 %v2396_v29, %v2396_v29 }
 0x262   : > { %v2655_v30 = vadd.f32 %v2654_v24, %v2624_v51  ;;  %v3195_v57 = vpack.c.bf16 %v2388_v35, %v2385_v8  ;;  %v2587_v58 = vadd.f32 %v2586_v9, %v2388_v35  ;;  %v2625_v22 = vmul.f32 %v2388_v35, %v2388_v35 }
 0x263   : > { %3216 = vst [vmem:[%s4554_s14 + $0x78] sm:$0xff] %v3200_v1  }
 0x264   : > { %3215 = vst [vmem:[%s4554_s14 + $0x70] sm:$0xff] %v3195_v57   ;;  %v2588_v52 = vadd.f32 %v2587_v58, %v2393_v15  ;;  %v2656_v0 = vadd.f32 %v2655_v30, %v2625_v22 }
 0x266   : > { %v2589_v41 = vadd.f32 %v2588_v52, %v2396_v29  ;;  %v2657_v17 = vadd.f32 %v2656_v0, %v2626_v12 }
 0x268   : > { %v2590_v43 = vrot.slane %v2589_v41, 4  ;;  %v2658_v2 = vadd.f32 %v2657_v17, %v2627_v18 }
 0x26a   : > { %v2591_v21 = vadd.f32 %v2590_v43, %v2589_v41  ;;  %v2659_v47 = vrot.slane %v2658_v2, 4 }
 0x26c   : > { %v2592_v40 = vrot.slane %v2591_v21, 2  ;;  %v2660_v48 = vadd.f32 %v2659_v47, %v2658_v2 }
 0x26e   : > { %v2593_v7 = vadd.f32 %v2592_v40, %v2591_v21  ;;  %v2661_v36 = vrot.slane %v2660_v48, 2 }
 0x270   : > { %v2594_v28 = vrot.slane %v2593_v7, 1  ;;  %v2662_v26 = vadd.f32 %v2661_v36, %v2660_v48 }
 0x272   : > { %v2663_v62 = vrot.slane %v2662_v26, 1  ;;  %v2595_v4 = vadd.f32 %v2594_v28, %v2593_v7 }
 0x274   : > { %v2664_v45 = vadd.f32 %v2663_v62, %v2662_v26 }
 0x276   : > { %v2666_v38 = vsel %vm2665_vm12, %v2595_v4, %v2664_v45 }
 0x277   : > { %2667 = vst [vmem:[%s208_s20] sm:$0x3] %v2666_v38 }
 0x278 PF: > { %s15_s15 = sadd.s32 1, %s3452_s15  }
 0x279   : > { %p12_p4 = scmp.ge.s32.totalorder %s15_s15, 4  }
 0x27b   :  { %14 = sbr.rel (!%p12_p4) target bundleno = 1 (0x1), region = 76 }

// kernel: double_conv.3
= control target key start
LH: loop header
LB: loop body
LE: loop exit
PB: predicated region body
PF: predicated region fallthrough
CT: control target
= control target key end

     0   :  { %s4877_s21 = smov 0   ;;  %s6007_s0 = inlined_call_operand.vmem [shape: bf16[2,16,16,128], index: 0, kind: input, shape index: {}]   ;;  %s6008_s1 = inlined_call_operand.vmem [shape: f32[1,128], index: 1, kind: input, shape index: {}]   ;;  %s6009_s2 = inlined_call_operand.vmem [shape: f32[1,128], index: 2, kind: input, shape index: {}]   ;;  %s6010_s3 = inlined_call_operand.vmem [shape: bf16[3,384,128], index: 3, kind: input, shape index: {}]   ;;  %s6011_s4 = inlined_call_operand.vmem [shape: f32[1,128], index: 4, kind: input, shape index: {}]   ;;  %s6012_s5 = inlined_call_operand.vmem [shape: bf16[2,16,16,128], index: 5, kind: output, shape index: {0}]   ;;  %s6013_s6 = inlined_call_operand.vmem [shape: f32[2,2,128], index: 6, kind: output, shape index: {1}]  }
   0x1 LB: > { %s3431_s22 = sadd.s32 4294967295, %s4839_s21   ;;  %p3435_p0 = scmp.ge.s32.totalorder %s4839_s21, 1  ;;  %s4839_s21 = sphi %s4877_s21, %s17_s21  }
   0x2   : > { %p215_p1 = scmp.lt.s32.totalorder %s4839_s21, 3 }
   0x4   : > { %p216_p2 = pnand %p3435_p0, %p215_p1 }
   0x6   : > { %219 = sbr.rel (%p216_p2) target bundleno = 616 (0x268), region = 40 }
   0xd   : > { %v4888_v0 = vld [vmem:[%s6010_s3 + $0x140] sm:$0xff]   ;;  %v4901_v3 = vld [vmem:[%s6010_s3 + $0x148] sm:$0xff]   ;;  %v4913_v6 = vld [vmem:[%s6010_s3 + $0x150] sm:$0xff]   ;;  %v4841_v7 = vmov 0   ;;  %p249_p3 = scmp.lt.s32.totalorder %s3431_s22, 1  ;;  %vm598_vm0 = vcmask 1040384  }
   0xe   : > { %v4694_v1 = vld [vmem:[%s6010_s3 + $0x100] sm:$0xff]   ;;  %4508 = vmatprep.subr.bf16.mxu1 %v4888_v0  ;;  %v4697_v4 = vld [vmem:[%s6010_s3 + $0x108] sm:$0xff]   ;;  %858 = vst [vmem:[#allocation2] sm:$0xf] %v4841_v7  ;;  %859 = vst [vmem:[#allocation2 + $0x4] sm:$0xf] %v4841_v7 }
   0xf   : > { %v4695_v2 = vld [vmem:[%s6010_s3 + $0xc0] sm:$0xff]   ;;  %4516 = vmatpush3.bf16.msra.mxu1 %v4888_v0  ;;  %3956 = vmatprep.subr.bf16.mxu0 %v4694_v1  ;;  %v4698_v5 = vld [vmem:[%s6010_s3 + $0xc8] sm:$0xff]   ;;  %860 = vst [vmem:[#allocation2 + $0x8] sm:$0x1] %v4841_v7  ;;  %862 = vst [vmem:[#allocation2 + $0xcc] sm:$0xf] %v4841_v7 }
  0x10   : > { %3957 = vmatpush3.bf16.msra.mxu0 %v4695_v2  ;;  %4509 = vmatprep.subr.bf16.mxu1 %v4901_v3  ;;  %863 = vst [vmem:[#allocation2 + $0xd0] sm:$0xf] %v4841_v7  ;;  %864 = vst [vmem:[#allocation2 + $0xd4] sm:$0x1] %v4841_v7  ;;  %v4700_v8 = vld [vmem:[%s6010_s3 + $0x110] sm:$0xff]   ;;  %v4926_v10 = vld [vmem:[%s6010_s3 + $0x158] sm:$0xff]  }
  0x11   : > { %3958 = vmatprep.subr.bf16.mxu0 %v4697_v4  ;;  %v4701_v9 = vld [vmem:[%s6010_s3 + $0xd0] sm:$0xff]   ;;  %v4703_v11 = vld [vmem:[%s6010_s3 + $0x118] sm:$0xff]   ;;  %v4941_v13 = vld [vmem:[%s6010_s3 + $0x160] sm:$0xff]   ;;  %s6028_s22 = smov (!%p249_p3, %s3431_s22), 1  ;;  %vm599_vm1 = vsmask.f32 256 }
  0x12   : > { %v4704_v12 = vld [vmem:[%s6010_s3 + $0xd8] sm:$0xff]   ;;  %v4706_v14 = vld [vmem:[%s6010_s3 + $0x120] sm:$0xff]   ;;  %v4958_v16 = vld [vmem:[%s6010_s3 + $0x168] sm:$0xff]   ;;  %s3748_s11 = sshll.u32 %s6028_s22, 7  ;;  %vm1388_vm3 = vcmask 1046528  }
  0x13   : > { %4517 = vmatpush3.bf16.msra.mxu1 %v4901_v3  ;;  %v4707_v15 = vld [vmem:[%s6010_s3 + $0xe0] sm:$0xff]   ;;  %v4709_v17 = vld [vmem:[%s6010_s3 + $0x128] sm:$0xff]   ;;  %v4972_v19 = vld [vmem:[%s6010_s3 + $0x170] sm:$0xff]   ;;  %s4979_s18 = scalar_lea.vmem %s6007_s0, %s3748_s11  ;;  %vm1099_vm4 = vsmask.f32 7424  ;;  %s5913_s14 = scalar_lea.vmem %s6012_s5, %s3748_s11 }
  0x14   : > { %3959 = vmatpush3.bf16.msra.mxu0 %v4698_v5  ;;  %4510 = vmatprep.subr.bf16.mxu1 %v4913_v6  ;;  %v4710_v18 = vld [vmem:[%s6010_s3 + $0xe8] sm:$0xff]   ;;  %v4712_v20 = vld [vmem:[%s6010_s3 + $0x130] sm:$0xff]   ;;  %v3933_v22 = vld [vmem:[%s4979_s18 + $0x40] sm:$0xff]   ;;  %s3440_s11 = sshll.u32 %s6028_s22, 1 }
  0x15   : > { %3960 = vmatprep.subr.bf16.mxu0 %v4700_v8  ;;  %v4713_v21 = vld [vmem:[%s6010_s3 + $0xf0] sm:$0xff]   ;;  %v4992_v23 = vld [vmem:[%s6008_s1] ss:$0 sm:$0xff]  ;;  %v4998_v24 = vld [vmem:[%s6010_s3 + $0x178] sm:$0xff]   ;;  %v3816_v25 = vunpack.c.l.bf16 %v3933_v22  ;;  %v3817_v26 = vunpack.c.h.bf16 %v3933_v22  ;;  %s262_s17 = scalar_lea.vmem %s6013_s6, %s3440_s11 }
  0x16   : > { %v4715_v27 = vld [vmem:[%s6010_s3 + $0x138] sm:$0xff]   ;;  %v5006_v28 = vld [vmem:[%s6009_s2] ss:$0 sm:$0xff]  ;;  %v3934_v29 = vld [vmem:[%s4979_s18 + $0x48] sm:$0xff]  }
  0x17   : > { %4518 = vmatpush3.bf16.msra.mxu1 %v4913_v6  ;;  %v351_v30 = vmul.f32 %v3816_v25, %v4992_v23  ;;  %v352_v31 = vmul.f32 %v3817_v26, %v4992_v23  ;;  %v4719_v32 = vld [vmem:[%s6010_s3 + $0xf8] sm:$0xff]   ;;  %v3820_v33 = vunpack.c.l.bf16 %v3934_v29  ;;  %v3821_v34 = vunpack.c.h.bf16 %v3934_v29  ;;  %v4723_v35 = vld [vmem:[%s6010_s3 + $0x40] sm:$0xff]   ;;  %v3935_v46 = vld [vmem:[%s4979_s18 + $0x50] sm:$0xff]  }
  0x18   : > { %3961 = vmatpush3.bf16.msra.mxu0 %v4701_v9  ;;  %4511 = vmatprep.subr.bf16.mxu1 %v4926_v10  ;;  %v3783_v39 = vld [vmem:[%s4979_s18] sm:$0xff]   ;;  %v3936_v47 = vld [vmem:[%s4979_s18 + $0x58] sm:$0xff]   ;;  %v3824_v51 = vunpack.c.l.bf16 %v3935_v46  ;;  %v3825_v54 = vunpack.c.h.bf16 %v3935_v46  ;;  %vm5038_vm2 = vmand %vm598_vm0, %vm599_vm1 }
  0x19   : > { %3962 = vmatprep.subr.bf16.mxu0 %v4703_v11  ;;  %v390_v36 = vadd.f32 %v5006_v28, %v351_v30  ;;  %v391_v37 = vadd.f32 %v5006_v28, %v352_v31  ;;  %v353_v38 = vmul.f32 %v3820_v33, %v4992_v23  ;;  %v354_v40 = vmul.f32 %v3821_v34, %v4992_v23  ;;  %v3926_v31 = vld [vmem:[%s4979_s18 + $0x8] sm:$0xff]   ;;  %v4779_v1 = vld [vmem:[%s6010_s3 + $0xa0] sm:$0xff]  }
  0x1a   : > { %v3784_v41 = vunpack.c.l.bf16 %v3783_v39  ;;  %v3785_v42 = vunpack.c.h.bf16 %v3783_v39  ;;  %v3828_v55 = vunpack.c.l.bf16 %v3936_v47  ;;  %v355_v59 = vmul.f32 %v3824_v51, %v4992_v23 }
  0x1b   : > { %4519 = vmatpush3.bf16.msra.mxu1 %v4926_v10  ;;  %v422_v43 = vmax.f32 %v390_v36, 0.0  ;;  %v423_v44 = vmax.f32 %v391_v37, 0.0  ;;  %v392_v45 = vadd.f32 %v5006_v28, %v353_v38  ;;  %v393_v48 = vadd.f32 %v5006_v28, %v354_v40 }
  0x1c   : > { %3963 = vmatpush3.bf16.msra.mxu0 %v4704_v12  ;;  %4512 = vmatprep.subr.bf16.mxu1 %v4941_v13  ;;  %v335_v49 = vmul.f32 %v3784_v41, %v4992_v23  ;;  %v336_v50 = vmul.f32 %v3785_v42, %v4992_v23  ;;  %v356_v62 = vmul.f32 %v3825_v54, %v4992_v23  ;;  %v3829_v63 = vunpack.c.h.bf16 %v3936_v47 }
  0x1d   : > { %3964 = vmatprep.subr.bf16.mxu0 %v4706_v14  ;;  %v446_v52 = vpack.c.bf16 %v423_v44, %v422_v43  ;;  %v424_v53 = vmax.f32 %v392_v45, 0.0  ;;  %v425_v56 = vmax.f32 %v393_v48, 0.0  ;;  %v394_v7 = vadd.f32 %v5006_v28, %v355_v59  ;;  %v3937_v44 = vld [vmem:[%s4979_s18 + $0x60] sm:$0xff]  }
  0x1e   : > { %v374_v57 = vadd.f32 %v5006_v28, %v335_v49  ;;  %v375_v58 = vadd.f32 %v5006_v28, %v336_v50  ;;  %v395_v9 = vadd.f32 %v5006_v28, %v356_v62  ;;  %v357_v11 = vmul.f32 %v3828_v55, %v4992_v23 }
  0x1f   : > { %4520 = vmatpush3.bf16.msra.mxu1 %v4941_v13  ;;  %v511_v60 = vshrl.u32 %v446_v52, 16  ;;  %v514_v61 = vshll.u32 %v446_v52, 16  ;;  %v447_v2 = vpack.c.bf16 %v425_v56, %v424_v53  ;;  %v358_v12 = vmul.f32 %v3829_v63, %v4992_v23 }
  0x20   : > { %3965 = vmatpush3.bf16.msra.mxu0 %v4707_v15  ;;  %4513 = vmatprep.subr.bf16.mxu1 %v4958_v16  ;;  %v406_v4 = vmax.f32 %v374_v57, 0.0  ;;  %v407_v5 = vmax.f32 %v375_v58, 0.0  ;;  %v427_v22 = vmax.f32 %v395_v9, 0.0  ;;  %v396_v25 = vadd.f32 %v5006_v28, %v357_v11 }
  0x21   : > { %3966 = vmatprep.subr.bf16.mxu0 %v4709_v17  ;;  %v513_v8 = vrot.slane %v511_v60, 7  ;;  %v518_v14 = vshrl.u32 %v447_v2, 16  ;;  %v521_v15 = vshll.u32 %v447_v2, 16  ;;  %v397_v34 = vadd.f32 %v5006_v28, %v358_v12 }
  0x22   : > { %v438_v17 = vpack.c.bf16 %v407_v5, %v406_v4  ;;  %v3788_v47 = vunpack.c.l.bf16 %v3926_v31  ;;  %v3789_v48 = vunpack.c.h.bf16 %v3926_v31  ;;  %v3832_v59 = vunpack.c.l.bf16 %v3937_v44  ;;  %v3938_v4 = vld [vmem:[%s4979_s18 + $0x68] sm:$0xff]  }
  0x23   : > { %4521 = vmatpush3.bf16.msra.mxu1 %v4958_v16  ;;  %v429_v46 = vmax.f32 %v397_v34, 0.0  ;;  %v3833_v60 = vunpack.c.h.bf16 %v3937_v44 }
  0x24   : > { %3967 = vmatpush3.bf16.msra.mxu0 %v4710_v18  ;;  %4514 = vmatprep.subr.bf16.mxu1 %v4972_v19  ;;  %v426_v18 = vmax.f32 %v394_v7, 0.0  ;;  %v455_v29 = vshrl.u32 %v438_v17, 16  ;;  %v458_v30 = vshll.u32 %v438_v17, 16  ;;  %v337_v56 = vmul.f32 %v3788_v47, %v4992_v23 }
  0x25   : > { %3968 = vmatprep.subr.bf16.mxu0 %v4712_v20  ;;  %v516_v20 = vor.u32 %v514_v61, %v513_v8  ;;  %v338_v58 = vmul.f32 %v3789_v48, %v4992_v23  ;;  %v360_v17 = vmul.f32 %v3833_v60, %v4992_v23 }
  0x26   : > { %v448_v33 = vpack.c.bf16 %v427_v22, %v426_v18  ;;  %v457_v41 = vrot.slane %v455_v29, 7  ;;  %v376_v9 = vadd.f32 %v5006_v28, %v337_v56  ;;  %v4724_v56 = vld [vmem:[%s6010_s3] sm:$0xff]  }
  0x27   : > { %4522 = vmatpush3.bf16.msra.mxu1 %v4972_v19  ;;  %v377_v11 = vadd.f32 %v5006_v28, %v338_v58 }
  0x28   : > { %3969 = vmatpush3.bf16.msra.mxu0 %v4713_v21  ;;  %4515 = vmatprep.subr.bf16.mxu1 %v4998_v24  ;;  %v625_v21 = vsel %vm5038_vm2, %v513_v8, 0  ;;  %v525_v42 = vshrl.u32 %v448_v33, 16  ;;  %v528_v43 = vshll.u32 %v448_v33, 16  ;;  %v460_v51 = vor.u32 %v458_v30, %v457_v41 }
  0x29   : > { %3970 = vmatprep.subr.bf16.mxu0 %v4715_v27  ;;  %v3469_v26 = vcombine.low %v625_v21, %v625_v21  ;;  %v520_v27 = vrot.slane %v518_v14, 7  ;;  %v617_v52 = vsel %vm5038_vm2, %v457_v41, 0  ;;  %v408_v33 = vmax.f32 %v376_v9, 0.0  ;;  %v4728_v9 = vld [vmem:[%s6010_s3 + $0x8] sm:$0xff]  }
  0x2a   : > { %v3445_v53 = vcombine.low %v617_v52, %v617_v52  ;;  %v527_v54 = vrot.slane %v525_v42, 7  ;;  %v601_v57 = vsel %vm5038_vm2, 0, %v460_v51  ;;  %v409_v34 = vmax.f32 %v377_v11, 0.0 }
  0x2b   : > { %4523 = vmatpush3.bf16.msra.mxu1 %v4998_v24  ;;  %836 = vst [vmem:[#allocation2 + $0x74] sm:$0x1] %v3469_v26  ;;  %v523_v38 = vor.u32 %v521_v15, %v520_v27  ;;  %v626_v39 = vsel %vm5038_vm2, %v520_v27, 0  ;;  %v3443_v61 = vcombine.low %v601_v57, %v601_v57  ;;  %v3444_v62 = vcombine.high %v601_v57, %v601_v57 }
  0x2c   : > { %3971 = vmatpush3.bf16.msra.mxu0 %v4719_v32  ;;  %4092 = vmatprep.subr.bf16.mxu1 %v4723_v35  ;;  %v609_v32 = vsel %vm5038_vm2, 0, %v516_v20  ;;  %v428_v35 = vmax.f32 %v396_v25, 0.0  ;;  %v3472_v40 = vcombine.low %v626_v39, %v626_v39  ;;  %812 = vst [vmem:[#allocation2 + $0x14] sm:$0x1] %v3445_v53  ;;  %v530_v63 = vor.u32 %v528_v43, %v527_v54 }
  0x2d   : > { %4364 = vmatprep.subr.bf16.mxu0 %v4888_v0  ;;  %v3467_v36 = vcombine.low %v609_v32, %v609_v32  ;;  %v3468_v37 = vcombine.high %v609_v32, %v609_v32  ;;  %v610_v45 = vsel %vm5038_vm2, 0, %v523_v38  ;;  %v627_v2 = vsel %vm5038_vm2, %v527_v54, 0  ;;  %810 = vst [vmem:[#allocation2 + $0xc] sm:$0xf] %v3443_v61  ;;  %811 = vst [vmem:[#allocation2 + $0x10] sm:$0xf] %v3444_v62 }
  0x2e   : > { %v3470_v49 = vcombine.low %v610_v45, %v610_v45  ;;  %v3471_v50 = vcombine.high %v610_v45, %v610_v45  ;;  %839 = vst [vmem:[#allocation2 + $0x80] sm:$0x1] %v3472_v40  ;;  %v449_v55 = vpack.c.bf16 %v429_v46, %v428_v35  ;;  %v3475_v7 = vcombine.low %v627_v2, %v627_v2 }
  0x2f   : > { %834 = vst [vmem:[#allocation2 + $0x6c] sm:$0xf] %v3467_v36  ;;  %835 = vst [vmem:[#allocation2 + $0x70] sm:$0xf] %v3468_v37  ;;  %v611_v12 = vsel %vm5038_vm2, 0, %v530_v63  ;;  %v359_v15 = vmul.f32 %v3832_v59, %v4992_v23  ;;  %v3836_v25 = vunpack.c.l.bf16 %v3938_v4  ;;  %v3837_v26 = vunpack.c.h.bf16 %v3938_v4  ;;  %v4727_v59 = vld [vmem:[%s6010_s3 + $0x48] sm:$0xff]  }
  0x30   : > { %837 = vst [vmem:[#allocation2 + $0x78] sm:$0xf] %v3470_v49  ;;  %838 = vst [vmem:[#allocation2 + $0x7c] sm:$0xf] %v3471_v50  ;;  %v532_v8 = vshrl.u32 %v449_v55, 16  ;;  %v535_v14 = vshll.u32 %v449_v55, 16  ;;  %v3473_v21 = vcombine.low %v611_v12, %v611_v12  ;;  %v3474_v22 = vcombine.high %v611_v12, %v611_v12 }
  0x31   : > { %842 = vst [vmem:[#allocation2 + $0x8c] sm:$0x1] %v3475_v7  ;;  %v398_v31 = vadd.f32 %v5006_v28, %v359_v15  ;;  %v399_v38 = vadd.f32 %v5006_v28, %v360_v17  ;;  %v361_v39 = vmul.f32 %v3836_v25, %v4992_v23  ;;  %v439_v43 = vpack.c.bf16 %v409_v34, %v408_v33  ;;  %v3927_v12 = vld [vmem:[%s4979_s18 + $0x10] sm:$0xff]  }
  0x32   : > { %v4717_v5 = vld [vmem:[#allocation2 + $0x74] ss:$0 sps:$4 sm:$0x11]   ;;  %840 = vst [vmem:[#allocation2 + $0x84] sm:$0xf] %v3473_v21  ;;  %v534_v32 = vrot.slane %v532_v8, 7  ;;  %v362_v44 = vmul.f32 %v3837_v26, %v4992_v23 }
  0x33   : > { %v1417_v29 = vrot.slane %v4717_v5, 1  ;;  %841 = vst [vmem:[#allocation2 + $0x88] sm:$0xf] %v3474_v22  ;;  %v4726_v47 = vld [vmem:[#allocation2 + $0x14] ss:$0 sps:$4 sm:$0x11]   ;;  %v5086_v54 = vadd.f32 %v5006_v28, %v361_v39 }
  0x34   : > { %v537_v41 = vor.u32 %v535_v14, %v534_v32  ;;  %v628_v42 = vsel %vm5038_vm2, %v534_v32, 0  ;;  %v430_v49 = vmax.f32 %v398_v31, 0.0  ;;  %v867_v50 = vld [vmem:[#allocation2 + $0xc] sm:$0xf]  ;;  %v868_v51 = vld [vmem:[#allocation2 + $0x10] sm:$0xf]  ;;  %v401_v11 = vadd.f32 %v5006_v28, %v362_v44 }
  0x35   : > { %v4721_v30 = vld [vmem:[#allocation2 + $0x80] ss:$0 sps:$4 sm:$0x11]   ;;  %v3478_v48 = vcombine.low %v628_v42, %v628_v42  ;;  %v462_v53 = vshrl.u32 %v439_v43, 16  ;;  %v5091_v57 = vcombine.low %v867_v50, %v868_v51  ;;  %v1120_v58 = vshll.u32 %v4726_v47, 16  ;;  %v5110_v22 = vld [vmem:[%s4979_s18 + $0x70] sm:$0xff]  }
  0x36   : > { %v884_v18 = vld [vmem:[#allocation2 + $0x70] sm:$0xf]  ;;  %v928_v20 = vld [vmem:[#allocation2 + $0x6c] sm:$0xe]  ;;  %v1420_v37 = vrot.slane %v4721_v30, 1  ;;  %v612_v52 = vsel %vm5038_vm2, 0, %v537_v41  ;;  %v3792_v42 = vunpack.c.l.bf16 %v3927_v12 }
  0x37   : > { %v3536_v27 = vcombine.low %v928_v20, %v884_v18  ;;  %v886_v36 = vld [vmem:[#allocation2 + $0x7c] sm:$0xf]  ;;  %v929_v40 = vld [vmem:[#allocation2 + $0x78] sm:$0xe]  ;;  %v3476_v60 = vcombine.low %v612_v52, %v612_v52  ;;  %845 = vst [vmem:[#allocation2 + $0x98] sm:$0x1] %v3478_v48  ;;  %v3477_v62 = vcombine.high %v612_v52, %v612_v52 }
  0x38   : > { %v3537_v46 = vcombine.low %v929_v40, %v886_v36  ;;  %v4730_v61 = vld [vmem:[#allocation2 + $0x8c] ss:$0 sps:$4 sm:$0x11]   ;;  %v464_v63 = vrot.slane %v462_v53, 7  ;;  %v465_v2 = vshll.u32 %v439_v43, 16  ;;  %v431_v4 = vmax.f32 %v399_v38, 0.0 }
  0x39   : > { %v1416_v35 = vrot.slane %v3536_v27, 1  ;;  %v1113_v7 = vshrl.u32 %v5091_v57, 16  ;;  %v1115_v8 = vshll.u32 %v5091_v57, 16  ;;  %843 = vst [vmem:[#allocation2 + $0x90] sm:$0xf] %v3476_v60  ;;  %v1122_v14 = vrot.slane %v1120_v58, 1 }
  0x3a   : > { %v1419_v55 = vrot.slane %v3537_v46, 1  ;;  %v888_v15 = vld [vmem:[#allocation2 + $0x88] sm:$0xf]  ;;  %v930_v17 = vld [vmem:[#allocation2 + $0x84] sm:$0xe]  ;;  %v467_v18 = vor.u32 %v465_v2, %v464_v63  ;;  %v618_v20 = vsel %vm5038_vm2, %v464_v63, 0  ;;  %v450_v21 = vpack.c.bf16 %v431_v4, %v430_v49 }
  0x3b   : > { %v5080_v45 = vsel %vm1388_vm3, %v1416_v35, %v1417_v29  ;;  %844 = vst [vmem:[#allocation2 + $0x94] sm:$0xf] %v3477_v62  ;;  %v1117_v25 = vrot.slane %v1115_v8, 1  ;;  %v3538_v26 = vcombine.low %v930_v17, %v888_v15  ;;  %v1423_v27 = vrot.slane %v4730_v61, 1  ;;  %v4735_v29 = vld [vmem:[%s6010_s3 + $0x50] sm:$0xff]   ;;  %v5119_v39 = vld [vmem:[%s4979_s18 + $0x78] sm:$0xff]  }
  0x3c   : > { %4396 = vmatprep.mubr.bf16.mxu1 %v5080_v45  ;;  %v5097_v5 = vsel %vm1388_vm3, %v1419_v55, %v1420_v37  ;;  %v3448_v30 = vcombine.low %v618_v20, %v618_v20  ;;  %v602_v31 = vsel %vm5038_vm2, 0, %v467_v18  ;;  %v539_v32 = vshrl.u32 %v450_v21, 16  ;;  %v4736_v47 = vld [vmem:[%s6010_s3 + $0x10] sm:$0xff]   ;;  %v4739_v51 = vld [vmem:[%s6010_s3 + $0x58] sm:$0xff]  }
  0x3d   : > { %4397 = vmatmul.mubr.bf16.vlgmr.msra.gmra.mrb[0].mxu1 %v5097_v5  ;;  %v542_v33 = vshll.u32 %v450_v21, 16  ;;  %v432_v34 = vmax.f32 %v5086_v54, 0.0  ;;  %v1118_v35 = vor.u32 %v1117_v25, %v1113_v7  ;;  %v1422_v36 = vrot.slane %v3538_v26, 1  ;;  %v4740_v2 = vld [vmem:[%s6010_s3 + $0x18] sm:$0xff]  }
  0x3e   : > { %4093 = vmatpush3.bf16.msra.mxu1 %v4724_v56  ;;  %v3446_v37 = vcombine.low %v602_v31, %v602_v31  ;;  %v3447_v38 = vcombine.high %v602_v31, %v602_v31  ;;  %815 = vst [vmem:[#allocation2 + $0x20] sm:$0x1] %v3448_v30  ;;  %v4733_v40 = vld [vmem:[#allocation2 + $0x98] ss:$0 sps:$4 sm:$0x11]   ;;  %v541_v41 = vrot.slane %v539_v32, 7  ;;  %v3793_v43 = vunpack.c.h.bf16 %v3927_v12 }
  0x3f   : > { %4094 = vmatprep.subr.bf16.mxu1 %v4727_v59  ;;  %v5122_v44 = vsel %vm1099_vm4, %v1118_v35, %v1122_v14  ;;  %v5125_v46 = vsel %vm1388_vm3, %v1422_v36, %v1423_v27  ;;  %v433_v48 = vmax.f32 %v401_v11, 0.0  ;;  %v3840_v49 = vunpack.c.l.bf16 %v5110_v22  ;;  %v4748_v32 = vld [vmem:[%s6010_s3 + $0x20] sm:$0xff]  }
  0x40   : > { %813 = vst [vmem:[#allocation2 + $0x18] sm:$0xf] %v3446_v37  ;;  %814 = vst [vmem:[#allocation2 + $0x1c] sm:$0xf] %v3447_v38  ;;  %1734 = vmatprep.mubr.bf16.mxu0 %v5122_v44  ;;  %4400 = vmatprep.mubr.bf16.mxu1 %v5125_v46  ;;  %v931_v50 = vld [vmem:[#allocation2 + $0x90] sm:$0xe]  ;;  %v544_v52 = vor.u32 %v542_v33, %v541_v41  ;;  %v339_v54 = vmul.f32 %v3792_v42, %v4992_v23  ;;  %v3841_v55 = vunpack.c.h.bf16 %v5110_v22 }
  0x41   : > { %v629_v53 = vsel %vm5038_vm2, %v541_v41, 0  ;;  %1735 = vmatmul.mubr.bf16.vlgmr.msra.gmra.mrb[0].mxu0 %v5091_v57  ;;  %v451_v59 = vpack.c.bf16 %v433_v48, %v432_v34  ;;  %v340_v60 = vmul.f32 %v3793_v43, %v4992_v23  ;;  %v3844_v61 = vunpack.c.l.bf16 %v5119_v39  ;;  %v4751_v38 = vld [vmem:[%s6010_s3 + $0x68] sm:$0xff]   ;;  %v3928_v42 = vld [vmem:[%s4979_s18 + $0x18] sm:$0xff]   ;;  %v865_v43 = vld [vmem:[#allocation2] sm:$0xf] }
  0x42   : > { %4095 = vmatpush3.bf16.msra.mxu1 %v4728_v9  ;;  %v890_v56 = vld [vmem:[#allocation2 + $0x94] sm:$0xf]  ;;  %v3481_v58 = vcombine.low %v629_v53, %v629_v53  ;;  %4365 = vmatpush3.bf16.msra.mxu0 %v4888_v0  ;;  %v1426_v63 = vrot.slane %v4733_v40, 1  ;;  %v613_v4 = vsel %vm5038_vm2, 0, %v544_v52  ;;  %v378_v7 = vadd.f32 %v5006_v28, %v339_v54  ;;  %v4747_v0 = vld [vmem:[%s6010_s3 + $0x60] sm:$0xff]  }
  0x43   : > { %4096 = vmatprep.subr.bf16.mxu1 %v4735_v29  ;;  %v3539_v62 = vcombine.low %v931_v50, %v890_v56  ;;  %v3479_v8 = vcombine.low %v613_v4, %v613_v4  ;;  %v3480_v9 = vcombine.high %v613_v4, %v613_v4  ;;  %v546_v11 = vshrl.u32 %v451_v59, 16  ;;  %4366 = vmatprep.subr.bf16.mxu0 %v4901_v3  ;;  %v4752_v4 = vld [vmem:[%s6010_s3 + $0x28] sm:$0xff]  }
  0x44   : > { %848 = vst [vmem:[#allocation2 + $0xa4] sm:$0x1] %v3481_v58  ;;  %v549_v12 = vshll.u32 %v451_v59, 16  ;;  %v379_v17 = vadd.f32 %v5006_v28, %v340_v60  ;;  %v363_v18 = vmul.f32 %v3840_v49, %v4992_v23  ;;  %v364_v20 = vmul.f32 %v3841_v55, %v4992_v23 }
  0x45   : > { %v1425_v14 = vrot.slane %v3539_v62, 1  ;;  %v4738_v15 = vld [vmem:[#allocation2 + $0x20] ss:$0 sps:$4 sm:$0x11]   ;;  %846 = vst [vmem:[#allocation2 + $0x9c] sm:$0xf] %v3479_v8  ;;  %v3845_v25 = vunpack.c.h.bf16 %v5119_v39  ;;  %v365_v26 = vmul.f32 %v3844_v61, %v4992_v23  ;;  %v3797_v8 = vunpack.c.h.bf16 %v3928_v42 }
  0x46   : > { %4097 = vmatpush3.bf16.msra.mxu1 %v4736_v47  ;;  %847 = vst [vmem:[#allocation2 + $0xa0] sm:$0xf] %v3480_v9  ;;  %v548_v21 = vrot.slane %v546_v11, 7  ;;  %v410_v22 = vmax.f32 %v378_v7, 0.0  ;;  %v1132_v31 = vshll.u32 %v4738_v15, 16  ;;  %v411_v33 = vmax.f32 %v379_v17, 0.0  ;;  %4367 = vmatpush3.bf16.msra.mxu0 %v4901_v3 }
  0x47   : > { %4098 = vmatprep.subr.bf16.mxu1 %v4739_v51  ;;  %v5160_v27 = vsel %vm1388_vm3, %v1425_v14, %v1426_v63  ;;  %v869_v29 = vld [vmem:[#allocation2 + $0x18] sm:$0xf]  ;;  %v870_v30 = vld [vmem:[#allocation2 + $0x1c] sm:$0xf]  ;;  %v402_v34 = vadd.f32 %v5006_v28, %v363_v18  ;;  %v403_v39 = vadd.f32 %v5006_v28, %v364_v20  ;;  %4368 = vmatprep.subr.bf16.mxu0 %v4913_v6  ;;  %v5178_v47 = vld [vmem:[#allocation2 + $0x4] sm:$0xf]  ;;  %v3796_v7 = vunpack.c.l.bf16 %v3928_v42 }
  0x48   : > { %4401 = vmatmul.mubr.bf16.gmra.mrb[4].mxu1 %v5160_v27  ;;  %v5168_v35 = vcombine.low %v869_v29, %v870_v30  ;;  %v551_v36 = vor.u32 %v549_v12, %v548_v21  ;;  %v630_v37 = vsel %vm5038_vm2, %v548_v21, 0  ;;  %v440_v40 = vpack.c.bf16 %v411_v33, %v410_v22  ;;  %v4760_v21 = vld [vmem:[%s6010_s3 + $0x30] sm:$0xff]  }
  0x49   : > { %v3484_v3 = vcombine.low %v630_v37, %v630_v37  ;;  %v434_v41 = vmax.f32 %v402_v34, 0.0  ;;  %v435_v51 = vmax.f32 %v403_v39, 0.0  ;;  %v366_v56 = vmul.f32 %v3845_v25, %v4992_v23  ;;  %v5226_v39 = vld [vmem:[#allocation2 + $0x8] ss:$0 sps:$4 sm:$0x11]  }
  0x4a   : > { %4099 = vmatpush3.bf16.msra.mxu1 %v4740_v2  ;;  %v1125_v48 = vshrl.u32 %v5168_v35, 16  ;;  %v1127_v49 = vshll.u32 %v5168_v35, 16  ;;  %v614_v50 = vsel %vm5038_vm2, 0, %v551_v36  ;;  %v469_v55 = vshrl.u32 %v440_v40, 16  ;;  %4369 = vmatpush3.bf16.msra.mxu0 %v4913_v6 }
  0x4b   : > { %4100 = vmatprep.subr.bf16.mxu1 %v4747_v0  ;;  %v5184_v52 = vld [vmem:[#allocation2 + $0xa4] ss:$0 sps:$4 sm:$0x11]   ;;  %v3482_v53 = vcombine.low %v614_v50, %v614_v50  ;;  %v3483_v54 = vcombine.high %v614_v50, %v614_v50  ;;  %851 = vst [vmem:[#allocation2 + $0xb0] sm:$0x1] %v3484_v3  ;;  %v1134_v59 = vrot.slane %v1132_v31, 1  ;;  %v452_v60 = vpack.c.bf16 %v435_v51, %v434_v41 }
  0x4c   : > { %v1129_v58 = vrot.slane %v1127_v49, 1  ;;  %v404_v61 = vadd.f32 %v5006_v28, %v365_v26  ;;  %4370 = vmatprep.subr.bf16.mxu0 %v4926_v10  ;;  %v932_v63 = vld [vmem:[#allocation2 + $0x9c] sm:$0xe]  ;;  %v472_v2 = vshll.u32 %v440_v40, 16  ;;  %v405_v6 = vadd.f32 %v5006_v28, %v366_v56  ;;  %v4759_v0 = vld [vmem:[%s6010_s3 + $0x70] sm:$0xff]   ;;  %v5245_v56 = vld [vmem:[%s6010_s3 + $0x80] sm:$0xff]  }
  0x4d   : > { %v5190_v62 = vld [vmem:[#allocation2 + $0xa0] sm:$0xf]  ;;  %849 = vst [vmem:[#allocation2 + $0xa8] sm:$0xf] %v3482_v53  ;;  %850 = vst [vmem:[#allocation2 + $0xac] sm:$0xf] %v3483_v54  ;;  %v5202_v14 = vcombine.low %v865_v43, %v5178_v47  ;;  %v341_v29 = vmul.f32 %v3796_v7, %v4992_v23 }
  0x4e   : > { %4101 = vmatpush3.bf16.msra.mxu1 %v4748_v32  ;;  %v1130_v9 = vor.u32 %v1129_v58, %v1125_v48  ;;  %v3540_v11 = vcombine.low %v932_v63, %v5190_v62  ;;  %v1429_v12 = vrot.slane %v5184_v52, 1  ;;  %v471_v15 = vrot.slane %v469_v55, 7  ;;  %4371 = vmatpush3.bf16.msra.mxu0 %v4926_v10  ;;  %v4764_v43 = vld [vmem:[%s6010_s3 + $0x38] sm:$0xff]   ;;  %v3929_v48 = vld [vmem:[%s4979_s18 + $0x20] sm:$0xff]  }
  0x4f   : > { %4102 = vmatprep.subr.bf16.mxu1 %v4751_v38  ;;  %v553_v17 = vshrl.u32 %v452_v60, 16  ;;  %v556_v18 = vshll.u32 %v452_v60, 16  ;;  %v436_v20 = vmax.f32 %v404_v61, 0.0  ;;  %v437_v26 = vmax.f32 %v405_v6, 0.0  ;;  %4372 = vmatprep.subr.bf16.mxu0 %v4941_v13  ;;  %v4763_v38 = vld [vmem:[%s6010_s3 + $0x78] sm:$0xff]  }
  0x50   : > { %v5209_v22 = vsel %vm1099_vm4, %v1130_v9, %v1134_v59  ;;  %v1428_v25 = vrot.slane %v3540_v11, 1  ;;  %v474_v30 = vor.u32 %v472_v2, %v471_v15  ;;  %v619_v31 = vsel %vm5038_vm2, %v471_v15, 0  ;;  %v3930_v15 = vld [vmem:[%s4979_s18 + $0x28] sm:$0xff]  }
  0x51   : > { %1742 = vmatprep.mubr.bf16.mxu0 %v5209_v22  ;;  %v555_v32 = vrot.slane %v553_v17, 7  ;;  %v342_v10 = vmul.f32 %v3797_v8, %v4992_v23  ;;  %v3451_v36 = vcombine.low %v619_v31, %v619_v31  ;;  %v453_v37 = vpack.c.bf16 %v437_v26, %v436_v20 }
  0x52   : > { %4103 = vmatpush3.bf16.msra.mxu1 %v4752_v4  ;;  %1743 = vmatmul.mubr.bf16.gmra.mrb[4].mxu0 %v5168_v35  ;;  %v5219_v33 = vsel %vm1388_vm3, %v1428_v25, %v1429_v12  ;;  %v5221_v34 = vld [vmem:[#allocation2 + $0xb0] ss:$0 sps:$4 sm:$0x11]   ;;  %v603_v3 = vsel %vm5038_vm2, 0, %v474_v30  ;;  %v380_v42 = vadd.f32 %v5006_v28, %v341_v29  ;;  %v1103_v8 = vshll.u32 %v5202_v14, 16  ;;  %v4782_v30 = vld [vmem:[%s6010_s3 + $0x1c0] sm:$0xff]  }
  0x53   : > { %4104 = vmatprep.subr.bf16.mxu1 %v4759_v0  ;;  %4404 = vmatprep.mubr.bf16.mxu1 %v5219_v33  ;;  %v558_v40 = vor.u32 %v556_v18, %v555_v32  ;;  %v631_v41 = vsel %vm5038_vm2, %v555_v32, 0  ;;  %v3449_v51 = vcombine.low %v603_v3, %v603_v3  ;;  %v3450_v53 = vcombine.high %v603_v3, %v603_v3 }
  0x54   : > { %4373 = vmatpush3.bf16.msra.mxu0 %v4941_v13  ;;  %v5239_v49 = vld [vmem:[#allocation2 + $0xac] sm:$0xf]  ;;  %v933_v50 = vld [vmem:[#allocation2 + $0xa8] sm:$0xe]  ;;  %818 = vst [vmem:[#allocation2 + $0x2c] sm:$0x1] %v3451_v36  ;;  %v3487_v54 = vcombine.low %v631_v41, %v631_v41  ;;  %v381_v55 = vadd.f32 %v5006_v28, %v342_v10  ;;  %v3800_v12 = vunpack.c.l.bf16 %v3929_v48  ;;  %v3801_v0 = vunpack.c.h.bf16 %v3929_v48 }
  0x55   : > { %4374 = vmatprep.subr.bf16.mxu0 %v4958_v16  ;;  %v3541_v58 = vcombine.low %v933_v50, %v5239_v49  ;;  %v1432_v13 = vrot.slane %v5221_v34, 1  ;;  %v615_v59 = vsel %vm5038_vm2, 0, %v558_v40  ;;  %816 = vst [vmem:[#allocation2 + $0x24] sm:$0xf] %v3449_v51  ;;  %817 = vst [vmem:[#allocation2 + $0x28] sm:$0xf] %v3450_v53 }
  0x56   : > { %4105 = vmatpush3.bf16.msra.mxu1 %v4760_v21  ;;  %v3485_v60 = vcombine.low %v615_v59, %v615_v59  ;;  %v3486_v61 = vcombine.high %v615_v59, %v615_v59  ;;  %854 = vst [vmem:[#allocation2 + $0xbc] sm:$0x1] %v3487_v54  ;;  %v560_v63 = vshrl.u32 %v453_v37, 16  ;;  %v563_v2 = vshll.u32 %v453_v37, 16 }
  0x57   : > { %4106 = vmatprep.subr.bf16.mxu1 %v4763_v38  ;;  %v1431_v4 = vrot.slane %v3541_v58, 1  ;;  %v412_v6 = vmax.f32 %v380_v42, 0.0  ;;  %v413_v7 = vmax.f32 %v381_v55, 0.0  ;;  %v1108_v11 = vshll.u32 %v5226_v39, 16 }
  0x58   : > { %4375 = vmatpush3.bf16.msra.mxu0 %v4958_v16  ;;  %852 = vst [vmem:[#allocation2 + $0xb4] sm:$0xf] %v3485_v60  ;;  %853 = vst [vmem:[#allocation2 + $0xb8] sm:$0xf] %v3486_v61  ;;  %v562_v9 = vrot.slane %v560_v63, 7  ;;  %v1101_v20 = vshrl.u32 %v5202_v14, 16  ;;  %v343_v29 = vmul.f32 %v3800_v12, %v4992_v23  ;;  %v344_v36 = vmul.f32 %v3801_v0, %v4992_v23 }
  0x59   : > { %4376 = vmatprep.subr.bf16.mxu0 %v4972_v19  ;;  %v5258_v17 = vsel %vm1388_vm3, %v1431_v4, %v1432_v13  ;;  %v441_v18 = vpack.c.bf16 %v413_v7, %v412_v6  ;;  %v1105_v21 = vrot.slane %v1103_v8, 1  ;;  %v5264_v26 = vrot.slane %v1108_v11, 1  ;;  %v4818_v60 = vld [vmem:[%s6008_s1] ss:$0 sm:$0xff]  ;;  %v3931_v63 = vld [vmem:[%s4979_s18 + $0x30] sm:$0xff]  }
  0x5a   : > { %4107 = vmatpush3.bf16.msra.mxu1 %v4764_v43  ;;  %v565_v16 = vor.u32 %v563_v2, %v562_v9  ;;  %v632_v25 = vsel %vm5038_vm2, %v562_v9, 0  ;;  %v3804_v37 = vunpack.c.l.bf16 %v3930_v15  ;;  %v382_v40 = vadd.f32 %v5006_v28, %v343_v29 }
  0x5b   : > { %4405 = vmatmul.mubr.bf16.gmra.mrb[8].mxu1 %v5258_v17  ;;  %4412 = vmatprep.subr.bf16.mxu1 %v5245_v56  ;;  %v5271_v31 = vld [vmem:[#allocation2 + $0x2c] ss:$0 sps:$4 sm:$0x11]   ;;  %v3490_v32 = vcombine.low %v632_v25, %v632_v25  ;;  %v476_v10 = vshrl.u32 %v441_v18, 16  ;;  %v479_v3 = vshll.u32 %v441_v18, 16  ;;  %v1106_v53 = vor.u32 %v1105_v21, %v1101_v20 }
  0x5c   : > { %4377 = vmatpush3.bf16.msra.mxu0 %v4972_v19  ;;  %v616_v38 = vsel %vm5038_vm2, 0, %v565_v16  ;;  %v871_v41 = vld [vmem:[#allocation2 + $0x24] sm:$0xf]  ;;  %v5279_v42 = vld [vmem:[#allocation2 + $0x28] sm:$0xf]  ;;  %v1144_v43 = vshll.u32 %v5271_v31, 16  ;;  %v383_v54 = vadd.f32 %v5006_v28, %v344_v36  ;;  %v3805_v55 = vunpack.c.h.bf16 %v3930_v15 }
  0x5d   : > { %4378 = vmatprep.subr.bf16.mxu0 %v4998_v24  ;;  %v3488_v48 = vcombine.low %v616_v38, %v616_v38  ;;  %v3489_v50 = vcombine.high %v616_v38, %v616_v38  ;;  %857 = vst [vmem:[#allocation2 + $0xc8] sm:$0x1] %v3490_v32  ;;  %v478_v23 = vrot.slane %v476_v10, 7  ;;  %v5283_v19 = vcombine.low %v871_v41, %v5279_v42  ;;  %v5285_v51 = vld [vmem:[#allocation2 + $0xbc] ss:$0 sps:$4 sm:$0x11]  }
  0x5e   : > { %v414_v59 = vmax.f32 %v382_v40, 0.0  ;;  %v345_v61 = vmul.f32 %v4818_v60, %v3804_v37  ;;  %v4819_v28 = vld [vmem:[%s6010_s3 + $0x178] sm:$0xff]   ;;  %v1146_v6 = vrot.slane %v1144_v43, 1  ;;  %v1435_v8 = vrot.slane %v5285_v51, 1  ;;  %v4820_v32 = vld [vmem:[%s6009_s2] ss:$0 sm:$0xff] }
  0x5f   : > { %v5288_v24 = vld [vmem:[#allocation2 + $0xb8] sm:$0xf]  ;;  %855 = vst [vmem:[#allocation2 + $0xc0] sm:$0xf] %v3488_v48  ;;  %856 = vst [vmem:[#allocation2 + $0xc4] sm:$0xf] %v3489_v50  ;;  %v481_v58 = vor.u32 %v479_v3, %v478_v23  ;;  %v346_v16 = vmul.f32 %v4818_v60, %v3805_v55  ;;  %v3808_v10 = vunpack.c.l.bf16 %v3931_v63  ;;  %v3809_v3 = vunpack.c.h.bf16 %v3931_v63 }
  0x60   : > { %v620_v13 = vsel %vm5038_vm2, %v478_v23, 0  ;;  %4379 = vmatpush3.bf16.msra.mxu0 %v4819_v28  ;;  %v1137_v2 = vshrl.u32 %v5283_v19, 16  ;;  %v1139_v4 = vshll.u32 %v5283_v19, 16  ;;  %v934_v7 = vld [vmem:[#allocation2 + $0xb4] sm:$0xe]  ;;  %v415_v0 = vmax.f32 %v383_v54, 0.0 }
  0x61   : > { %4228 = vmatprep.subr.bf16.mxu0 %v4782_v30  ;;  %v3542_v9 = vcombine.low %v934_v7, %v5288_v24  ;;  %v604_v11 = vsel %vm5038_vm2, 0, %v481_v58  ;;  %v3454_v12 = vcombine.low %v620_v13, %v620_v13  ;;  %v3932_v15 = vld [vmem:[%s4979_s18 + $0x38] sm:$0xff]   ;;  %v384_v30 = vadd.f32 %v4820_v32, %v345_v61 }
  0x62   : > { %v1141_v18 = vrot.slane %v1139_v4, 1  ;;  %v3452_v20 = vcombine.low %v604_v11, %v604_v11  ;;  %v3453_v21 = vcombine.high %v604_v11, %v604_v11  ;;  %v442_v29 = vpack.c.bf16 %v415_v0, %v414_v59 }
  0x63   : > { %v1434_v25 = vrot.slane %v3542_v9, 1  ;;  %821 = vst [vmem:[#allocation2 + $0x38] sm:$0x1] %v3454_v12  ;;  %v385_v38 = vadd.f32 %v4820_v32, %v346_v16  ;;  %v3812_v40 = vunpack.c.l.bf16 %v3932_v15  ;;  %v416_v50 = vmax.f32 %v384_v30, 0.0 }
  0x64   : > { %v1142_v36 = vor.u32 %v1141_v18, %v1137_v2  ;;  %v5309_v37 = vld [vmem:[#allocation2 + $0xc8] ss:$0 sps:$4 sm:$0x11]   ;;  %819 = vst [vmem:[#allocation2 + $0x30] sm:$0xf] %v3452_v20  ;;  %v483_v43 = vshrl.u32 %v442_v29, 16  ;;  %v347_v58 = vmul.f32 %v4818_v60, %v3808_v10  ;;  %v348_v13 = vmul.f32 %v4818_v60, %v3809_v3 }
  0x65   : > { %820 = vst [vmem:[#allocation2 + $0x34] sm:$0xf] %v3453_v21  ;;  %v5312_v41 = vsel %vm1388_vm3, %v1434_v25, %v1435_v8  ;;  %v486_v48 = vshll.u32 %v442_v29, 16  ;;  %v3813_v59 = vunpack.c.h.bf16 %v3932_v15  ;;  %v1438_v63 = vrot.slane %v5309_v37, 1 }
  0x66   : > { %6019 = vst [vmem:[#allocation3_spill] sm:$0xff] %v5312_v41  ;;  %v5315_v23 = vsel %vm1099_vm4, %v1142_v36, %v1146_v6  ;;  %4408 = vmatprep.mubr.bf16.mxu1 %v5312_v41  ;;  %v5318_v54 = vld [vmem:[#allocation2 + $0xc4] sm:$0xf]  ;;  %v935_v55 = vld [vmem:[#allocation2 + $0xc0] sm:$0xe]  ;;  %v1111_v28 = vsel %vm1099_vm4, %v1106_v53, %v5264_v26  ;;  %v485_v2 = vrot.slane %v483_v43, 7  ;;  %v386_v6 = vadd.f32 %v4820_v32, %v347_v58 }
  0x67   : > { %1750 = vmatprep.mubr.bf16.mxu0 %v5315_v23  ;;  %v3543_v61 = vcombine.low %v935_v55, %v5318_v54  ;;  %v417_v4 = vmax.f32 %v385_v38, 0.0  ;;  %v387_v7 = vadd.f32 %v4820_v32, %v348_v13  ;;  %v349_v8 = vmul.f32 %v4818_v60, %v3812_v40 }
  0x68   : > { %1751 = vmatmul.mubr.bf16.gmra.mrb[8].mxu0 %v5283_v19  ;;  %v488_v11 = vor.u32 %v486_v48, %v485_v2  ;;  %v621_v12 = vsel %vm5038_vm2, %v485_v2, 0  ;;  %v350_v0 = vmul.f32 %v4818_v60, %v3813_v59  ;;  %v418_v21 = vmax.f32 %v386_v6, 0.0 }
  0x69   : > { %v1437_v9 = vrot.slane %v3543_v61, 1  ;;  %v3457_v18 = vcombine.low %v621_v12, %v621_v12  ;;  %v443_v20 = vpack.c.bf16 %v417_v4, %v416_v50  ;;  %v388_v16 = vadd.f32 %v4820_v32, %v349_v8 }
  0x6a   : > { %v5328_v15 = vld [vmem:[#allocation2 + $0x38] ss:$0 sps:$4 sm:$0x11]   ;;  %v605_v29 = vsel %vm5038_vm2, 0, %v488_v11  ;;  %v419_v30 = vmax.f32 %v387_v7, 0.0  ;;  %v389_v10 = vadd.f32 %v4820_v32, %v350_v0  ;;  %v4774_v11 = vld [vmem:[%s6010_s3 + $0x88] sm:$0xff]  }
  0x6b   : > { %v5331_v26 = vsel %vm1388_vm3, %v1437_v9, %v1438_v63  ;;  %v873_v53 = vld [vmem:[#allocation2 + $0x30] sm:$0xf]  ;;  %v1156_v36 = vshll.u32 %v5328_v15, 16  ;;  %v3455_v38 = vcombine.low %v605_v29, %v605_v29  ;;  %v3456_v3 = vcombine.high %v605_v29, %v605_v29  ;;  %824 = vst [vmem:[#allocation2 + $0x44] sm:$0x1] %v3457_v18 }
  0x6c   : > { %6020 = vst [vmem:[#allocation4_spill] sm:$0xff] %v5331_v26  ;;  %v5333_v25 = vld [vmem:[#allocation2 + $0x34] sm:$0xf]  ;;  %4409 = vmatmul.mubr.bf16.gmra.mrb[12].mxu1 %v5331_v26  ;;  %v490_v40 = vshrl.u32 %v443_v20, 16  ;;  %v493_v43 = vshll.u32 %v443_v20, 16  ;;  %v444_v48 = vpack.c.bf16 %v419_v30, %v418_v21  ;;  %v420_v50 = vmax.f32 %v388_v16, 0.0 }
  0x6d   : > { %v5339_v60 = vcombine.low %v873_v53, %v5333_v25  ;;  %2200 = vmatprep.mubr.bf16.mxu1 %v1111_v28  ;;  %822 = vst [vmem:[#allocation2 + $0x3c] sm:$0xf] %v3455_v38  ;;  %823 = vst [vmem:[#allocation2 + $0x40] sm:$0xf] %v3456_v3  ;;  %v421_v32 = vmax.f32 %v389_v10, 0.0  ;;  %v1158_v2 = vrot.slane %v1156_v36, 1 }
  0x6e   : > { %v492_v13 = vrot.slane %v490_v40, 7  ;;  %v497_v59 = vshrl.u32 %v444_v48, 16  ;;  %v500_v61 = vshll.u32 %v444_v48, 16  ;;  %v919_v26 = vld [vmem:[#allocation2] sm:$0xe] }
  0x6f   : > { %v1149_v55 = vshrl.u32 %v5339_v60, 16  ;;  %v1151_v58 = vshll.u32 %v5339_v60, 16  ;;  %v445_v4 = vpack.c.bf16 %v421_v32, %v420_v50 }
  0x70   : > { %v495_v6 = vor.u32 %v493_v43, %v492_v13  ;;  %v622_v28 = vsel %vm5038_vm2, %v492_v13, 0  ;;  %v499_v7 = vrot.slane %v497_v59, 7 }
  0x71   : > { %v1153_v63 = vrot.slane %v1151_v58, 1  ;;  %v3460_v9 = vcombine.low %v622_v28, %v622_v28  ;;  %v504_v12 = vshrl.u32 %v445_v4, 16  ;;  %v507_v0 = vshll.u32 %v445_v4, 16 }
  0x72   : > { %v5349_v18 = vld [vmem:[#allocation2 + $0x44] ss:$0 sps:$4 sm:$0x11]   ;;  %v606_v20 = vsel %vm5038_vm2, 0, %v495_v6  ;;  %v502_v21 = vor.u32 %v500_v61, %v499_v7  ;;  %v623_v30 = vsel %vm5038_vm2, %v499_v7, 0 }
  0x73   : > { %v1154_v8 = vor.u32 %v1153_v63, %v1149_v55  ;;  %v3458_v53 = vcombine.low %v606_v20, %v606_v20  ;;  %v3459_v29 = vcombine.high %v606_v20, %v606_v20  ;;  %827 = vst [vmem:[#allocation2 + $0x50] sm:$0x1] %v3460_v9  ;;  %v1168_v38 = vshll.u32 %v5349_v18, 16 }
  0x74   : > { %2201 = vmatmul.mubr.bf16.vlgmr.msra.gmra.mrb[16].mxu1 %v5202_v14  ;;  %v875_v10 = vld [vmem:[#allocation2 + $0x3c] sm:$0xf]  ;;  %v5360_v36 = vld [vmem:[#allocation2 + $0x40] sm:$0xf]  ;;  %v607_v3 = vsel %vm5038_vm2, 0, %v502_v21  ;;  %v3463_v40 = vcombine.low %v623_v30, %v623_v30  ;;  %v506_v50 = vrot.slane %v504_v12, 7 }
  0x75   : > { %v5354_v16 = vsel %vm1099_vm4, %v1154_v8, %v1158_v2  ;;  %4413 = vmatpush3.bf16.msra.mxu1 %v5245_v56  ;;  %v5368_v14 = vcombine.low %v875_v10, %v5360_v36  ;;  %2208 = vmatprep.mubr.bf16.mxu1 %v5122_v44  ;;  %825 = vst [vmem:[#allocation2 + $0x48] sm:$0xf] %v3458_v53  ;;  %826 = vst [vmem:[#allocation2 + $0x4c] sm:$0xf] %v3459_v29  ;;  %v4777_v56 = vld [vmem:[%s6010_s3 + $0x90] sm:$0xff]   ;;  %v1170_v61 = vrot.slane %v1168_v38, 1 }
  0x76   : > { %1758 = vmatprep.mubr.bf16.mxu0 %v5354_v16  ;;  %v3461_v43 = vcombine.low %v607_v3, %v607_v3  ;;  %v3462_v48 = vcombine.high %v607_v3, %v607_v3  ;;  %830 = vst [vmem:[#allocation2 + $0x5c] sm:$0x1] %v3463_v40  ;;  %4414 = vmatprep.subr.bf16.mxu1 %v4774_v11  ;;  %v624_v44 = vsel %vm5038_vm2, %v506_v50, 0  ;;  %v4778_v2 = vld [vmem:[%s6010_s3 + $0x98] sm:$0xff]   ;;  %v883_v38 = vld [vmem:[#allocation2 + $0x6c] sm:$0xf] }
  0x77   : > { %1759 = vmatmul.mubr.bf16.gmra.mrb[12].mxu0 %v5339_v60  ;;  %v1161_v55 = vshrl.u32 %v5368_v14, 16  ;;  %v1163_v58 = vshll.u32 %v5368_v14, 16  ;;  %v509_v32 = vor.u32 %v507_v0, %v506_v50  ;;  %v3466_v13 = vcombine.low %v624_v44, %v624_v44  ;;  %v4780_v3 = vld [vmem:[%s6010_s3 + $0xa8] sm:$0xff]  }
  0x78   : > { %828 = vst [vmem:[#allocation2 + $0x54] sm:$0xf] %v3461_v43  ;;  %829 = vst [vmem:[#allocation2 + $0x58] sm:$0xf] %v3462_v48 }
  0x79   : > { %4415 = vmatpush3.bf16.msra.mxu1 %v4774_v11  ;;  %v1165_v59 = vrot.slane %v1163_v58, 1  ;;  %v608_v63 = vsel %vm5038_vm2, 0, %v509_v32  ;;  %833 = vst [vmem:[#allocation2 + $0x68] sm:$0x1] %v3466_v13 }
  0x7a   : > { %4416 = vmatprep.subr.bf16.mxu1 %v4777_v56  ;;  %v5383_v4 = vld [vmem:[#allocation2 + $0x50] ss:$0 sps:$4 sm:$0x11]   ;;  %v3464_v6 = vcombine.low %v608_v63, %v608_v63  ;;  %v3465_v28 = vcombine.high %v608_v63, %v608_v63 }
  0x7b   : > { %v1166_v7 = vor.u32 %v1165_v59, %v1161_v55  ;;  %v4821_v59 = vld [vmem:[#allocation2 + $0x70] sm:$0xf] }
  0x7c   : > { %2209 = vmatmul.mubr.bf16.gmra.mrb[20].mxu1 %v5091_v57  ;;  %v877_v8 = vld [vmem:[#allocation2 + $0x48] sm:$0xf]  ;;  %v5386_v9 = vld [vmem:[#allocation2 + $0x4c] sm:$0xf]  ;;  %831 = vst [vmem:[#allocation2 + $0x60] sm:$0xf] %v3464_v6 }
  0x7d   : > { %2216 = vmatprep.mubr.bf16.mxu1 %v5209_v22  ;;  %832 = vst [vmem:[#allocation2 + $0x64] sm:$0xf] %v3465_v28  ;;  %4417 = vmatpush3.bf16.msra.mxu1 %v4777_v56  ;;  %v5393_v11 = vsel %vm1099_vm4, %v1166_v7, %v1170_v61  ;;  %v5396_v12 = vcombine.low %v877_v8, %v5386_v9  ;;  %v1180_v57 = vshll.u32 %v5383_v4, 16  ;;  %v5399_v0 = vld [vmem:[#allocation2 + $0x5c] ss:$0 sps:$4 sm:$0x11]  }
  0x7e   : > { %4418 = vmatprep.subr.bf16.mxu1 %v4778_v2  ;;  %1766 = vmatprep.mubr.bf16.mxu0 %v5393_v11  ;;  %v1192_v10 = vshll.u32 %v5399_v0, 16  ;;  %v5421_v61 = vcombine.low %v883_v38, %v4821_v59  ;;  %v4781_v7 = vld [vmem:[%s6010_s3 + $0xb0] sm:$0xff]  }
  0x7f   : > { %v879_v20 = vld [vmem:[#allocation2 + $0x54] sm:$0xf]  ;;  %v5402_v21 = vld [vmem:[#allocation2 + $0x58] sm:$0xf]  ;;  %1767 = vmatmul.mubr.bf16.gmra.mrb[16].mxu0 %v5368_v14  ;;  %v1173_v53 = vshrl.u32 %v5396_v12, 16  ;;  %v1175_v29 = vshll.u32 %v5396_v12, 16 }
  0x80   : > { %v5408_v30 = vcombine.low %v879_v20, %v5402_v21  ;;  %v1182_v43 = vrot.slane %v1180_v57, 1  ;;  %v5416_v56 = vld [vmem:[#allocation2 + $0x68] ss:$0 sps:$4 sm:$0x11]   ;;  %v1194_v32 = vrot.slane %v1192_v10, 1  ;;  %v1211_v10 = vshll.u32 %v5421_v61, 16 }
  0x81   : > { %4419 = vmatpush3.bf16.msra.mxu1 %v4778_v2  ;;  %v1177_v40 = vrot.slane %v1175_v29, 1  ;;  %v1204_v28 = vshll.u32 %v5416_v56, 16  ;;  %v885_v20 = vld [vmem:[#allocation2 + $0x78] sm:$0xf]  ;;  %v923_v38 = vld [vmem:[#allocation2 + $0x30] sm:$0xe] }
  0x82   : > { %v1185_v48 = vshrl.u32 %v5408_v30, 16  ;;  %v1187_v50 = vshll.u32 %v5408_v30, 16  ;;  %4420 = vmatprep.subr.bf16.mxu1 %v4779_v1  ;;  %v926_v59 = vld [vmem:[#allocation2 + $0x54] sm:$0xe]  ;;  %v1209_v41 = vshrl.u32 %v5421_v61, 16 }
  0x83   : > { %v1178_v55 = vor.u32 %v1177_v40, %v1173_v53  ;;  %v881_v44 = vld [vmem:[#allocation2 + $0x60] sm:$0xf]  ;;  %v922_v53 = vld [vmem:[#allocation2 + $0x24] sm:$0xe]  ;;  %v924_v40 = vld [vmem:[#allocation2 + $0x3c] sm:$0xe] }
  0x84   : > { %2217 = vmatmul.mubr.bf16.gmra.mrb[24].mxu1 %v5168_v35  ;;  %v1189_v58 = vrot.slane %v1187_v50, 1  ;;  %v5419_v13 = vld [vmem:[#allocation2 + $0x64] sm:$0xf]  ;;  %v925_v50 = vld [vmem:[#allocation2 + $0x48] sm:$0xe] }
  0x85   : > { %2224 = vmatprep.mubr.bf16.mxu1 %v5315_v23  ;;  %v5425_v63 = vcombine.low %v881_v44, %v5419_v13  ;;  %4421 = vmatpush3.bf16.msra.mxu1 %v4779_v1  ;;  %v5428_v2 = vsel %vm1099_vm4, %v1178_v55, %v1182_v43  ;;  %v1206_v43 = vrot.slane %v1204_v28, 1  ;;  %v3530_v44 = vcombine.low %v922_v53, %v5279_v42 }
  0x86   : > { %v1190_v6 = vor.u32 %v1189_v58, %v1185_v48  ;;  %4422 = vmatprep.subr.bf16.mxu1 %v4780_v3  ;;  %1774 = vmatprep.mubr.bf16.mxu0 %v5428_v2  ;;  %v4794_v48 = vld [vmem:[%s6010_s3 + $0xb8] sm:$0xff]   ;;  %v4822_v58 = vld [vmem:[#allocation2 + $0x74] ss:$0 sps:$4 sm:$0x11]   ;;  %v3532_v28 = vcombine.low %v924_v40, %v5360_v36  ;;  %v1402_v40 = vrot.slane %v5328_v15, 1  ;;  %v1411_v15 = vrot.slane %v5399_v0, 1 }
  0x87   : > { %v1197_v8 = vshrl.u32 %v5425_v63, 16  ;;  %v1199_v57 = vshll.u32 %v5425_v63, 16  ;;  %1775 = vmatmul.mubr.bf16.gmra.mrb[20].mxu0 %v5396_v12  ;;  %v1398_v53 = vrot.slane %v3530_v44, 1  ;;  %v1390_v0 = vrot.slane %v5226_v39, 1  ;;  %v889_v39 = vld [vmem:[#allocation2 + $0x90] sm:$0xf] }
  0x88   : > { %v5439_v1 = vsel %vm1099_vm4, %v1190_v6, %v1194_v32  ;;  %v1216_v32 = vshll.u32 %v4822_v58, 16  ;;  %v4823_v6 = vld [vmem:[#allocation2 + $0x7c] sm:$0xf]  ;;  %v1405_v58 = vrot.slane %v5349_v18, 1  ;;  %v1414_v18 = vrot.slane %v5416_v56, 1 }
  0x89   : > { %1782 = vmatprep.mubr.bf16.mxu0 %v5439_v1  ;;  %v1201_v29 = vrot.slane %v1199_v57, 1  ;;  %4423 = vmatpush3.bf16.msra.mxu1 %v4780_v3  ;;  %v5447_v57 = vcombine.low %v885_v20, %v4823_v6  ;;  %v3531_v3 = vcombine.low %v923_v38, %v5333_v25  ;;  %v3534_v20 = vcombine.low %v926_v59, %v5402_v21  ;;  %v5462_v25 = vld [vmem:[%s6010_s3 + $0x200] sm:$0xff]  }
  0x8a   : > { %4424 = vmatprep.subr.bf16.mxu1 %v4781_v7  ;;  %v1218_v36 = vrot.slane %v1216_v32, 1  ;;  %v1399_v38 = vrot.slane %v5271_v31, 1  ;;  %v927_v21 = vld [vmem:[#allocation2 + $0x60] sm:$0xe]  ;;  %v1408_v32 = vrot.slane %v5383_v4, 1 }
  0x8b   : > { %v1202_v55 = vor.u32 %v1201_v29, %v1197_v8  ;;  %v1213_v8 = vrot.slane %v1211_v10, 1  ;;  %v3533_v29 = vcombine.low %v925_v50, %v5386_v9  ;;  %v3527_v10 = vcombine.low %v919_v26, %v5178_v47  ;;  %v887_v47 = vld [vmem:[#allocation2 + $0x84] sm:$0xf] }
  0x8c   : > { %2225 = vmatmul.mubr.bf16.gmra.mrb[28].mxu1 %v5283_v19  ;;  %v1223_v9 = vshll.u32 %v5447_v57, 16  ;;  %v1410_v44 = vrot.slane %v3534_v20, 1  ;;  %v3535_v59 = vcombine.low %v927_v21, %v5419_v13  ;;  %v1221_v13 = vshrl.u32 %v5447_v57, 16  ;;  %v4825_v20 = vld [vmem:[#allocation2 + $0x80] ss:$0 sps:$4 sm:$0x11]  }
  0x8d   : > { %2232 = vmatprep.mubr.bf16.mxu1 %v5354_v16  ;;  %4425 = vmatpush3.bf16.msra.mxu1 %v4781_v7  ;;  %v5456_v42 = vsel %vm1099_vm4, %v1202_v55, %v1206_v43  ;;  %v1401_v7 = vrot.slane %v3531_v3, 1  ;;  %v1404_v43 = vrot.slane %v3532_v28, 1  ;;  %v1214_v50 = vor.u32 %v1213_v8, %v1209_v41  ;;  %v4824_v3 = vld [vmem:[#allocation2 + $0x88] sm:$0xf] }
  0x8e   : > { %4426 = vmatprep.subr.bf16.mxu1 %v4794_v48  ;;  %v5471_v55 = vsel %vm1388_vm3, %v1398_v53, %v1399_v38  ;;  %v1407_v31 = vrot.slane %v3533_v29, 1  ;;  %v1389_v6 = vrot.slane %v3527_v10, 1  ;;  %v5490_v4 = vsel %vm1388_vm3, %v1410_v44, %v1411_v15 }
  0x8f   : > { %1783 = vmatmul.mubr.bf16.gmra.mrb[24].mxu0 %v5408_v30  ;;  %v5475_v26 = vsel %vm1388_vm3, %v1401_v7, %v1402_v40  ;;  %v5481_v41 = vsel %vm1388_vm3, %v1404_v43, %v1405_v58  ;;  %v5493_v28 = vcombine.low %v887_v47, %v4824_v3  ;;  %v1413_v8 = vrot.slane %v3535_v59, 1 }
  0x90   : > { %1790 = vmatprep.mubr.bf16.mxu0 %v5456_v42  ;;  %v5498_v56 = vsel %vm1099_vm4, %v1214_v50, %v1218_v36  ;;  %v1225_v29 = vrot.slane %v1223_v9, 1  ;;  %v1228_v53 = vshll.u32 %v4825_v20, 16  ;;  %v5501_v38 = vsel %vm1388_vm3, %v1389_v6, %v1390_v0  ;;  %v4826_v36 = vld [vmem:[#allocation2 + $0x94] sm:$0xf] }
  0x91   : > { %4427 = vmatpush3.bf16.msra.mxu1 %v4794_v48  ;;  %v5487_v48 = vsel %vm1388_vm3, %v1407_v31, %v1408_v32  ;;  %v5504_v10 = vsel %vm1388_vm3, %v1413_v8, %v1414_v18  ;;  %v1235_v43 = vshll.u32 %v5493_v28, 16  ;;  %v5510_v9 = vcombine.low %v889_v39, %v4826_v36  ;;  %v4827_v31 = vld [vmem:[#allocation2 + $0x8c] ss:$0 sps:$4 sm:$0x11]   ;;  %v891_v32 = vld [vmem:[#allocation2 + $0x9c] sm:$0xf] }
  0x92   : > { %4460 = vmatprep.subr.bf16.mxu1 %v5462_v25  ;;  %v1226_v7 = vor.u32 %v1225_v29, %v1221_v13  ;;  %v1230_v40 = vrot.slane %v1228_v53, 1  ;;  %v1233_v50 = vshrl.u32 %v5493_v28, 16  ;;  %v1240_v47 = vshll.u32 %v4827_v31, 16  ;;  %v4828_v13 = vld [vmem:[#allocation2 + $0x98] ss:$0 sps:$4 sm:$0x11]  }
  0x93   : > { %v1237_v58 = vrot.slane %v1235_v43, 1  ;;  %v1247_v59 = vshll.u32 %v5510_v9, 16  ;;  %v5522_v18 = vcombine.low %v891_v32, %v5190_v62  ;;  %v1245_v0 = vshrl.u32 %v5510_v9, 16  ;;  %v893_v29 = vld [vmem:[#allocation2 + $0xa8] sm:$0xf] }
  0x94   : > { %2233 = vmatmul.mubr.bf16.gmra.mrb[32].mxu1 %v5339_v60  ;;  %v5514_v21 = vsel %vm1099_vm4, %v1226_v7, %v1230_v40  ;;  %v1242_v15 = vrot.slane %v1240_v47, 1  ;;  %v1252_v8 = vshll.u32 %v4828_v13, 16  ;;  %v5534_v39 = vcombine.low %v893_v29, %v5239_v49 }
  0x95   : > { %2240 = vmatprep.mubr.bf16.mxu1 %v5393_v11  ;;  %v1238_v44 = vor.u32 %v1237_v58, %v1233_v50  ;;  %v1249_v3 = vrot.slane %v1247_v59, 1  ;;  %v1259_v62 = vshll.u32 %v5522_v18, 16  ;;  %v1257_v40 = vshrl.u32 %v5522_v18, 16  ;;  %v895_v50 = vld [vmem:[#allocation2 + $0xb4] sm:$0xf] }
  0x96   : > { %v1254_v53 = vrot.slane %v1252_v8, 1  ;;  %v1264_v36 = vshll.u32 %v5184_v52, 16  ;;  %v1271_v49 = vshll.u32 %v5534_v39, 16  ;;  %v5547_v47 = vcombine.low %v895_v50, %v5288_v24  ;;  %v897_v59 = vld [vmem:[#allocation2 + $0xc0] sm:$0xf] }
  0x97   : > { %1791 = vmatmul.mubr.bf16.gmra.mrb[28].mxu0 %v5425_v63  ;;  %v5526_v6 = vsel %vm1099_vm4, %v1238_v44, %v1242_v15  ;;  %v1250_v20 = vor.u32 %v1249_v3, %v1245_v0  ;;  %v1261_v43 = vrot.slane %v1259_v62, 1  ;;  %v1269_v52 = vshrl.u32 %v5534_v39, 16 }
  0x98   : > { %1798 = vmatprep.mubr.bf16.mxu0 %v5498_v56  ;;  %v1266_v31 = vrot.slane %v1264_v36, 1  ;;  %v1273_v44 = vrot.slane %v1271_v49, 1  ;;  %v1276_v15 = vshll.u32 %v5221_v34, 16  ;;  %v1283_v24 = vshll.u32 %v5547_v47, 16 }
  0x99   : > { %v5538_v7 = vsel %vm1099_vm4, %v1250_v20, %v1254_v53  ;;  %v1262_v58 = vor.u32 %v1261_v43, %v1257_v40  ;;  %v5560_v13 = vcombine.low %v897_v59, %v5318_v54  ;;  %v1281_v34 = vshrl.u32 %v5547_v47, 16 }
  0x9a   : > { %v1274_v0 = vor.u32 %v1273_v44, %v1269_v52  ;;  %v1278_v3 = vrot.slane %v1276_v15, 1  ;;  %v1285_v29 = vrot.slane %v1283_v24, 1  ;;  %v1288_v20 = vshll.u32 %v5285_v51, 16  ;;  %v4829_v52 = vld [vmem:[#allocation2 + $0x10] sm:$0xf] }
  0x9b   : > { %v5551_v32 = vsel %vm1099_vm4, %v1262_v58, %v1266_v31  ;;  %v1295_v40 = vshll.u32 %v5560_v13, 16  ;;  %v1293_v43 = vshrl.u32 %v5560_v13, 16  ;;  %v1300_v51 = vshll.u32 %v5309_v37, 16  ;;  %v920_v31 = vld [vmem:[#allocation2 + $0xc] sm:$0xe] }
  0x9c   : > { %2241 = vmatmul.mubr.bf16.gmra.mrb[36].mxu1 %v5368_v14  ;;  %v5564_v8 = vsel %vm1099_vm4, %v1274_v0, %v1278_v3  ;;  %v1286_v53 = vor.u32 %v1285_v29, %v1281_v34  ;;  %v1290_v62 = vrot.slane %v1288_v20, 1  ;;  %v3528_v44 = vcombine.low %v920_v31, %v4829_v52  ;;  %v4830_v15 = vld [vmem:[#allocation2 + $0x14] ss:$0 sps:$4 sm:$0x11]   ;;  %v921_v0 = vld [vmem:[#allocation2 + $0x18] sm:$0xe] }
  0x9d   : > { %2248 = vmatprep.mubr.bf16.mxu1 %v5428_v2  ;;  %v1297_v36 = vrot.slane %v1295_v40, 1  ;;  %v1302_v58 = vrot.slane %v1300_v51, 1  ;;  %v1393_v59 = vrot.slane %v4830_v15, 1  ;;  %v4831_v3 = vld [vmem:[#allocation2 + $0x1c] sm:$0xf]  ;;  %v4784_v40 = vld [vmem:[%s6010_s3 + $0x180] sm:$0xff]  }
  0x9e   : > { %v5574_v54 = vsel %vm1099_vm4, %v1286_v53, %v1290_v62  ;;  %v1392_v37 = vrot.slane %v3528_v44, 1  ;;  %v3529_v24 = vcombine.low %v921_v0, %v4831_v3  ;;  %v4832_v20 = vld [vmem:[#allocation2 + $0x20] ss:$0 sps:$4 sm:$0x11]   ;;  %v4788_v51 = vld [vmem:[%s6010_s3 + $0x1d0] sm:$0xff]   ;;  %v4792_v31 = vld [vmem:[%s6010_s3 + $0x198] sm:$0xff]  }
  0x9f   : > { %1799 = vmatmul.mubr.bf16.gmra.mrb[32].mxu0 %v5421_v61  ;;  %v1298_v50 = vor.u32 %v1297_v36, %v1293_v43  ;;  %v1396_v53 = vrot.slane %v4832_v20, 1  ;;  %v4785_v43 = vld [vmem:[%s6010_s3 + $0x1c8] sm:$0xff]   ;;  %v4795_v52 = vld [vmem:[%s6010_s3 + $0x1e0] sm:$0xff]   ;;  %v4803_v0 = vld [vmem:[%s6010_s3 + $0x1b0] sm:$0xff]  }
  0xa0   : > { %1806 = vmatprep.mubr.bf16.mxu0 %v5514_v21  ;;  %v1394_v34 = vsel %vm1388_vm3, %v1392_v37, %v1393_v59  ;;  %v1395_v29 = vrot.slane %v3529_v24, 1  ;;  %v4786_v36 = vld [vmem:[%s6010_s3 + $0x188] sm:$0xff]   ;;  %v4797_v44 = vld [vmem:[%s6010_s3 + $0x1a0] sm:$0xff]   ;;  %v4801_v59 = vld [vmem:[%s6010_s3 + $0x1f0] sm:$0xff]  }
  0xa1   : > { %v5583_v49 = vsel %vm1099_vm4, %v1298_v50, %v1302_v58  ;;  %v4790_v50 = vld [vmem:[%s6010_s3 + $0x190] sm:$0xff]   ;;  %v4791_v58 = vld [vmem:[%s6010_s3 + $0x1d8] sm:$0xff]   ;;  %v4798_v37 = vld [vmem:[%s6010_s3 + $0x1e8] sm:$0xff]  }
  0xa2   : > { %v5593_v62 = vsel %vm1388_vm3, %v1395_v29, %v1396_v53  ;;  %v4799_v15 = vld [vmem:[%s6010_s3 + $0x1a8] sm:$0xff]   ;;  %v4805_v3 = vld [vmem:[%s6010_s3 + $0x1f8] sm:$0xff]   ;;  %v4809_v24 = vld [vmem:[%s6010_s3 + $0x210] sm:$0xff]  }
  0xa3   : > { %v4811_v29 = vld [vmem:[%s6010_s3 + $0x220] sm:$0xff]   ;;  %v4813_v20 = vld [vmem:[%s6010_s3 + $0x230] sm:$0xff]  }
  0xa4   : > { %2249 = vmatmul.mubr.bf16.gmra.mrb[40].mxu1 %v5396_v12 }
  0xa5   : > { %2256 = vmatprep.mubr.bf16.mxu1 %v5439_v1 }
  0xa7   : > { %1807 = vmatmul.mubr.bf16.gmra.mrb[36].mxu0 %v5447_v57 }
  0xa8   : > { %1814 = vmatprep.mubr.bf16.mxu0 %v5526_v6 }
  0xac   : > { %2257 = vmatmul.mubr.bf16.gmra.mrb[44].mxu1 %v5408_v30 }
  0xad   : > { %2264 = vmatprep.mubr.bf16.mxu1 %v5456_v42 }
  0xaf   : > { %1815 = vmatmul.mubr.bf16.gmra.mrb[40].mxu0 %v5493_v28 }
  0xb0   : > { %1822 = vmatprep.mubr.bf16.mxu0 %v5538_v7 }
  0xb4   : > { %2265 = vmatmul.mubr.bf16.gmra.mrb[48].mxu1 %v5425_v63 }
  0xb5   : > { %2272 = vmatprep.mubr.bf16.mxu1 %v5498_v56 }
  0xb7   : > { %1823 = vmatmul.mubr.bf16.gmra.mrb[44].mxu0 %v5510_v9 }
  0xb8   : > { %1830 = vmatprep.mubr.bf16.mxu0 %v5551_v32 }
  0xbc   : > { %2273 = vmatmul.mubr.bf16.gmra.mrb[52].mxu1 %v5421_v61 }
  0xbd   : > { %2280 = vmatprep.mubr.bf16.mxu1 %v5514_v21 }
  0xbf   : > { %1831 = vmatmul.mubr.bf16.gmra.mrb[48].mxu0 %v5522_v18 }
  0xc0   : > { %1838 = vmatprep.mubr.bf16.mxu0 %v5564_v8 }
  0xc4   : > { %2281 = vmatmul.mubr.bf16.gmra.mrb[56].mxu1 %v5447_v57 }
  0xc5   : > { %2288 = vmatprep.mubr.bf16.mxu1 %v5526_v6 }
  0xc7   : > { %1839 = vmatmul.mubr.bf16.gmra.mrb[52].mxu0 %v5534_v39 }
  0xc8   : > { %1846 = vmatprep.mubr.bf16.mxu0 %v5574_v54 }
  0xcc   : > { %2289 = vmatmul.mubr.bf16.gmra.mrb[60].mxu1 %v5493_v28 }
  0xcd   : > { %2296 = vmatprep.mubr.bf16.mxu1 %v5538_v7 }
  0xcf   : > { %1847 = vmatmul.mubr.bf16.gmra.mrb[56].mxu0 %v5547_v47 }
  0xd0   : > { %1854 = vmatprep.mubr.bf16.mxu0 %v5583_v49 }
  0xd4   : > { %2297 = vmatmul.mubr.bf16.gmra.mrb[64].mxu1 %v5510_v9 }
  0xd5   : > { %2304 = vmatprep.mubr.bf16.mxu1 %v5551_v32 }
  0xd7   : > { %1855 = vmatmul.mubr.bf16.gmra.mrb[60].mxu0 %v5560_v13 }
  0xd8   : > { %4380 = vmatprep.mubr.bf16.mxu0 %v1394_v34 }
  0xdc   : > { %2305 = vmatmul.mubr.bf16.gmra.mrb[68].mxu1 %v5522_v18 }
  0xdd   : > { %2312 = vmatprep.mubr.bf16.mxu1 %v5564_v8 }
  0xdf   : > { %4381 = vmatmul.mubr.bf16.vlgmr.msra.gmra.mrb[64].mxu0 %v5593_v62 }
  0xe0   : > { %4229 = vmatpush3.bf16.msra.mxu0 %v4784_v40  ;;  %4384 = vmatprep.mubr.bf16.mxu0 %v5471_v55 }
  0xe1   : > { %4230 = vmatprep.subr.bf16.mxu0 %v4785_v43 }
  0xe4   : > { %2313 = vmatmul.mubr.bf16.gmra.mrb[72].mxu1 %v5534_v39  ;;  %4231 = vmatpush3.bf16.msra.mxu0 %v4786_v36 }
  0xe5   : > { %2320 = vmatprep.mubr.bf16.mxu1 %v5574_v54  ;;  %4232 = vmatprep.subr.bf16.mxu0 %v4788_v51 }
  0xe7   : > { %4385 = vmatmul.mubr.bf16.gmra.mrb[68].mxu0 %v5475_v26 }
  0xe8   : > { %4233 = vmatpush3.bf16.msra.mxu0 %v4790_v50  ;;  %4388 = vmatprep.mubr.bf16.mxu0 %v5481_v41  ;;  %v6021_v50 = vld [vmem:[#allocation3_spill] sm:$0xff] }
  0xe9   : > { %4234 = vmatprep.subr.bf16.mxu0 %v4791_v58 }
  0xec   : > { %2321 = vmatmul.mubr.bf16.gmra.mrb[76].mxu1 %v5547_v47  ;;  %4235 = vmatpush3.bf16.msra.mxu0 %v4792_v31 }
  0xed   : > { %4428 = vmatprep.mubr.bf16.mxu1 %v5501_v38  ;;  %4236 = vmatprep.subr.bf16.mxu0 %v4795_v52  ;;  %v4808_v38 = vld [vmem:[%s6010_s3 + $0x208] sm:$0xff]  }
  0xef   : > { %4389 = vmatmul.mubr.bf16.gmra.mrb[72].mxu0 %v5487_v48 }
  0xf0   : > { %4237 = vmatpush3.bf16.msra.mxu0 %v4797_v44  ;;  %4392 = vmatprep.mubr.bf16.mxu0 %v5490_v4 }
  0xf1   : > { %4238 = vmatprep.subr.bf16.mxu0 %v4798_v37 }
  0xf4   : > { %4429 = vmatmul.mubr.bf16.vlgmr.msra.gmra.mrb[80].mxu1 %v1394_v34  ;;  %4239 = vmatpush3.bf16.msra.mxu0 %v4799_v15  ;;  %v4806_v34 = vld [vmem:[%s6010_s3 + $0x1b8] sm:$0xff]  }
  0xf5   : > { %4461 = vmatpush3.bf16.msra.mxu1 %v5462_v25  ;;  %4240 = vmatprep.subr.bf16.mxu0 %v4801_v59  ;;  %v4810_v25 = vld [vmem:[%s6010_s3 + $0x218] sm:$0xff]  }
  0xf6   : > { %4432 = vmatprep.mubr.bf16.mxu1 %v5593_v62  ;;  %4462 = vmatprep.subr.bf16.mxu1 %v4808_v38 }
  0xf7   : > { %4393 = vmatmul.mubr.bf16.gmra.mrb[76].mxu0 %v5504_v10 }
  0xf8   : > { %4241 = vmatpush3.bf16.msra.mxu0 %v4803_v0  ;;  %2715 = vmatprep.mubr.bf16.mxu0 %v5209_v22  ;;  %v4812_v22 = vld [vmem:[%s6010_s3 + $0x228] sm:$0xff]  }
  0xf9   : > { %4242 = vmatprep.subr.bf16.mxu0 %v4805_v3  ;;  %4463 = vmatpush3.bf16.msra.mxu1 %v4808_v38 }
  0xfa   : > { %4464 = vmatprep.subr.bf16.mxu1 %v4809_v24 }
  0xfc   : > { %4433 = vmatmul.mubr.bf16.gmra.mrb[84].mxu1 %v5471_v55  ;;  %4243 = vmatpush3.bf16.msra.mxu0 %v4806_v34 }
  0xfd   : > { %4436 = vmatprep.mubr.bf16.mxu1 %v5475_v26  ;;  %4465 = vmatpush3.bf16.msra.mxu1 %v4809_v24 }
  0xfe   : > { %4466 = vmatprep.subr.bf16.mxu1 %v4810_v25 }
  0xff   : > { %2716 = vmatmul.mubr.bf16.vlgmr.msra.gmra.mrb[80].mxu0 %v5168_v35  ;;  %v4814_v35 = vld [vmem:[%s6010_s3 + $0x238] sm:$0xff]  }
 0x100   : > { %2723 = vmatprep.mubr.bf16.mxu0 %v5315_v23 }
 0x101   : > { %4467 = vmatpush3.bf16.msra.mxu1 %v4810_v25 }
 0x102   : > { %4468 = vmatprep.subr.bf16.mxu1 %v4811_v29 }
 0x104   : > { %4437 = vmatmul.mubr.bf16.gmra.mrb[88].mxu1 %v5481_v41 }
 0x105   : > { %4440 = vmatprep.mubr.bf16.mxu1 %v5487_v48  ;;  %4469 = vmatpush3.bf16.msra.mxu1 %v4811_v29  ;;  %v899_v29 = vld [vmem:[#allocation2 + $0xcc] sm:$0xf] }
 0x106   : > { %4470 = vmatprep.subr.bf16.mxu1 %v4812_v22 }
 0x107   : > { %2724 = vmatmul.mubr.bf16.gmra.mrb[84].mxu0 %v5283_v19 }
 0x108   : > { %2731 = vmatprep.mubr.bf16.mxu0 %v5354_v16 }
 0x109   : > { %4471 = vmatpush3.bf16.msra.mxu1 %v4812_v22  ;;  %v900_v22 = vld [vmem:[#allocation2 + $0xd0] sm:$0xf] }
 0x10a   : > { %4472 = vmatprep.subr.bf16.mxu1 %v4813_v20 }
 0x10c   : > { %4441 = vmatmul.mubr.bf16.gmra.mrb[92].mxu1 %v5490_v4 }
 0x10d   : > { %4444 = vmatprep.mubr.bf16.mxu1 %v5504_v10  ;;  %4473 = vmatpush3.bf16.msra.mxu1 %v4813_v20 }
 0x10e   : > { %4474 = vmatprep.subr.bf16.mxu1 %v4814_v35 }
 0x10f   : > { %2732 = vmatmul.mubr.bf16.gmra.mrb[88].mxu0 %v5339_v60 }
 0x110   : > { %2739 = vmatprep.mubr.bf16.mxu0 %v5393_v11 }
 0x111   : > { %4475 = vmatpush3.bf16.msra.mxu1 %v4814_v35 }
 0x114   : > { %4445 = vmatmul.mubr.bf16.gmra.mrb[0].mxu1 %v5080_v45  ;;  %v3972_v19 = vpop.f32.mrb[0].mxu0 }
 0x115   : > { %4448 = vmatprep.mubr.bf16.mxu1 %v5097_v5  ;;  %v3973_v23 = vpop.f32.mrb[1].mxu0 }
 0x116   : > { %v5690_v16 = vadd.f32 %v3973_v23, %v3972_v19  ;;  %v3975_v53 = vpop.f32.mrb[2].mxu0  ;;  %v936_v19 = vld [vmem:[#allocation2 + $0xcc] sm:$0xe] }
 0x117   : > { %2740 = vmatmul.mubr.bf16.gmra.mrb[92].mxu0 %v5368_v14  ;;  %v3976_v40 = vpop.f32.mrb[3].mxu0 }
 0x118   : > { %2747 = vmatprep.mubr.bf16.mxu0 %v5428_v2  ;;  %v5694_v43 = vadd.f32 %v3976_v40, %v3975_v53 }
 0x11c   : > { %4449 = vmatmul.mubr.bf16.gmra.mrb[4].mxu1 %v5125_v46 }
 0x11d   : > { %4452 = vmatprep.mubr.bf16.mxu1 %v5160_v27 }
 0x11f   : > { %2748 = vmatmul.mubr.bf16.gmra.mrb[96].mxu0 %v5396_v12 }
 0x120   : > { %2755 = vmatprep.mubr.bf16.mxu0 %v5439_v1 }
 0x124   : > { %4453 = vmatmul.mubr.bf16.gmra.mrb[8].mxu1 %v5219_v33 }
 0x125   : > { %4456 = vmatprep.mubr.bf16.mxu1 %v5258_v17  ;;  %v3978_v60 = vpop.f32.mrb[4].mxu0 }
 0x126   : > { %v3979_v11 = vpop.f32.mrb[5].mxu0 }
 0x127   : > { %v5702_v14 = vadd.f32 %v3979_v11, %v3978_v60  ;;  %v3981_v36 = vpop.f32.mrb[6].mxu0  ;;  %2756 = vmatmul.mubr.bf16.gmra.mrb[100].mxu0 %v5408_v30 }
 0x128   : > { %v3982_v2 = vpop.f32.mrb[7].mxu0  ;;  %2763 = vmatprep.mubr.bf16.mxu0 %v5456_v42 }
 0x129   : > { %v5706_v51 = vadd.f32 %v3982_v2, %v3981_v36  ;;  %v3544_v36 = vcombine.low %v936_v19, %v900_v22 }
 0x12c   : > { %4457 = vmatmul.mubr.bf16.gmra.mrb[12].mxu1 %v6021_v50 }
 0x12d   : > { %4476 = vmatprep.mubr.bf16.mxu1 %v5593_v62 }
 0x12f   : > { %2764 = vmatmul.mubr.bf16.gmra.mrb[104].mxu0 %v5425_v63 }
 0x130   : > { %2771 = vmatprep.mubr.bf16.mxu0 %v5498_v56 }
 0x134   : > { %4477 = vmatmul.mubr.bf16.vlgmr.msra.gmra.mrb[80].mxu1 %v5471_v55 }
 0x135   : > { %4480 = vmatprep.mubr.bf16.mxu1 %v5475_v26 }
 0x137   : > { %2772 = vmatmul.mubr.bf16.gmra.mrb[108].mxu0 %v5421_v61 }
 0x138   : > { %2779 = vmatprep.mubr.bf16.mxu0 %v5514_v21 }
 0x13b   : > { %v3984_v12 = vpop.f32.mrb[8].mxu0 }
 0x13c   : > { %v3985_v30 = vpop.f32.mrb[9].mxu0  ;;  %4481 = vmatmul.mubr.bf16.gmra.mrb[84].mxu1 %v5481_v41 }
 0x13d   : > { %v5717_v1 = vadd.f32 %v3985_v30, %v3984_v12  ;;  %v3987_v42 = vpop.f32.mrb[10].mxu0  ;;  %4484 = vmatprep.mubr.bf16.mxu1 %v5487_v48 }
 0x13e   : > { %v3988_v63 = vpop.f32.mrb[11].mxu0 }
 0x13f   : > { %v5720_v62 = vadd.f32 %v3988_v63, %v3987_v42  ;;  %2780 = vmatmul.mubr.bf16.gmra.mrb[112].mxu0 %v5447_v57 }
 0x140   : > { %2787 = vmatprep.mubr.bf16.mxu0 %v5526_v6 }
 0x144   : > { %4485 = vmatmul.mubr.bf16.gmra.mrb[88].mxu1 %v5490_v4 }
 0x145   : > { %4488 = vmatprep.mubr.bf16.mxu1 %v5504_v10 }
 0x147   : > { %v4108_v61 = vpop.f32.mrb[16].mxu1  ;;  %2788 = vmatmul.mubr.bf16.gmra.mrb[116].mxu0 %v5493_v28 }
 0x148   : > { %v4109_v55 = vpop.f32.mrb[17].mxu1  ;;  %2795 = vmatprep.mubr.bf16.mxu0 %v5538_v7 }
 0x149   : > { %v5728_v41 = vadd.f32 %v4109_v55, %v4108_v61  ;;  %v4111_v48 = vpop.f32.mrb[18].mxu1  ;;  %v1440_v55 = vrot.slane %v3544_v36, 1 }
 0x14a   : > { %v3990_v26 = vpop.f32.mrb[12].mxu0  ;;  %v4112_v21 = vpop.f32.mrb[19].mxu1 }
 0x14b   : > { %v3991_v56 = vpop.f32.mrb[13].mxu0  ;;  %v5732_v6 = vadd.f32 %v4112_v21, %v4111_v48 }
 0x14c   : > { %v5730_v58 = vadd.f32 %v3991_v56, %v3990_v26  ;;  %v3993_v57 = vpop.f32.mrb[14].mxu0  ;;  %4489 = vmatmul.mubr.bf16.gmra.mrb[92].mxu1 %v5080_v45 }
 0x14d   : > { %v3994_v4 = vpop.f32.mrb[15].mxu0  ;;  %4492 = vmatprep.mubr.bf16.mxu1 %v5097_v5 }
 0x14e   : > { %v5735_v10 = vadd.f32 %v3994_v4, %v3993_v57 }
 0x14f   : > { %v4114_v28 = vpop.f32.mrb[20].mxu1  ;;  %2796 = vmatmul.mubr.bf16.gmra.mrb[120].mxu0 %v5510_v9 }
 0x150   : > { %v4115_v7 = vpop.f32.mrb[21].mxu1  ;;  %2803 = vmatprep.mubr.bf16.mxu0 %v5551_v32 }
 0x151   : > { %v5740_v31 = vadd.f32 %v4115_v7, %v4114_v28  ;;  %v4117_v52 = vpop.f32.mrb[22].mxu1 }
 0x152   : > { %v4118_v44 = vpop.f32.mrb[23].mxu1  ;;  %v3996_v37 = vpop.f32.mrb[16].mxu0 }
 0x153   : > { %v5742_v15 = vadd.f32 %v4118_v44, %v4117_v52  ;;  %v3997_v59 = vpop.f32.mrb[17].mxu0 }
 0x154   : > { %4493 = vmatmul.mubr.bf16.gmra.mrb[0].mxu1 %v5125_v46  ;;  %v5745_v45 = vadd.f32 %v3997_v59, %v3996_v37  ;;  %v3999_v38 = vpop.f32.mrb[18].mxu0 }
 0x155   : > { %4496 = vmatprep.mubr.bf16.mxu1 %v5160_v27  ;;  %v4000_v5 = vpop.f32.mrb[19].mxu0 }
 0x156   : > { %v5748_v9 = vadd.f32 %v4000_v5, %v3999_v38 }
 0x157   : > { %v4120_v0 = vpop.f32.mrb[24].mxu1  ;;  %2804 = vmatmul.mubr.bf16.gmra.mrb[124].mxu0 %v5522_v18 }
 0x158   : > { %v4121_v32 = vpop.f32.mrb[25].mxu1  ;;  %2811 = vmatprep.mubr.bf16.mxu0 %v5564_v8  ;;  %v3508_v8 = vcombine.low %v899_v29, %v900_v22 }
 0x159   : > { %v5752_v3 = vadd.f32 %v4121_v32, %v4120_v0  ;;  %v4123_v24 = vpop.f32.mrb[26].mxu1 }
 0x15a   : > { %v4124_v34 = vpop.f32.mrb[27].mxu1  ;;  %v4002_v25 = vpop.f32.mrb[20].mxu0  ;;  %v1307_v12 = vshll.u32 %v3508_v8, 16  ;;  %v1305_v48 = vshrl.u32 %v3508_v8, 16 }
 0x15b   : > { %v5754_v46 = vadd.f32 %v4124_v34, %v4123_v24  ;;  %v4003_v20 = vpop.f32.mrb[21].mxu0 }
 0x15c   : > { %4497 = vmatmul.mubr.bf16.gmra.mrb[4].mxu1 %v5219_v33  ;;  %v5757_v27 = vadd.f32 %v4003_v20, %v4002_v25  ;;  %v4005_v35 = vpop.f32.mrb[22].mxu0  ;;  %v4816_v33 = vld [vmem:[#allocation2 + $0xd4] ss:$0 sps:$4 sm:$0x11]   ;;  %v1309_v56 = vrot.slane %v1307_v12, 1 }
 0x15d   : > { %4500 = vmatprep.mubr.bf16.mxu1 %v5258_v17  ;;  %v4006_v18 = vpop.f32.mrb[23].mxu0  ;;  %v1312_v21 = vshll.u32 %v4816_v33, 16 }
 0x15e   : > { %v5760_v23 = vadd.f32 %v4006_v18, %v4005_v35  ;;  %v1310_v37 = vor.u32 %v1309_v56, %v1305_v48 }
 0x15f   : > { %v4126_v53 = vpop.f32.mrb[28].mxu1  ;;  %2812 = vmatmul.mubr.bf16.gmra.mrb[128].mxu0 %v5534_v39  ;;  %v6022_v39 = vld [vmem:[#allocation4_spill] sm:$0xff]  ;;  %v1314_v59 = vrot.slane %v1312_v21, 1 }
 0x160   : > { %v4127_v40 = vpop.f32.mrb[29].mxu1  ;;  %2819 = vmatprep.mubr.bf16.mxu0 %v5574_v54  ;;  %v1441_v54 = vrot.slane %v4816_v33, 1 }
 0x161   : > { %v5764_v60 = vadd.f32 %v4127_v40, %v4126_v53  ;;  %v4129_v11 = vpop.f32.mrb[30].mxu1  ;;  %v1315_v34 = vsel %vm1099_vm4, %v1310_v37, %v1314_v59 }
 0x162   : > { %v4130_v2 = vpop.f32.mrb[31].mxu1  ;;  %v4008_v30 = vpop.f32.mrb[24].mxu0  ;;  %v1442_v52 = vsel %vm1388_vm3, %v1440_v55, %v1441_v54 }
 0x163   : > { %v5766_v17 = vadd.f32 %v4130_v2, %v4129_v11  ;;  %v4009_v42 = vpop.f32.mrb[25].mxu0 }
 0x164   : > { %4501 = vmatmul.mubr.bf16.gmra.mrb[8].mxu1 %v6021_v50  ;;  %v5769_v63 = vadd.f32 %v4009_v42, %v4008_v30  ;;  %v4011_v61 = vpop.f32.mrb[26].mxu0 }
 0x165   : > { %4504 = vmatprep.mubr.bf16.mxu1 %v6022_v39  ;;  %v4012_v26 = vpop.f32.mrb[27].mxu0 }
 0x166   : > { %v5772_v57 = vadd.f32 %v4012_v26, %v4011_v61 }
 0x167   : > { %v4132_v4 = vpop.f32.mrb[32].mxu1  ;;  %2820 = vmatmul.mubr.bf16.gmra.mrb[132].mxu0 %v5547_v47 }
 0x168   : > { %v4133_v28 = vpop.f32.mrb[33].mxu1  ;;  %2827 = vmatprep.mubr.bf16.mxu0 %v5583_v49 }
 0x169   : > { %v5776_v50 = vadd.f32 %v4133_v28, %v4132_v4  ;;  %v4135_v7 = vpop.f32.mrb[34].mxu1 }
 0x16a   : > { %v4136_v44 = vpop.f32.mrb[35].mxu1  ;;  %v4014_v38 = vpop.f32.mrb[28].mxu0 }
 0x16b   : > { %v5779_v5 = vadd.f32 %v4136_v44, %v4135_v7  ;;  %v4015_v0 = vpop.f32.mrb[29].mxu0 }
 0x16c   : > { %4505 = vmatmul.mubr.bf16.gmra.mrb[12].mxu1 %v1442_v52  ;;  %v5781_v32 = vadd.f32 %v4015_v0, %v4014_v38  ;;  %v4017_v24 = vpop.f32.mrb[30].mxu0 }
 0x16d   : > { %v4018_v47 = vpop.f32.mrb[31].mxu0 }
 0x16e   : > { %v5784_v49 = vadd.f32 %v4018_v47, %v4017_v24 }
 0x16f   : > { %v4138_v25 = vpop.f32.mrb[36].mxu1  ;;  %2828 = vmatmul.mubr.bf16.gmra.mrb[136].mxu0 %v5560_v13 }
 0x170   : > { %v4139_v29 = vpop.f32.mrb[37].mxu1  ;;  %2835 = vmatprep.mubr.bf16.mxu0 %v1315_v34 }
 0x171   : > { %v5787_v22 = vadd.f32 %v4139_v29, %v4138_v25  ;;  %v4141_v20 = vpop.f32.mrb[38].mxu1 }
 0x172   : > { %v4142_v35 = vpop.f32.mrb[39].mxu1  ;;  %v4020_v18 = vpop.f32.mrb[32].mxu0 }
 0x173   : > { %v5789_v19 = vadd.f32 %v4142_v35, %v4141_v20  ;;  %v4021_v53 = vpop.f32.mrb[33].mxu0 }
 0x174   : > { %v4022_v40 = vadd.f32 %v4021_v53, %v4020_v18  ;;  %v4023_v11 = vpop.f32.mrb[34].mxu0 }
 0x175   : > { %v4024_v33 = vpop.f32.mrb[35].mxu0 }
 0x176   : > { %v4025_v36 = vadd.f32 %v4024_v33, %v4023_v11 }
 0x177   : > { %v4144_v2 = vpop.f32.mrb[40].mxu1  ;;  %2836 = vmatmul.mubr.bf16.gmra.mrb[140].mxu0 %v3508_v8 }
 0x178   : > { %v4145_v12 = vpop.f32.mrb[41].mxu1 }
 0x179   : > { %v5791_v30 = vadd.f32 %v4145_v12, %v4144_v2  ;;  %v4147_v13 = vpop.f32.mrb[42].mxu1 }
 0x17a   : > { %v4148_v42 = vpop.f32.mrb[43].mxu1  ;;  %v4026_v61 = vpop.f32.mrb[36].mxu0 }
 0x17b   : > { %v5793_v39 = vadd.f32 %v4148_v42, %v4147_v13  ;;  %v4027_v55 = vpop.f32.mrb[37].mxu0 }
 0x17c   : > { %v4028_v54 = vadd.f32 %v4027_v55, %v4026_v61  ;;  %v4029_v26 = vpop.f32.mrb[38].mxu0 }
 0x17d   : > { %v4030_v48 = vpop.f32.mrb[39].mxu0 }
 0x17e   : > { %v4031_v56 = vadd.f32 %v4030_v48, %v4029_v26 }
 0x17f   : > { %v4150_v21 = vpop.f32.mrb[44].mxu1 }
 0x180   : > { %v4151_v4 = vpop.f32.mrb[45].mxu1 }
 0x181   : > { %v5795_v28 = vadd.f32 %v4151_v4, %v4150_v21  ;;  %v4153_v7 = vpop.f32.mrb[46].mxu1 }
 0x182   : > { %v4154_v52 = vpop.f32.mrb[47].mxu1  ;;  %v4032_v8 = vpop.f32.mrb[40].mxu0 }
 0x183   : > { %v5797_v44 = vadd.f32 %v4154_v52, %v4153_v7  ;;  %v4033_v37 = vpop.f32.mrb[41].mxu0 }
 0x184   : > { %v4034_v59 = vadd.f32 %v4033_v37, %v4032_v8  ;;  %v4035_v38 = vpop.f32.mrb[42].mxu0 }
 0x185   : > { %v4036_v0 = vpop.f32.mrb[43].mxu0 }
 0x186   : > { %v4037_v24 = vadd.f32 %v4036_v0, %v4035_v38 }
 0x187   : > { %v4156_v47 = vpop.f32.mrb[48].mxu1 }
 0x188   : > { %v4157_v34 = vpop.f32.mrb[49].mxu1 }
 0x189   : > { %v4158_v25 = vadd.f32 %v4157_v34, %v4156_v47  ;;  %v4159_v29 = vpop.f32.mrb[50].mxu1 }
 0x18a   : > { %v4160_v20 = vpop.f32.mrb[51].mxu1  ;;  %v4038_v35 = vpop.f32.mrb[44].mxu0 }
 0x18b   : > { %v5799_v18 = vadd.f32 %v4158_v25, %v4022_v40  ;;  %v4161_v53 = vadd.f32 %v4160_v20, %v4159_v29  ;;  %v4039_v11 = vpop.f32.mrb[45].mxu0 }
 0x18c   : > { %v4040_v33 = vadd.f32 %v4039_v11, %v4038_v35  ;;  %v4041_v2 = vpop.f32.mrb[46].mxu0 }
 0x18d   : > { %v5801_v12 = vadd.f32 %v4161_v53, %v4025_v36  ;;  %v4042_v13 = vpop.f32.mrb[47].mxu0 }
 0x18e   : > { %v4043_v42 = vadd.f32 %v4042_v13, %v4041_v2 }
 0x18f   : > { %v4162_v61 = vpop.f32.mrb[52].mxu1 }
 0x190   : > { %v4163_v55 = vpop.f32.mrb[53].mxu1 }
 0x191   : > { %v4164_v26 = vadd.f32 %v4163_v55, %v4162_v61  ;;  %v4165_v48 = vpop.f32.mrb[54].mxu1 }
 0x192   : > { %v4166_v21 = vpop.f32.mrb[55].mxu1  ;;  %v4044_v4 = vpop.f32.mrb[48].mxu0 }
 0x193   : > { %v5803_v7 = vadd.f32 %v4164_v26, %v4028_v54  ;;  %v4167_v52 = vadd.f32 %v4166_v21, %v4165_v48  ;;  %v4045_v8 = vpop.f32.mrb[49].mxu0 }
 0x194   : > { %v4046_v40 = vadd.f32 %v4045_v8, %v4044_v4  ;;  %v4047_v37 = vpop.f32.mrb[50].mxu0 }
 0x195   : > { %v5805_v38 = vadd.f32 %v4167_v52, %v4031_v56  ;;  %v4048_v0 = vpop.f32.mrb[51].mxu0 }
 0x196   : > { %v4049_v47 = vadd.f32 %v4048_v0, %v4047_v37 }
 0x197   : > { %v4168_v36 = vpop.f32.mrb[56].mxu1 }
 0x198   : > { %v4169_v34 = vpop.f32.mrb[57].mxu1 }
 0x199   : > { %v4170_v25 = vadd.f32 %v4169_v34, %v4168_v36  ;;  %v4171_v29 = vpop.f32.mrb[58].mxu1 }
 0x19a   : > { %v4172_v20 = vpop.f32.mrb[59].mxu1  ;;  %v4050_v35 = vpop.f32.mrb[52].mxu0 }
 0x19b   : > { %v5807_v53 = vadd.f32 %v4170_v25, %v4034_v59  ;;  %v4173_v11 = vadd.f32 %v4172_v20, %v4171_v29  ;;  %v4051_v2 = vpop.f32.mrb[53].mxu0 }
 0x19c   : > { %v4052_v54 = vadd.f32 %v4051_v2, %v4050_v35  ;;  %v4053_v13 = vpop.f32.mrb[54].mxu0 }
 0x19d   : > { %v5809_v61 = vadd.f32 %v4173_v11, %v4037_v24  ;;  %v4054_v55 = vpop.f32.mrb[55].mxu0 }
 0x19e   : > { %v4055_v26 = vadd.f32 %v4054_v55, %v4053_v13 }
 0x19f   : > { %6023 = vst [vmem:[#allocation3_spill] sm:$0xff] %v5809_v61  ;;  %v4174_v56 = vpop.f32.mrb[60].mxu1 }
 0x1a0   : > { %v4175_v48 = vpop.f32.mrb[61].mxu1 }
 0x1a1   : > { %v4176_v21 = vadd.f32 %v4175_v48, %v4174_v56  ;;  %v4177_v4 = vpop.f32.mrb[62].mxu1 }
 0x1a2   : > { %v4178_v52 = vpop.f32.mrb[63].mxu1  ;;  %v4056_v8 = vpop.f32.mrb[56].mxu0 }
 0x1a3   : > { %v5811_v37 = vadd.f32 %v4176_v21, %v4040_v33  ;;  %v4179_v0 = vadd.f32 %v4178_v52, %v4177_v4  ;;  %v4057_v36 = vpop.f32.mrb[57].mxu0 }
 0x1a4   : > { %v4058_v59 = vadd.f32 %v4057_v36, %v4056_v8  ;;  %v4059_v34 = vpop.f32.mrb[58].mxu0 }
 0x1a5   : > { %v5813_v25 = vadd.f32 %v4179_v0, %v4043_v42  ;;  %v4060_v29 = vpop.f32.mrb[59].mxu0 }
 0x1a6   : > { %v4061_v20 = vadd.f32 %v4060_v29, %v4059_v34 }
 0x1a7   : > { %6024 = vst [vmem:[#allocation4_spill] sm:$0xff] %v5813_v25  ;;  %v4180_v24 = vpop.f32.mrb[64].mxu1 }
 0x1a8   : > { %v4181_v35 = vpop.f32.mrb[65].mxu1 }
 0x1a9   : > { %v4182_v11 = vadd.f32 %v4181_v35, %v4180_v24  ;;  %v4183_v2 = vpop.f32.mrb[66].mxu1 }
 0x1aa   : > { %v4184_v13 = vpop.f32.mrb[67].mxu1  ;;  %v4062_v55 = vpop.f32.mrb[60].mxu0 }
 0x1ab   : > { %v5815_v56 = vadd.f32 %v4182_v11, %v4046_v40  ;;  %v4185_v48 = vadd.f32 %v4184_v13, %v4183_v2  ;;  %v4063_v61 = vpop.f32.mrb[61].mxu0 }
 0x1ac   : > { %v4064_v33 = vadd.f32 %v4063_v61, %v4062_v55  ;;  %v4065_v21 = vpop.f32.mrb[62].mxu0 }
 0x1ad   : > { %v5817_v4 = vadd.f32 %v4185_v48, %v4049_v47  ;;  %v4066_v52 = vpop.f32.mrb[63].mxu0 }
 0x1ae   : > { %v4067_v8 = vadd.f32 %v4066_v52, %v4065_v21 }
 0x1af   : > { %v4186_v42 = vpop.f32.mrb[68].mxu1 }
 0x1b0   : > { %v4187_v0 = vpop.f32.mrb[69].mxu1 }
 0x1b1   : > { %v4188_v36 = vadd.f32 %v4187_v0, %v4186_v42  ;;  %v4189_v34 = vpop.f32.mrb[70].mxu1 }
 0x1b2   : > { %v4190_v29 = vpop.f32.mrb[71].mxu1  ;;  %v4382_v25 = vpop.f32.mrb[64].mxu0 }
 0x1b3   : > { %v5819_v24 = vadd.f32 %v4188_v36, %v4052_v54  ;;  %v4191_v35 = vadd.f32 %v4190_v29, %v4189_v34  ;;  %v1906_v40 = vadd.f32 %v4382_v25, %v5702_v14  ;;  %v1897_v11 = vpop.f32.mrb[65].mxu0 }
 0x1b4   : > { %v1898_v2 = vadd.f32 %v5690_v16, %v1897_v11  ;;  %v4383_v61 = vpop.f32.mrb[66].mxu0 }
 0x1b5   : > { %v5823_v13 = vadd.f32 %v4191_v35, %v4055_v26  ;;  %v5826_v47 = vadd.f32 %v5740_v31, %v1906_v40  ;;  %v1909_v55 = vadd.f32 %v4383_v61, %v5706_v51  ;;  %v1900_v48 = vpop.f32.mrb[67].mxu0 }
 0x1b6   : > { %v2203_v21 = vadd.f32 %v5728_v41, %v1898_v2  ;;  %v1901_v54 = vadd.f32 %v5694_v43, %v1900_v48 }
 0x1b7   : > { %v4192_v52 = vpop.f32.mrb[72].mxu1  ;;  %v5832_v42 = vadd.f32 %v5742_v15, %v1909_v55 }
 0x1b8   : > { %v4193_v14 = vpop.f32.mrb[73].mxu1  ;;  %v2206_v16 = vadd.f32 %v5732_v6, %v1901_v54 }
 0x1b9   : > { %v4194_v25 = vadd.f32 %v4193_v14, %v4192_v52  ;;  %v4195_v26 = vpop.f32.mrb[74].mxu1 }
 0x1ba   : > { %v4196_v0 = vpop.f32.mrb[75].mxu1  ;;  %v4386_v36 = vpop.f32.mrb[68].mxu0 }
 0x1bb   : > { %v5835_v31 = vadd.f32 %v4194_v25, %v4058_v59  ;;  %v4197_v34 = vadd.f32 %v4196_v0, %v4195_v26  ;;  %v1922_v51 = vadd.f32 %v4386_v36, %v5730_v58  ;;  %v1913_v29 = vpop.f32.mrb[69].mxu0 }
 0x1bc   : > { %v1914_v41 = vadd.f32 %v5717_v1, %v1913_v29  ;;  %v4387_v43 = vpop.f32.mrb[70].mxu0 }
 0x1bd   : > { %v5839_v35 = vadd.f32 %v4197_v34, %v4061_v20  ;;  %v5842_v15 = vadd.f32 %v5764_v60, %v1922_v51  ;;  %v1925_v6 = vadd.f32 %v4387_v43, %v5735_v10  ;;  %v1916_v40 = vpop.f32.mrb[71].mxu0 }
 0x1be   : > { %v2219_v11 = vadd.f32 %v5752_v3, %v1914_v41  ;;  %v1917_v59 = vadd.f32 %v5720_v62, %v1916_v40 }
 0x1bf   : > { %v4198_v2 = vpop.f32.mrb[76].mxu1  ;;  %v5848_v61 = vadd.f32 %v5766_v17, %v1925_v6 }
 0x1c0   : > { %v4199_v58 = vpop.f32.mrb[77].mxu1  ;;  %v2222_v1 = vadd.f32 %v5754_v46, %v1917_v59 }
 0x1c1   : > { %v4200_v55 = vadd.f32 %v4199_v58, %v4198_v2  ;;  %v4201_v20 = vpop.f32.mrb[78].mxu1 }
 0x1c2   : > { %v4202_v48 = vpop.f32.mrb[79].mxu1  ;;  %v4390_v54 = vpop.f32.mrb[72].mxu0 }
 0x1c3   : > { %v5851_v60 = vadd.f32 %v4200_v55, %v4064_v33  ;;  %v4203_v52 = vadd.f32 %v4202_v48, %v4201_v20  ;;  %v1938_v10 = vadd.f32 %v4390_v54, %v5757_v27  ;;  %v1929_v14 = vpop.f32.mrb[73].mxu0 }
 0x1c4   : > { %v1930_v3 = vadd.f32 %v5745_v45, %v1929_v14  ;;  %v4391_v62 = vpop.f32.mrb[74].mxu0 }
 0x1c5   : > { %v5855_v25 = vadd.f32 %v4203_v52, %v4067_v8  ;;  %v5858_v17 = vadd.f32 %v5787_v22, %v1938_v10  ;;  %v1941_v46 = vadd.f32 %v4391_v62, %v5760_v23  ;;  %v1932_v26 = vpop.f32.mrb[75].mxu0 }
 0x1c6   : > { %v2235_v0 = vadd.f32 %v5776_v50, %v1930_v3  ;;  %v1933_v33 = vadd.f32 %v5748_v9, %v1932_v26 }
 0x1c7   : > { %v2246_v36 = vadd.f32 %v5789_v19, %v1941_v46 }
 0x1c8   : > { %v2238_v27 = vadd.f32 %v5779_v5, %v1933_v33 }
 0x1ca   : > { %v4394_v34 = vpop.f32.mrb[76].mxu0 }
 0x1cb   : > { %v1954_v45 = vadd.f32 %v4394_v34, %v5781_v32  ;;  %v1945_v51 = vpop.f32.mrb[77].mxu0 }
 0x1cc   : > { %v1946_v8 = vadd.f32 %v5769_v63, %v1945_v51  ;;  %v4395_v29 = vpop.f32.mrb[78].mxu0 }
 0x1cd   : > { %v5868_v22 = vadd.f32 %v5795_v28, %v1954_v45  ;;  %v1957_v23 = vadd.f32 %v4395_v29, %v5784_v49  ;;  %v1948_v41 = vpop.f32.mrb[79].mxu0 }
 0x1ce   : > { %v2251_v50 = vadd.f32 %v5791_v30, %v1946_v8  ;;  %v1949_v9 = vadd.f32 %v5772_v57, %v1948_v41 }
 0x1cf   : > { %v5874_v19 = vadd.f32 %v5797_v44, %v1957_v23 }
 0x1d0   : > { %v2254_v5 = vadd.f32 %v5793_v39, %v1949_v9 }
 0x1d2   : > { %v4244_v32 = vpop.f32.mrb[80].mxu0 }
 0x1d3   : > { %v4245_v43 = vpop.f32.mrb[81].mxu0 }
 0x1d4   : > { %v4246_v6 = vadd.f32 %v4245_v43, %v4244_v32  ;;  %v4247_v63 = vpop.f32.mrb[82].mxu0 }
 0x1d5   : > { %v4248_v40 = vpop.f32.mrb[83].mxu0 }
 0x1d6   : > { %v4249_v59 = vadd.f32 %v4248_v40, %v4247_v63  ;;  %v4530_v28 = vadd.f32 %v4246_v6, %v2203_v21 }
 0x1d8   : > { %v4538_v2 = vadd.f32 %v4249_v59, %v2206_v16 }
 0x1da   : > { %v4250_v58 = vpop.f32.mrb[84].mxu0 }
 0x1db   : > { %v4251_v49 = vpop.f32.mrb[85].mxu0 }
 0x1dc   : > { %v4252_v55 = vadd.f32 %v4251_v49, %v4250_v58  ;;  %v4253_v20 = vpop.f32.mrb[86].mxu0 }
 0x1dd   : > { %v4254_v30 = vpop.f32.mrb[87].mxu0 }
 0x1de   : > { %v4255_v48 = vadd.f32 %v4254_v30, %v4253_v20  ;;  %v4526_v57 = vadd.f32 %v4252_v55, %v5826_v47 }
 0x1e0   : > { %v4534_v44 = vadd.f32 %v4255_v48, %v5832_v42 }
 0x1e2   : > { %v4256_v54 = vpop.f32.mrb[88].mxu0 }
 0x1e3   : > { %v4257_v39 = vpop.f32.mrb[89].mxu0 }
 0x1e4   : > { %v4258_v52 = vadd.f32 %v4257_v39, %v4256_v54  ;;  %v4259_v10 = vpop.f32.mrb[90].mxu0  ;;  %v5901_v39 = vld [vmem:[%s6011_s4] ss:$0 sm:$0xff] }
 0x1e5   : > { %v4260_v14 = vpop.f32.mrb[91].mxu0 }
 0x1e6   : > { %v4261_v3 = vadd.f32 %v4260_v14, %v4259_v10  ;;  %v5879_v62 = vadd.f32 %v4258_v52, %v2219_v11 }
 0x1e8   : > { %v5881_v21 = vadd.f32 %v4261_v3, %v2222_v1 }
 0x1ea   : > { %v4262_v16 = vpop.f32.mrb[92].mxu0 }
 0x1eb   : > { %v4263_v46 = vpop.f32.mrb[93].mxu0 }
 0x1ec   : > { %v4264_v26 = vadd.f32 %v4263_v46, %v4262_v16  ;;  %v4265_v33 = vpop.f32.mrb[94].mxu0 }
 0x1ed   : > { %v4266_v34 = vpop.f32.mrb[95].mxu0 }
 0x1ee   : > { %v4267_v45 = vadd.f32 %v4266_v34, %v4265_v33  ;;  %v4542_v47 = vadd.f32 %v4264_v26, %v5842_v15 }
 0x1f0   : > { %v5885_v42 = vadd.f32 %v4267_v45, %v5848_v61 }
 0x1f2   : > { %v4268_v51 = vpop.f32.mrb[96].mxu0 }
 0x1f3   : > { %v4269_v8 = vpop.f32.mrb[97].mxu0 }
 0x1f4   : > { %v4270_v29 = vadd.f32 %v4269_v8, %v4268_v51  ;;  %v4271_v23 = vpop.f32.mrb[98].mxu0 }
 0x1f5   : > { %v4272_v41 = vpop.f32.mrb[99].mxu0 }
 0x1f6   : > { %v4273_v11 = vadd.f32 %v4272_v41, %v4271_v23  ;;  %v5887_v9 = vadd.f32 %v4270_v29, %v2235_v0 }
 0x1f8   : > { %v5889_v1 = vadd.f32 %v4273_v11, %v2238_v27 }
 0x1fa   : > { %v4274_v32 = vpop.f32.mrb[100].mxu0 }
 0x1fb   : > { %v4275_v43 = vpop.f32.mrb[101].mxu0 }
 0x1fc   : > { %v4276_v6 = vadd.f32 %v4275_v43, %v4274_v32  ;;  %v4277_v63 = vpop.f32.mrb[102].mxu0 }
 0x1fd   : > { %v4278_v40 = vpop.f32.mrb[103].mxu0 }
 0x1fe   : > { %v4279_v59 = vadd.f32 %v4278_v40, %v4277_v63  ;;  %v5892_v15 = vadd.f32 %v4276_v6, %v5858_v17 }
 0x200   : > { %v5894_v61 = vadd.f32 %v4279_v59, %v2246_v36 }
 0x202   : > { %v4280_v58 = vpop.f32.mrb[104].mxu0 }
 0x203   : > { %v4281_v49 = vpop.f32.mrb[105].mxu0 }
 0x204   : > { %v4282_v55 = vadd.f32 %v4281_v49, %v4280_v58  ;;  %v4283_v20 = vpop.f32.mrb[106].mxu0 }
 0x205   : > { %v4284_v30 = vpop.f32.mrb[107].mxu0 }
 0x206   : > { %v4285_v0 = vadd.f32 %v4284_v30, %v4283_v20  ;;  %v5896_v27 = vadd.f32 %v4282_v55, %v2251_v50 }
 0x207   : > { %v4478_v48 = vpop.f32.mrb[80].mxu1 }
 0x208   : > { %v4527_v54 = vadd.f32 %v4526_v57, %v4478_v48  ;;  %v2878_v17 = vpop.f32.mrb[81].mxu1  ;;  %v5903_v10 = vadd.f32 %v4285_v0, %v2254_v5 }
 0x209   : > { %v4531_v52 = vadd.f32 %v4530_v28, %v2878_v17  ;;  %v4479_v36 = vpop.f32.mrb[82].mxu1 }
 0x20a   : > { %v4535_v14 = vadd.f32 %v4534_v44, %v4479_v36  ;;  %v2881_v3 = vpop.f32.mrb[83].mxu1  ;;  %v4286_v16 = vpop.f32.mrb[108].mxu0  ;;  %v3046_v57 = vadd.f32 %v4527_v54, %v5901_v39 }
 0x20b   : > { %v3044_v46 = vadd.f32 %v4531_v52, %v5901_v39  ;;  %v4539_v26 = vadd.f32 %v4538_v2, %v2881_v3  ;;  %v4287_v50 = vpop.f32.mrb[109].mxu0 }
 0x20c   : > { %v3047_v33 = vadd.f32 %v4535_v14, %v5901_v39  ;;  %v4288_v34 = vadd.f32 %v4287_v50, %v4286_v16  ;;  %v4289_v45 = vpop.f32.mrb[110].mxu0  ;;  %v3275_v11 = vmul.f32 %v3046_v57, %v3046_v57 }
 0x20d   : > { %v3045_v5 = vadd.f32 %v4539_v26, %v5901_v39  ;;  %v4290_v28 = vpop.f32.mrb[111].mxu0  ;;  %v3273_v44 = vmul.f32 %v3044_v46, %v3044_v46 }
 0x20e   : > { %v3854_v2 = vpack.c.bf16 %v3047_v33, %v3046_v57  ;;  %v4291_v51 = vadd.f32 %v4290_v28, %v4289_v45  ;;  %v5918_v6 = vadd.f32 %v4288_v34, %v5868_v22  ;;  %v3276_v55 = vmul.f32 %v3047_v33, %v3047_v33 }
 0x20f   : > { %v3849_v8 = vpack.c.bf16 %v3045_v5, %v3044_v46  ;;  %v3236_v29 = vadd.f32 %v3045_v5, %v3044_v46  ;;  %v3274_v23 = vmul.f32 %v3045_v5, %v3045_v5  ;;  %v4482_v41 = vpop.f32.mrb[84].mxu1 }
 0x210   : > { %3941 = vst [vmem:[%s5913_s14 + $0x8] sm:$0xff] %v3854_v2   ;;  %v4543_v32 = vadd.f32 %v4542_v47, %v4482_v41  ;;  %v2894_v43 = vpop.f32.mrb[85].mxu1  ;;  %v5923_v49 = vadd.f32 %v4291_v51, %v5874_v19 }
 0x211   : > { %3850 = vst [vmem:[%s5913_s14] sm:$0xff] %v3849_v8   ;;  %v3237_v63 = vadd.f32 %v3236_v29, %v3046_v57  ;;  %v3305_v40 = vadd.f32 %v3274_v23, %v3273_v44  ;;  %v4547_v59 = vadd.f32 %v5879_v62, %v2894_v43  ;;  %v4483_v58 = vpop.f32.mrb[86].mxu1 }
 0x212   : > { %v4551_v20 = vadd.f32 %v5885_v42, %v4483_v58  ;;  %v2897_v30 = vpop.f32.mrb[87].mxu1  ;;  %v4292_v48 = vpop.f32.mrb[112].mxu0  ;;  %v3050_v52 = vadd.f32 %v4543_v32, %v5901_v39 }
 0x213   : > { %v3306_v0 = vadd.f32 %v3305_v40, %v3275_v11  ;;  %v3048_v47 = vadd.f32 %v4547_v59, %v5901_v39  ;;  %v3238_v54 = vadd.f32 %v3237_v63, %v3047_v33  ;;  %v4555_v22 = vadd.f32 %v5881_v21, %v2897_v30  ;;  %v4293_v17 = vpop.f32.mrb[113].mxu0 }
 0x214   : > { %v3051_v62 = vadd.f32 %v4551_v20, %v5901_v39  ;;  %v4294_v36 = vadd.f32 %v4293_v17, %v4292_v48  ;;  %v4295_v19 = vpop.f32.mrb[114].mxu0  ;;  %v3279_v29 = vmul.f32 %v3050_v52, %v3050_v52 }
 0x215   : > { %v3239_v14 = vadd.f32 %v3238_v54, %v3048_v47  ;;  %v3277_v3 = vmul.f32 %v3048_v47, %v3048_v47  ;;  %v3307_v16 = vadd.f32 %v3306_v0, %v3276_v55  ;;  %v4296_v42 = vpop.f32.mrb[115].mxu0  ;;  %v3049_v26 = vadd.f32 %v4555_v22, %v5901_v39 }
 0x216   : > { %v3864_v46 = vpack.c.bf16 %v3051_v62, %v3050_v52  ;;  %v4297_v50 = vadd.f32 %v4296_v42, %v4295_v19  ;;  %v5932_v21 = vadd.f32 %v5799_v18, %v4294_v36  ;;  %v3280_v32 = vmul.f32 %v3051_v62, %v3051_v62 }
 0x217   : > { %v3308_v57 = vadd.f32 %v3307_v16, %v3277_v3  ;;  %v4486_v33 = vpop.f32.mrb[88].mxu1  ;;  %v3859_v34 = vpack.c.bf16 %v3049_v26, %v3048_v47  ;;  %v3240_v45 = vadd.f32 %v3239_v14, %v3049_v26  ;;  %v3278_v5 = vmul.f32 %v3049_v26, %v3049_v26 }
 0x218   : > { %3943 = vst [vmem:[%s5913_s14 + $0x18] sm:$0xff] %v3864_v46   ;;  %v4559_v28 = vadd.f32 %v5892_v15, %v4486_v33  ;;  %v2910_v44 = vpop.f32.mrb[89].mxu1  ;;  %v5938_v8 = vadd.f32 %v5801_v12, %v4297_v50 }
 0x219   : > { %v4563_v2 = vadd.f32 %v5887_v9, %v2910_v44  ;;  %v4487_v51 = vpop.f32.mrb[90].mxu1  ;;  %3942 = vst [vmem:[%s5913_s14 + $0x10] sm:$0xff] %v3859_v34   ;;  %v3241_v23 = vadd.f32 %v3240_v45, %v3050_v52  ;;  %v3309_v41 = vadd.f32 %v3308_v57, %v3278_v5 }
 0x21a   : > { %v4567_v18 = vadd.f32 %v5894_v61, %v4487_v51  ;;  %v2913_v11 = vpop.f32.mrb[91].mxu1  ;;  %v4298_v43 = vpop.f32.mrb[116].mxu0  ;;  %v3054_v9 = vadd.f32 %v4559_v28, %v5901_v39 }
 0x21b   : > { %v3052_v63 = vadd.f32 %v4563_v2, %v5901_v39  ;;  %v4571_v15 = vadd.f32 %v5889_v1, %v2913_v11  ;;  %v3310_v40 = vadd.f32 %v3309_v41, %v3279_v29  ;;  %v4299_v59 = vpop.f32.mrb[117].mxu0  ;;  %v3242_v58 = vadd.f32 %v3241_v23, %v3051_v62 }
 0x21c   : > { %v3055_v12 = vadd.f32 %v4567_v18, %v5901_v39  ;;  %v4300_v55 = vadd.f32 %v4299_v59, %v4298_v43  ;;  %v4301_v20 = vpop.f32.mrb[118].mxu0  ;;  %v3283_v26 = vmul.f32 %v3054_v9, %v3054_v9 }
 0x21d   : > { %v3281_v30 = vmul.f32 %v3052_v63, %v3052_v63  ;;  %v3053_v61 = vadd.f32 %v4571_v15, %v5901_v39  ;;  %v4302_v0 = vpop.f32.mrb[119].mxu0  ;;  %v3243_v48 = vadd.f32 %v3242_v58, %v3052_v63  ;;  %v3311_v47 = vadd.f32 %v3310_v40, %v3280_v32 }
 0x21e   : > { %v3874_v54 = vpack.c.bf16 %v3055_v12, %v3054_v9  ;;  %v4303_v22 = vadd.f32 %v4302_v0, %v4301_v20  ;;  %v4589_v36 = vadd.f32 %v5803_v7, %v4300_v55  ;;  %v3284_v45 = vmul.f32 %v3055_v12, %v3055_v12 }
 0x21f   : > { %v3869_v1 = vpack.c.bf16 %v3053_v61, %v3052_v63  ;;  %v3282_v17 = vmul.f32 %v3053_v61, %v3053_v61  ;;  %v4490_v52 = vpop.f32.mrb[92].mxu1  ;;  %v3312_v62 = vadd.f32 %v3311_v47, %v3281_v30  ;;  %v3244_v19 = vadd.f32 %v3243_v48, %v3053_v61  ;;  %v6025_v30 = vld [vmem:[#allocation3_spill] sm:$0xff] }
 0x220   : > { %3945 = vst [vmem:[%s5913_s14 + $0x28] sm:$0xff] %v3874_v54   ;;  %v4575_v14 = vadd.f32 %v5918_v6, %v4490_v52  ;;  %v2926_v3 = vpop.f32.mrb[93].mxu1  ;;  %v4595_v46 = vadd.f32 %v5805_v38, %v4303_v22 }
 0x221   : > { %3944 = vst [vmem:[%s5913_s14 + $0x20] sm:$0xff] %v3869_v1   ;;  %v4579_v16 = vadd.f32 %v5896_v27, %v2926_v3  ;;  %v4491_v42 = vpop.f32.mrb[94].mxu1  ;;  %v3245_v50 = vadd.f32 %v3244_v19, %v3054_v9  ;;  %v3313_v57 = vadd.f32 %v3312_v62, %v3282_v17 }
 0x222   : > { %v4583_v33 = vadd.f32 %v5923_v49, %v4491_v42  ;;  %v2929_v34 = vpop.f32.mrb[95].mxu1  ;;  %v4304_v7 = vpop.f32.mrb[120].mxu0  ;;  %v3058_v2 = vadd.f32 %v4575_v14, %v5901_v39 }
 0x223   : > { %v3056_v5 = vadd.f32 %v4579_v16, %v5901_v39  ;;  %v4587_v28 = vadd.f32 %v5903_v10, %v2929_v34  ;;  %v3314_v6 = vadd.f32 %v3313_v57, %v3283_v26  ;;  %v4305_v44 = vpop.f32.mrb[121].mxu0  ;;  %v3246_v27 = vadd.f32 %v3245_v50, %v3055_v12 }
 0x224   : > { %v3059_v38 = vadd.f32 %v4583_v33, %v5901_v39  ;;  %v4306_v51 = vadd.f32 %v4305_v44, %v4304_v7  ;;  %v4307_v29 = vpop.f32.mrb[122].mxu0  ;;  %v3287_v0 = vmul.f32 %v3058_v2, %v3058_v2 }
 0x225   : > { %v3285_v23 = vmul.f32 %v3056_v5, %v3056_v5  ;;  %v3057_v49 = vadd.f32 %v4587_v28, %v5901_v39  ;;  %v4308_v41 = vpop.f32.mrb[123].mxu0  ;;  %v3247_v18 = vadd.f32 %v3246_v27, %v3056_v5  ;;  %v3315_v11 = vadd.f32 %v3314_v6, %v3284_v45 }
 0x226   : > { %v3884_v32 = vpack.c.bf16 %v3059_v38, %v3058_v2  ;;  %v4309_v43 = vadd.f32 %v4308_v41, %v4307_v29  ;;  %v4604_v40 = vadd.f32 %v5807_v53, %v4306_v51  ;;  %v3288_v1 = vmul.f32 %v3059_v38, %v3059_v38  ;;  %v6026_v51 = vld [vmem:[#allocation4_spill] sm:$0xff] }
 0x227   : > { %v3879_v10 = vpack.c.bf16 %v3057_v49, %v3056_v5  ;;  %v3286_v63 = vmul.f32 %v3057_v49, %v3057_v49  ;;  %v4494_v15 = vpop.f32.mrb[0].mxu1  ;;  %v3316_v59 = vadd.f32 %v3315_v11, %v3285_v23  ;;  %v3248_v9 = vadd.f32 %v3247_v18, %v3057_v49 }
 0x228   : > { %3947 = vst [vmem:[%s5913_s14 + $0x38] sm:$0xff] %v3884_v32   ;;  %v4590_v58 = vadd.f32 %v4589_v36, %v4494_v15  ;;  %v2942_v12 = vpop.f32.mrb[1].mxu1  ;;  %v4610_v61 = vadd.f32 %v6025_v30, %v4309_v43 }
 0x229   : > { %3946 = vst [vmem:[%s5913_s14 + $0x30] sm:$0xff] %v3879_v10   ;;  %v4593_v55 = vadd.f32 %v5932_v21, %v2942_v12  ;;  %v4495_v20 = vpop.f32.mrb[2].mxu1  ;;  %v3249_v48 = vadd.f32 %v3248_v9, %v3058_v2  ;;  %v3317_v47 = vadd.f32 %v3316_v59, %v3286_v63 }
 0x22a   : > { %v4596_v54 = vadd.f32 %v4595_v46, %v4495_v20  ;;  %v2945_v22 = vpop.f32.mrb[3].mxu1  ;;  %v4310_v17 = vpop.f32.mrb[124].mxu0  ;;  %v3062_v19 = vadd.f32 %v4590_v58, %v5901_v39 }
 0x22b   : > { %v3060_v53 = vadd.f32 %v4593_v55, %v5901_v39  ;;  %v4599_v52 = vadd.f32 %v5938_v8, %v2945_v22  ;;  %v3318_v62 = vadd.f32 %v3317_v47, %v3287_v0  ;;  %v4311_v36 = vpop.f32.mrb[125].mxu0  ;;  %v3250_v14 = vadd.f32 %v3249_v48, %v3059_v38 }
 0x22c   : > { %v3063_v21 = vadd.f32 %v4596_v54, %v5901_v39  ;;  %v4312_v3 = vadd.f32 %v4311_v36, %v4310_v17  ;;  %v4313_v16 = vpop.f32.mrb[126].mxu0  ;;  %v3291_v23 = vmul.f32 %v3062_v19, %v3062_v19 }
 0x22d   : > { %v3289_v42 = vmul.f32 %v3060_v53, %v3060_v53  ;;  %v3061_v46 = vadd.f32 %v4599_v52, %v5901_v39  ;;  %v4314_v26 = vpop.f32.mrb[127].mxu0  ;;  %v3251_v50 = vadd.f32 %v3250_v14, %v3060_v53  ;;  %v3319_v57 = vadd.f32 %v3318_v62, %v3288_v1 }
 0x22e   : > { %v3894_v33 = vpack.c.bf16 %v3063_v21, %v3062_v19  ;;  %v4315_v34 = vadd.f32 %v4314_v26, %v4313_v16  ;;  %v4601_v5 = vadd.f32 %v5811_v37, %v4312_v3  ;;  %v3292_v37 = vmul.f32 %v3063_v21, %v3063_v21 }
 0x22f   : > { %v3889_v8 = vpack.c.bf16 %v3061_v46, %v3060_v53  ;;  %v3290_v45 = vmul.f32 %v3061_v46, %v3061_v46  ;;  %v4498_v7 = vpop.f32.mrb[4].mxu1  ;;  %v3320_v28 = vadd.f32 %v3319_v57, %v3289_v42  ;;  %v3252_v6 = vadd.f32 %v3251_v50, %v3061_v46 }
 0x230   : > { %3949 = vst [vmem:[%s5913_s14 + $0x48] sm:$0xff] %v3894_v33   ;;  %v2958_v44 = vpop.f32.mrb[5].mxu1  ;;  %v4602_v2 = vadd.f32 %v4601_v5, %v4498_v7  ;;  %v4607_v29 = vadd.f32 %v6026_v51, %v4315_v34 }
 0x231   : > { %3948 = vst [vmem:[%s5913_s14 + $0x40] sm:$0xff] %v3889_v8   ;;  %v4605_v27 = vadd.f32 %v4604_v40, %v2958_v44  ;;  %v4499_v38 = vpop.f32.mrb[6].mxu1  ;;  %v3253_v49 = vadd.f32 %v3252_v6, %v3062_v19  ;;  %v3321_v41 = vadd.f32 %v3320_v28, %v3290_v45 }
 0x232   : > { %v2961_v18 = vpop.f32.mrb[7].mxu1  ;;  %v4316_v11 = vpop.f32.mrb[128].mxu0  ;;  %v4608_v43 = vadd.f32 %v4607_v29, %v4499_v38  ;;  %v3066_v40 = vadd.f32 %v4602_v2, %v5901_v39 }
 0x233   : > { %v3064_v32 = vadd.f32 %v4605_v27, %v5901_v39  ;;  %v4611_v10 = vadd.f32 %v4610_v61, %v2961_v18  ;;  %v3322_v63 = vadd.f32 %v3321_v41, %v3291_v23  ;;  %v4317_v15 = vpop.f32.mrb[129].mxu0  ;;  %v3254_v59 = vadd.f32 %v3253_v49, %v3063_v21 }
 0x234   : > { %v4318_v9 = vadd.f32 %v4317_v15, %v4316_v11  ;;  %v4319_v58 = vpop.f32.mrb[130].mxu0  ;;  %v3067_v55 = vadd.f32 %v4608_v43, %v5901_v39  ;;  %v3295_v21 = vmul.f32 %v3066_v40, %v3066_v40 }
 0x235   : > { %v3293_v12 = vmul.f32 %v3064_v32, %v3064_v32  ;;  %v4320_v20 = vpop.f32.mrb[131].mxu0  ;;  %v3255_v30 = vadd.f32 %v3254_v59, %v3064_v32  ;;  %v3323_v0 = vadd.f32 %v3322_v63, %v3292_v37  ;;  %v3065_v48 = vadd.f32 %v4611_v10, %v5901_v39 }
 0x236   : > { %v4321_v47 = vadd.f32 %v4320_v20, %v4319_v58  ;;  %v3904_v61 = vpack.c.bf16 %v3067_v55, %v3066_v40  ;;  %v4616_v22 = vadd.f32 %v5815_v56, %v4318_v9  ;;  %v3296_v56 = vmul.f32 %v3067_v55, %v3067_v55 }
 0x237   : > { %v4502_v54 = vpop.f32.mrb[8].mxu1  ;;  %v3324_v1 = vadd.f32 %v3323_v0, %v3293_v12  ;;  %v3899_v17 = vpack.c.bf16 %v3065_v48, %v3064_v32  ;;  %v3256_v53 = vadd.f32 %v3255_v30, %v3065_v48  ;;  %v3294_v52 = vmul.f32 %v3065_v48, %v3065_v48 }
 0x238   : > { %v2974_v62 = vpop.f32.mrb[9].mxu1  ;;  %3951 = vst [vmem:[%s5913_s14 + $0x58] sm:$0xff] %v3904_v61   ;;  %v4622_v14 = vadd.f32 %v5817_v4, %v4321_v47 }
 0x239   : > { %v4617_v36 = vadd.f32 %v4616_v22, %v2974_v62  ;;  %v4503_v19 = vpop.f32.mrb[10].mxu1  ;;  %3950 = vst [vmem:[%s5913_s14 + $0x50] sm:$0xff] %v3899_v17   ;;  %v3257_v3 = vadd.f32 %v3256_v53, %v3066_v40  ;;  %v3325_v16 = vadd.f32 %v3324_v1, %v3294_v52 }
 0x23a   : > { %v2977_v42 = vpop.f32.mrb[11].mxu1  ;;  %v4322_v46 = vpop.f32.mrb[132].mxu0 }
 0x23b   : > { %v3068_v26 = vadd.f32 %v4617_v36, %v5901_v39  ;;  %v4623_v50 = vadd.f32 %v4622_v14, %v2977_v42  ;;  %v3326_v57 = vadd.f32 %v3325_v16, %v3295_v21  ;;  %v4323_v33 = vpop.f32.mrb[133].mxu0  ;;  %v3258_v34 = vadd.f32 %v3257_v3, %v3067_v55 }
 0x23c   : > { %v4324_v8 = vadd.f32 %v4323_v33, %v4322_v46  ;;  %v4325_v45 = vpop.f32.mrb[134].mxu0 }
 0x23d   : > { %v3297_v7 = vmul.f32 %v3068_v26, %v3068_v26  ;;  %v3069_v5 = vadd.f32 %v4623_v50, %v5901_v39  ;;  %v4326_v4 = vpop.f32.mrb[135].mxu0  ;;  %v3259_v28 = vadd.f32 %v3258_v34, %v3068_v26  ;;  %v3327_v6 = vadd.f32 %v3326_v57, %v3296_v56 }
 0x23e   : > { %v4327_v44 = vadd.f32 %v4326_v4, %v4325_v45  ;;  %v4613_v2 = vadd.f32 %v5819_v24, %v4324_v8 }
 0x23f   : > { %v3909_v27 = vpack.c.bf16 %v3069_v5, %v3068_v26  ;;  %v3298_v38 = vmul.f32 %v3069_v5, %v3069_v5  ;;  %v4506_v51 = vpop.f32.mrb[12].mxu1  ;;  %v3328_v29 = vadd.f32 %v3327_v6, %v3297_v7  ;;  %v3260_v23 = vadd.f32 %v3259_v28, %v3069_v5 }
 0x240   : > { %v2990_v49 = vpop.f32.mrb[13].mxu1  ;;  %v4614_v41 = vadd.f32 %v4613_v2, %v4502_v54  ;;  %v4619_v18 = vadd.f32 %v5823_v13, %v4327_v44 }
 0x241   : > { %3952 = vst [vmem:[%s5913_s14 + $0x60] sm:$0xff] %v3909_v27   ;;  %v4507_v11 = vpop.f32.mrb[14].mxu1  ;;  %v3329_v32 = vadd.f32 %v3328_v29, %v3298_v38 }
 0x242   : > { %v2993_v43 = vpop.f32.mrb[15].mxu1  ;;  %v3070_v10 = vadd.f32 %v4614_v41, %v5901_v39  ;;  %v4620_v37 = vadd.f32 %v4619_v18, %v4503_v19  ;;  %v4328_v63 = vpop.f32.mrb[136].mxu0 }
 0x243   : > { %v4329_v15 = vpop.f32.mrb[137].mxu0 }
 0x244   : > { %v3299_v24 = vmul.f32 %v3070_v10, %v3070_v10  ;;  %v3071_v59 = vadd.f32 %v4620_v37, %v5901_v39  ;;  %v3261_v9 = vadd.f32 %v3260_v23, %v3070_v10  ;;  %v4330_v58 = vadd.f32 %v4329_v15, %v4328_v63  ;;  %v4331_v40 = vpop.f32.mrb[138].mxu0 }
 0x245   : > { %v4332_v12 = vpop.f32.mrb[139].mxu0 }
 0x246   : > { %v3914_v55 = vpack.c.bf16 %v3071_v59, %v3070_v10  ;;  %v3300_v20 = vmul.f32 %v3071_v59, %v3071_v59  ;;  %v3330_v13 = vadd.f32 %v3329_v32, %v3299_v24  ;;  %v4333_v30 = vadd.f32 %v4332_v12, %v4331_v40 }
 0x247   : > { %v4628_v0 = vadd.f32 %v5835_v31, %v4330_v58  ;;  %v3262_v48 = vadd.f32 %v3261_v9, %v3071_v59 }
 0x248   : > { %3953 = vst [vmem:[%s5913_s14 + $0x68] sm:$0xff] %v3914_v55   ;;  %v3331_v47 = vadd.f32 %v3330_v13, %v3300_v20  ;;  %v4634_v61 = vadd.f32 %v5839_v35, %v4333_v30 }
 0x249   : > { %v4629_v54 = vadd.f32 %v4628_v0, %v2990_v49 }
 0x24a   : > { %v4635_v22 = vadd.f32 %v4634_v61, %v2993_v43  ;;  %v4334_v1 = vpop.f32.mrb[140].mxu0 }
 0x24b   : > { %v3072_v17 = vadd.f32 %v4629_v54, %v5901_v39  ;;  %v4335_v53 = vpop.f32.mrb[141].mxu0 }
 0x24c   : > { %v3073_v52 = vadd.f32 %v4635_v22, %v5901_v39  ;;  %v4336_v62 = vadd.f32 %v4335_v53, %v4334_v1  ;;  %v4337_v36 = vpop.f32.mrb[142].mxu0 }
 0x24d   : > { %v3263_v19 = vadd.f32 %v3262_v48, %v3072_v17  ;;  %v3301_v14 = vmul.f32 %v3072_v17, %v3072_v17  ;;  %v4338_v21 = vpop.f32.mrb[143].mxu0 }
 0x24e   : > { %v3919_v31 = vpack.c.bf16 %v3073_v52, %v3072_v17  ;;  %v3302_v3 = vmul.f32 %v3073_v52, %v3073_v52  ;;  %v4625_v16 = vadd.f32 %v5851_v60, %v4336_v62  ;;  %v4339_v42 = vadd.f32 %v4338_v21, %v4337_v36 }
 0x24f   : > { %v3332_v35 = vadd.f32 %v3331_v47, %v3301_v14  ;;  %v3264_v46 = vadd.f32 %v3263_v19, %v3073_v52 }
 0x250   : > { %3954 = vst [vmem:[%s5913_s14 + $0x70] sm:$0xff] %v3919_v31   ;;  %v4626_v26 = vadd.f32 %v4625_v16, %v4506_v51  ;;  %v4631_v50 = vadd.f32 %v5855_v25, %v4339_v42 }
 0x251   : > { %v3333_v56 = vadd.f32 %v3332_v35, %v3302_v3 }
 0x252   : > { %v3074_v57 = vadd.f32 %v4626_v26, %v5901_v39  ;;  %v4632_v33 = vadd.f32 %v4631_v50, %v4507_v11 }
 0x254   : > { %v3265_v34 = vadd.f32 %v3264_v46, %v3074_v57  ;;  %v3303_v8 = vmul.f32 %v3074_v57, %v3074_v57  ;;  %v3075_v45 = vadd.f32 %v4632_v33, %v5901_v39 }
 0x256   : > { %v3334_v7 = vadd.f32 %v3333_v56, %v3303_v8  ;;  %v3924_v5 = vpack.c.bf16 %v3075_v45, %v3074_v57  ;;  %v3266_v60 = vadd.f32 %v3265_v34, %v3075_v45  ;;  %v3304_v4 = vmul.f32 %v3075_v45, %v3075_v45 }
 0x258   : > { %3955 = vst [vmem:[%s5913_s14 + $0x78] sm:$0xff] %v3924_v5   ;;  %v3267_v28 = vrot.slane %v3266_v60, 4  ;;  %v3335_v6 = vadd.f32 %v3334_v7, %v3304_v4 }
 0x25a   : > { %v3268_v44 = vadd.f32 %v3267_v28, %v3266_v60  ;;  %v3336_v2 = vrot.slane %v3335_v6, 4 }
 0x25c   : > { %v3269_v27 = vrot.slane %v3268_v44, 2  ;;  %v3337_v25 = vadd.f32 %v3336_v2, %v3335_v6 }
 0x25e   : > { %v3270_v38 = vadd.f32 %v3269_v27, %v3268_v44  ;;  %v3338_v51 = vrot.slane %v3337_v25, 2 }
 0x260   : > { %v3271_v29 = vrot.slane %v3270_v38, 1  ;;  %v3339_v23 = vadd.f32 %v3338_v51, %v3337_v25 }
 0x262   : > { %v3340_v49 = vrot.slane %v3339_v23, 1  ;;  %v3272_v39 = vadd.f32 %v3271_v29, %v3270_v38 }
 0x264   : > { %v3341_v41 = vadd.f32 %v3340_v49, %v3339_v23 }
 0x266   : > { %v3343_v18 = vsel %vm598_vm0, %v3272_v39, %v3341_v41 }
 0x267   : > { %3344 = vst [vmem:[%s262_s17] sm:$0x3] %v3343_v18 }
 0x268 PF: > { %s17_s21 = sadd.s32 1, %s4839_s21  }
 0x269   : > { %p14_p4 = scmp.ge.s32.totalorder %s17_s21, 4  }
 0x26b   :  { %16 = sbr.rel (!%p14_p4) target bundleno = 1 (0x1), region = 86 }

</bundles_post_ra>
